<compile_context>
chip_gen: v7x
topology: tpu7x:2x2x1
jax: 0.10.0
libtpu: 0.0.40
codegen_flags: <defaults>
</compile_context>

<pallas_src>
import jax
import jax.numpy as jnp
from jax.experimental import pallas as pl
from jax.experimental.pallas import tpu as pltpu


D_HIDDEN = 500        # logical fc1 hidden width (as in the PyTorch module)
D_HIDDEN_PAD = 512    # lane-padded hidden width (multiple of 128)
D_OUT = 5
MLP_TK = 2048         # w1 K-tile (streamed over the reduction axis)


def _round_up(x, m):
    return (x + m - 1) // m * m


# ----------------------------------------------------------------------------
# Conv block: ReflectionPad2d(1) + Conv2d(3x3) + bias + ReLU + BatchNorm(eval).
# im2col is layout plumbing done in XLA; the FLOPs run on the MXU in Pallas.
# All samples of both branches are folded onto the lane axis -> one matmul.
# ----------------------------------------------------------------------------
def _conv_mm_kernel(p_ref, w_ref, pk_ref, o_ref):
    # p_ref:  (Cin*9, M) VMEM  im2col patches, M = 2N*H*W on lanes
    # w_ref:  (Cout, Cin*9) VMEM  conv weight reshaped for the MXU
    # pk_ref: (Cout, 3) VMEM  packed [bias, bn_scale, bn_shift]
    # o_ref:  (Cout, M) VMEM  lane-dense output
    y = jnp.dot(w_ref[...], p_ref[...], preferred_element_type=jnp.float32)
    bias = pk_ref[:, 0:1]
    scale = pk_ref[:, 1:2]
    shift = pk_ref[:, 2:3]
    y = jnp.maximum(y + bias, 0.0)          # conv bias + ReLU
    o_ref[...] = y * scale + shift          # folded BatchNorm (eval), post-ReLU
    # TODO(synk): Dropout2d(p=0.2) is identity in eval mode; training-mode
    # channel dropout is intentionally not implemented.


def _im2col_reflect(x):
    """x: (B, C, H, W) -> reflection-pad(1) im2col patches (B, C*9, H*W)."""
    b, c, h, w = x.shape
    xp = jnp.pad(x, ((0, 0), (0, 0), (1, 1), (1, 1)), mode="reflect")
    cols = [xp[:, :, kh:kh + h, kw:kw + w] for kh in range(3) for kw in range(3)]
    p = jnp.stack(cols, axis=2)            # (B, C, 9, H, W): (ci, kh*3+kw) order
    return p.reshape(b, c * 9, h * w)


def conv_relu_bn(x, w, pk):
    """x: (B, Cin, H, W) f32 -> (B, Cout, H, W) f32.  One Pallas matmul."""
    bsz, cin, h, wd = x.shape
    cout = w.shape[0]
    m = bsz * h * wd
    # (B, Cin*9, HW) -> (Cin*9, B*HW): batch folded onto the lane axis.
    patches = _im2col_reflect(x.astype(jnp.float32))
    patches = patches.transpose(1, 0, 2).reshape(cin * 9, m)
    w_mm = w.reshape(cout, cin * 9).astype(jnp.float32)

    out = pl.pallas_call(
        _conv_mm_kernel,
        out_shape=jax.ShapeDtypeStruct((cout, m), jnp.float32),
        grid_spec=pltpu.PrefetchScalarGridSpec(
            num_scalar_prefetch=0,
            grid=(1,),
            in_specs=[
                pl.BlockSpec((cin * 9, m), lambda i: (0, 0)),
                pl.BlockSpec((cout, cin * 9), lambda i: (0, 0)),
                pl.BlockSpec((cout, 3), lambda i: (0, 0)),
            ],
            out_specs=pl.BlockSpec((cout, m), lambda i: (0, 0)),
        ),
        compiler_params=pltpu.CompilerParams(
            dimension_semantics=("arbitrary",)),
    )(patches, w_mm, pk)

    # (Cout, B*HW) -> (B, Cout, H, W) for the next layer / the NCHW flatten.
    return out.reshape(cout, bsz, h, wd).transpose(1, 0, 2, 3)


# ----------------------------------------------------------------------------
# fc1: Linear -> ReLU -> Linear -> ReLU -> Linear, fused.
# w1 and the activation K-tiles stream in bf16 over the (lane-aligned) K axis
# into an f32 VMEM accumulator; w2/w3/biases stay resident (small).
# ----------------------------------------------------------------------------
def _mlp_kernel(x_ref, w1_ref, b1_ref, w2_ref, b2_ref, w3_ref, b3_ref,
                o_ref, acc_ref):
    k = pl.program_id(0)

    @pl.when(k == 0)
    def _():
        acc_ref[...] = jnp.zeros_like(acc_ref)

    # Streamed K-tile of the first (large) matmul: bf16 in, f32 accumulate.
    acc_ref[...] += jnp.dot(x_ref[...], w1_ref[...],
                            preferred_element_type=jnp.float32)

    @pl.when(k == pl.num_programs(0) - 1)
    def _():
        h = jnp.maximum(acc_ref[...] + b1_ref[...], 0.0)
        h = jnp.dot(h, w2_ref[...], preferred_element_type=jnp.float32)
        h = jnp.maximum(h + b2_ref[...], 0.0)
        o_ref[...] = (jnp.dot(h, w3_ref[...],
                              preferred_element_type=jnp.float32)
                      + b3_ref[...])


def mlp(x, w1, b1, w2, b2, w3, b3):
    m, d_in = x.shape
    d_h = w1.shape[1]          # padded hidden width (512)
    d_out = w3.shape[1]

    # Fixed large lane-aligned K-tile; zero-pad the reduction dim if needed
    # (zero rows of w1 / zero features of x contribute nothing).
    tk = min(MLP_TK, _round_up(d_in, 128))
    d_pad = _round_up(d_in, tk)
    kt = d_pad // tk
    if d_pad != d_in:
        x = jnp.pad(x, ((0, 0), (0, d_pad - d_in)))
        w1 = jnp.pad(w1, ((0, d_pad - d_in), (0, 0)))

    # Stream the dominant operands in bf16 (HBM-bound kernel); f32 accumulate.
    x_bf = x.astype(jnp.bfloat16)
    w1_bf = w1.astype(jnp.bfloat16)

    return pl.pallas_call(
        _mlp_kernel,
        out_shape=jax.ShapeDtypeStruct((m, d_out), jnp.float32),
        grid_spec=pltpu.PrefetchScalarGridSpec(
            num_scalar_prefetch=0,
            grid=(kt,),
            in_specs=[
                pl.BlockSpec((m, tk), lambda k: (0, k)),       # x K-tile (bf16)
                pl.BlockSpec((tk, d_h), lambda k: (k, 0)),     # w1 K-tile (bf16, streamed)
                pl.BlockSpec((1, d_h), lambda k: (0, 0)),      # b1 (resident)
                pl.BlockSpec((d_h, d_h), lambda k: (0, 0)),    # w2 (resident)
                pl.BlockSpec((1, d_h), lambda k: (0, 0)),      # b2
                pl.BlockSpec((d_h, d_out), lambda k: (0, 0)),  # w3
                pl.BlockSpec((1, d_out), lambda k: (0, 0)),    # b3
            ],
            out_specs=pl.BlockSpec((m, d_out), lambda k: (0, 0)),
            scratch_shapes=[pltpu.VMEM((m, d_h), jnp.float32)],
        ),
        compiler_params=pltpu.CompilerParams(
            dimension_semantics=("arbitrary",),
            vmem_limit_bytes=32 * 1024 * 1024),
    )(x_bf, w1_bf, b1.reshape(1, -1), w2, b2.reshape(1, -1), w3,
      b3.reshape(1, -1))


# ----------------------------------------------------------------------------
# Parameter init (deterministic, synthetic) and full forward.
# Logical fc widths are 500 (as in the module); stored padded to 512 with
# zeros so the computation is exactly equivalent but lane-dense.
# ----------------------------------------------------------------------------
def init_params(key, h, w):
    conv_dims = [(1, 4), (4, 8), (8, 8)]
    keys = iter(jax.random.split(key, len(conv_dims) * 6 + 6))
    params = {"conv": []}
    for cin, cout in conv_dims:
        cw = 0.3 * jax.random.normal(next(keys), (cout, cin, 3, 3), jnp.float32)
        cb = 0.1 * jax.random.normal(next(keys), (cout,), jnp.float32)
        gamma = 1.0 + 0.1 * jax.random.normal(next(keys), (cout,), jnp.float32)
        beta = 0.1 * jax.random.normal(next(keys), (cout,), jnp.float32)
        rmean = 0.1 * jax.random.normal(next(keys), (cout,), jnp.float32)
        rvar = 1.0 + 0.1 * jnp.abs(jax.random.normal(next(keys), (cout,), jnp.float32))
        scale = gamma / jnp.sqrt(rvar + 1e-5)
        shift = beta - rmean * scale
        pk = jnp.stack([cb, scale, shift], axis=1)   # (Cout, 3) packed epilogue
        params["conv"].append({"w": cw, "pk": pk})

    d_in = 8 * h * w  # 8*100*100 in the original module; small spatial here
    dims = [(d_in, D_HIDDEN), (D_HIDDEN, D_HIDDEN), (D_HIDDEN, D_OUT)]
    for i, (din, dout) in enumerate(dims, start=1):
        # stored as (in, out) = transpose of PyTorch's (out, in)
        wl = (jax.random.normal(next(keys), (din, dout), jnp.float32)
              / jnp.sqrt(jnp.float32(din)))
        bl = 0.1 * jax.random.normal(next(keys), (dout,), jnp.float32)
        # zero-pad logical 500 -> 512 on both sides where applicable
        din_p = d_in if i == 1 else D_HIDDEN_PAD
        dout_p = D_HIDDEN_PAD if i < 3 else D_OUT
        params[f"w{i}"] = jnp.pad(wl, ((0, din_p - din), (0, dout_p - dout)))
        params[f"b{i}"] = jnp.pad(bl, (0, dout_p - dout))
    return params


def forward_once(x, params):
    b = x.shape[0]
    h = x.astype(jnp.float32)
    for layer in params["conv"]:
        h = conv_relu_bn(h, layer["w"], layer["pk"])
    feat = h.reshape(b, -1)                  # NCHW flatten == torch .view(N, -1)
    return mlp(feat, params["w1"], params["b1"], params["w2"], params["b2"],
               params["w3"], params["b3"])


def siamese_forward(x1, x2, params):
    # Shared weights: run both branches as one stacked batch (streams weights
    # once, doubles the MXU M dimension), then split the outputs.
    n = x1.shape[0]
    out = forward_once(jnp.concatenate([x1, x2], axis=0), params)
    return out[:n], out[n:]


if __name__ == "__main__":
    H = W = 16   # small spatial size (original uses 100x100)
    N = 2        # batch per branch
    key = jax.random.PRNGKey(0)
    kp, k1, k2 = jax.random.split(key, 3)
    params = init_params(kp, H, W)

    input1 = jax.random.normal(k1, (N, 1, H, W), jnp.float32)
    input2 = jax.random.normal(k2, (N, 1, H, W), jnp.float32)

    fwd = jax.jit(lambda a, b: siamese_forward(a, b, params))
    out1, out2 = fwd(input1, input2)
    jax.block_until_ready((out1, out2))

    assert out1.shape == (N, 5) and out2.shape == (N, 5)
    assert out1.dtype == jnp.float32 and out2.dtype == jnp.float32
    assert bool(jnp.all(jnp.isfinite(out1))) and bool(jnp.all(jnp.isfinite(out2)))
    print("KERNEL_OK")
</pallas_src>

<mosaic_0001>
module attributes {stable_mosaic.version = 11 : i64} {
  func.func @_conv_mm_kernel(%arg0: i32, %arg1: memref<9x1024xf32, #tpu.memory_space<vmem>>, %arg2: memref<4x9xf32, #tpu.memory_space<vmem>>, %arg3: memref<4x3xf32, #tpu.memory_space<vmem>>, %arg4: memref<4x1024xf32, #tpu.memory_space<vmem>>) attributes {dimension_semantics = [#tpu.dimension_semantics<arbitrary>], iteration_bounds = array<i64: 1>, scalar_prefetch = 0 : i64, scratch_operands = 0 : i64, tpu.core_type = #tpu.core_type<tc>, window_params = [{pipeline_mode = #tpu.pipeline_mode<synchronous>, transform_indices = @transform_0, window_bounds = array<i64: 9, 1024>}, {pipeline_mode = #tpu.pipeline_mode<synchronous>, transform_indices = @transform_1, window_bounds = array<i64: 4, 9>}, {pipeline_mode = #tpu.pipeline_mode<synchronous>, transform_indices = @transform_2, window_bounds = array<i64: 4, 3>}, {pipeline_mode = #tpu.pipeline_mode<synchronous>, transform_indices = @transform_3, window_bounds = array<i64: 4, 1024>}]} {
    %c0 = arith.constant 0 : index
    %c0_0 = arith.constant 0 : index
    %0 = vector.load %arg2[%c0, %c0_0] : memref<4x9xf32, #tpu.memory_space<vmem>>, vector<4x9xf32>
    %c0_1 = arith.constant 0 : index
    %c0_2 = arith.constant 0 : index
    %1 = vector.load %arg1[%c0_1, %c0_2] : memref<9x1024xf32, #tpu.memory_space<vmem>>, vector<9x1024xf32>
    %cst = arith.constant dense<0.000000e+00> : vector<4x1024xf32>
    %2 = tpu.matmul %0, %1, %cst {dimension_numbers = #tpu.dot_dimension_numbers<[1], [0], [0], [1], [0, 0, 1, 1], [], []>} : vector<4x9xf32>, vector<9x1024xf32>, vector<4x1024xf32> -> vector<4x1024xf32>
    %c0_3 = arith.constant 0 : index
    %c0_4 = arith.constant 0 : index
    %3 = vector.load %arg3[%c0_3, %c0_4] : memref<4x3xf32, #tpu.memory_space<vmem>>, vector<4x1xf32>
    %c0_5 = arith.constant 0 : index
    %c1 = arith.constant 1 : index
    %4 = vector.load %arg3[%c0_5, %c1] : memref<4x3xf32, #tpu.memory_space<vmem>>, vector<4x1xf32>
    %c0_6 = arith.constant 0 : index
    %c2 = arith.constant 2 : index
    %5 = vector.load %arg3[%c0_6, %c2] : memref<4x3xf32, #tpu.memory_space<vmem>>, vector<4x1xf32>
    %6 = vector.broadcast %3 : vector<4x1xf32> to vector<4x1024xf32>
    %7 = arith.addf %2, %6 : vector<4x1024xf32>
    %cst_7 = arith.constant 0.000000e+00 : f32
    %8 = vector.broadcast %cst_7 : f32 to vector<4x1024xf32>
    %9 = arith.maximumf %7, %8 : vector<4x1024xf32>
    %10 = vector.broadcast %4 : vector<4x1xf32> to vector<4x1024xf32>
    %11 = arith.mulf %9, %10 : vector<4x1024xf32>
    %12 = vector.broadcast %5 : vector<4x1xf32> to vector<4x1024xf32>
    %13 = arith.addf %11, %12 : vector<4x1024xf32>
    %c0_8 = arith.constant 0 : index
    %c0_9 = arith.constant 0 : index
    %14 = vector.load %arg4[%c0_8, %c0_9] : memref<4x1024xf32, #tpu.memory_space<vmem>>, vector<4x1024xf32>
    tpu.vector_store %arg4[%c0_8, %c0_9], %13 {strides = array<i32>} : memref<4x1024xf32, #tpu.memory_space<vmem>>, vector<4x1024xf32>,
    return
  }
  func.func @transform_0(%arg0: i32) -> (i32, i32) {
    %c0_i32 = arith.constant 0 : i32
    %c0_i32_0 = arith.constant 0 : i32
    %c0_i32_1 = arith.constant 0 : i32
    return %c0_i32, %c0_i32_0 : i32, i32
  }
  func.func @transform_1(%arg0: i32) -> (i32, i32) {
    %c0_i32 = arith.constant 0 : i32
    %c0_i32_0 = arith.constant 0 : i32
    %c0_i32_1 = arith.constant 0 : i32
    return %c0_i32, %c0_i32_0 : i32, i32
  }
  func.func @transform_2(%arg0: i32) -> (i32, i32) {
    %c0_i32 = arith.constant 0 : i32
    %c0_i32_0 = arith.constant 0 : i32
    %c0_i32_1 = arith.constant 0 : i32
    return %c0_i32, %c0_i32_0 : i32, i32
  }
  func.func @transform_3(%arg0: i32) -> (i32, i32) {
    %c0_i32 = arith.constant 0 : i32
    %c0_i32_0 = arith.constant 0 : i32
    %c0_i32_1 = arith.constant 0 : i32
    return %c0_i32, %c0_i32_0 : i32, i32
  }
}

module attributes {stable_mosaic.version = 11 : i64} {
  func.func @_conv_mm_kernel(%arg0: i32, %arg1: memref<36x1024xf32, #tpu.memory_space<vmem>>, %arg2: memref<8x36xf32, #tpu.memory_space<vmem>>, %arg3: memref<8x3xf32, #tpu.memory_space<vmem>>, %arg4: memref<8x1024xf32, #tpu.memory_space<vmem>>) attributes {dimension_semantics = [#tpu.dimension_semantics<arbitrary>], iteration_bounds = array<i64: 1>, scalar_prefetch = 0 : i64, scratch_operands = 0 : i64, tpu.core_type = #tpu.core_type<tc>, window_params = [{pipeline_mode = #tpu.pipeline_mode<synchronous>, transform_indices = @transform_0, window_bounds = array<i64: 36, 1024>}, {pipeline_mode = #tpu.pipeline_mode<synchronous>, transform_indices = @transform_1, window_bounds = array<i64: 8, 36>}, {pipeline_mode = #tpu.pipeline_mode<synchronous>, transform_indices = @transform_2, window_bounds = array<i64: 8, 3>}, {pipeline_mode = #tpu.pipeline_mode<synchronous>, transform_indices = @transform_3, window_bounds = array<i64: 8, 1024>}]} {
    %c0 = arith.constant 0 : index
    %c0_0 = arith.constant 0 : index
    %0 = vector.load %arg2[%c0, %c0_0] : memref<8x36xf32, #tpu.memory_space<vmem>>, vector<8x36xf32>
    %c0_1 = arith.constant 0 : index
    %c0_2 = arith.constant 0 : index
    %1 = vector.load %arg1[%c0_1, %c0_2] : memref<36x1024xf32, #tpu.memory_space<vmem>>, vector<36x1024xf32>
    %cst = arith.constant dense<0.000000e+00> : vector<8x1024xf32>
    %2 = tpu.matmul %0, %1, %cst {dimension_numbers = #tpu.dot_dimension_numbers<[1], [0], [0], [1], [0, 0, 1, 1], [], []>} : vector<8x36xf32>, vector<36x1024xf32>, vector<8x1024xf32> -> vector<8x1024xf32>
    %c0_3 = arith.constant 0 : index
    %c0_4 = arith.constant 0 : index
    %3 = vector.load %arg3[%c0_3, %c0_4] : memref<8x3xf32, #tpu.memory_space<vmem>>, vector<8x1xf32>
    %c0_5 = arith.constant 0 : index
    %c1 = arith.constant 1 : index
    %4 = vector.load %arg3[%c0_5, %c1] : memref<8x3xf32, #tpu.memory_space<vmem>>, vector<8x1xf32>
    %c0_6 = arith.constant 0 : index
    %c2 = arith.constant 2 : index
    %5 = vector.load %arg3[%c0_6, %c2] : memref<8x3xf32, #tpu.memory_space<vmem>>, vector<8x1xf32>
    %6 = vector.broadcast %3 : vector<8x1xf32> to vector<8x1024xf32>
    %7 = arith.addf %2, %6 : vector<8x1024xf32>
    %cst_7 = arith.constant 0.000000e+00 : f32
    %8 = vector.broadcast %cst_7 : f32 to vector<8x1024xf32>
    %9 = arith.maximumf %7, %8 : vector<8x1024xf32>
    %10 = vector.broadcast %4 : vector<8x1xf32> to vector<8x1024xf32>
    %11 = arith.mulf %9, %10 : vector<8x1024xf32>
    %12 = vector.broadcast %5 : vector<8x1xf32> to vector<8x1024xf32>
    %13 = arith.addf %11, %12 : vector<8x1024xf32>
    %c0_8 = arith.constant 0 : index
    %c0_9 = arith.constant 0 : index
    %14 = vector.load %arg4[%c0_8, %c0_9] : memref<8x1024xf32, #tpu.memory_space<vmem>>, vector<8x1024xf32>
    tpu.vector_store %arg4[%c0_8, %c0_9], %13 {strides = array<i32>} : memref<8x1024xf32, #tpu.memory_space<vmem>>, vector<8x1024xf32>,
    return
  }
  func.func @transform_0(%arg0: i32) -> (i32, i32) {
    %c0_i32 = arith.constant 0 : i32
    %c0_i32_0 = arith.constant 0 : i32
    %c0_i32_1 = arith.constant 0 : i32
    return %c0_i32, %c0_i32_0 : i32, i32
  }
  func.func @transform_1(%arg0: i32) -> (i32, i32) {
    %c0_i32 = arith.constant 0 : i32
    %c0_i32_0 = arith.constant 0 : i32
    %c0_i32_1 = arith.constant 0 : i32
    return %c0_i32, %c0_i32_0 : i32, i32
  }
  func.func @transform_2(%arg0: i32) -> (i32, i32) {
    %c0_i32 = arith.constant 0 : i32
    %c0_i32_0 = arith.constant 0 : i32
    %c0_i32_1 = arith.constant 0 : i32
    return %c0_i32, %c0_i32_0 : i32, i32
  }
  func.func @transform_3(%arg0: i32) -> (i32, i32) {
    %c0_i32 = arith.constant 0 : i32
    %c0_i32_0 = arith.constant 0 : i32
    %c0_i32_1 = arith.constant 0 : i32
    return %c0_i32, %c0_i32_0 : i32, i32
  }
}

module attributes {stable_mosaic.version = 11 : i64} {
  func.func @_conv_mm_kernel(%arg0: i32, %arg1: memref<72x1024xf32, #tpu.memory_space<vmem>>, %arg2: memref<8x72xf32, #tpu.memory_space<vmem>>, %arg3: memref<8x3xf32, #tpu.memory_space<vmem>>, %arg4: memref<8x1024xf32, #tpu.memory_space<vmem>>) attributes {dimension_semantics = [#tpu.dimension_semantics<arbitrary>], iteration_bounds = array<i64: 1>, scalar_prefetch = 0 : i64, scratch_operands = 0 : i64, tpu.core_type = #tpu.core_type<tc>, window_params = [{pipeline_mode = #tpu.pipeline_mode<synchronous>, transform_indices = @transform_0, window_bounds = array<i64: 72, 1024>}, {pipeline_mode = #tpu.pipeline_mode<synchronous>, transform_indices = @transform_1, window_bounds = array<i64: 8, 72>}, {pipeline_mode = #tpu.pipeline_mode<synchronous>, transform_indices = @transform_2, window_bounds = array<i64: 8, 3>}, {pipeline_mode = #tpu.pipeline_mode<synchronous>, transform_indices = @transform_3, window_bounds = array<i64: 8, 1024>}]} {
    %c0 = arith.constant 0 : index
    %c0_0 = arith.constant 0 : index
    %0 = vector.load %arg2[%c0, %c0_0] : memref<8x72xf32, #tpu.memory_space<vmem>>, vector<8x72xf32>
    %c0_1 = arith.constant 0 : index
    %c0_2 = arith.constant 0 : index
    %1 = vector.load %arg1[%c0_1, %c0_2] : memref<72x1024xf32, #tpu.memory_space<vmem>>, vector<72x1024xf32>
    %cst = arith.constant dense<0.000000e+00> : vector<8x1024xf32>
    %2 = tpu.matmul %0, %1, %cst {dimension_numbers = #tpu.dot_dimension_numbers<[1], [0], [0], [1], [0, 0, 1, 1], [], []>} : vector<8x72xf32>, vector<72x1024xf32>, vector<8x1024xf32> -> vector<8x1024xf32>
    %c0_3 = arith.constant 0 : index
    %c0_4 = arith.constant 0 : index
    %3 = vector.load %arg3[%c0_3, %c0_4] : memref<8x3xf32, #tpu.memory_space<vmem>>, vector<8x1xf32>
    %c0_5 = arith.constant 0 : index
    %c1 = arith.constant 1 : index
    %4 = vector.load %arg3[%c0_5, %c1] : memref<8x3xf32, #tpu.memory_space<vmem>>, vector<8x1xf32>
    %c0_6 = arith.constant 0 : index
    %c2 = arith.constant 2 : index
    %5 = vector.load %arg3[%c0_6, %c2] : memref<8x3xf32, #tpu.memory_space<vmem>>, vector<8x1xf32>
    %6 = vector.broadcast %3 : vector<8x1xf32> to vector<8x1024xf32>
    %7 = arith.addf %2, %6 : vector<8x1024xf32>
    %cst_7 = arith.constant 0.000000e+00 : f32
    %8 = vector.broadcast %cst_7 : f32 to vector<8x1024xf32>
    %9 = arith.maximumf %7, %8 : vector<8x1024xf32>
    %10 = vector.broadcast %4 : vector<8x1xf32> to vector<8x1024xf32>
    %11 = arith.mulf %9, %10 : vector<8x1024xf32>
    %12 = vector.broadcast %5 : vector<8x1xf32> to vector<8x1024xf32>
    %13 = arith.addf %11, %12 : vector<8x1024xf32>
    %c0_8 = arith.constant 0 : index
    %c0_9 = arith.constant 0 : index
    %14 = vector.load %arg4[%c0_8, %c0_9] : memref<8x1024xf32, #tpu.memory_space<vmem>>, vector<8x1024xf32>
    tpu.vector_store %arg4[%c0_8, %c0_9], %13 {strides = array<i32>} : memref<8x1024xf32, #tpu.memory_space<vmem>>, vector<8x1024xf32>,
    return
  }
  func.func @transform_0(%arg0: i32) -> (i32, i32) {
    %c0_i32 = arith.constant 0 : i32
    %c0_i32_0 = arith.constant 0 : i32
    %c0_i32_1 = arith.constant 0 : i32
    return %c0_i32, %c0_i32_0 : i32, i32
  }
  func.func @transform_1(%arg0: i32) -> (i32, i32) {
    %c0_i32 = arith.constant 0 : i32
    %c0_i32_0 = arith.constant 0 : i32
    %c0_i32_1 = arith.constant 0 : i32
    return %c0_i32, %c0_i32_0 : i32, i32
  }
  func.func @transform_2(%arg0: i32) -> (i32, i32) {
    %c0_i32 = arith.constant 0 : i32
    %c0_i32_0 = arith.constant 0 : i32
    %c0_i32_1 = arith.constant 0 : i32
    return %c0_i32, %c0_i32_0 : i32, i32
  }
  func.func @transform_3(%arg0: i32) -> (i32, i32) {
    %c0_i32 = arith.constant 0 : i32
    %c0_i32_0 = arith.constant 0 : i32
    %c0_i32_1 = arith.constant 0 : i32
    return %c0_i32, %c0_i32_0 : i32, i32
  }
}

module attributes {stable_mosaic.version = 11 : i64} {
  func.func @_mlp_kernel(%arg0: i32, %arg1: memref<4x2048xbf16, #tpu.memory_space<vmem>>, %arg2: memref<2048x512xbf16, #tpu.memory_space<vmem>>, %arg3: memref<1x512xf32, #tpu.memory_space<vmem>>, %arg4: memref<512x512xf32, #tpu.memory_space<vmem>>, %arg5: memref<1x512xf32, #tpu.memory_space<vmem>>, %arg6: memref<512x5xf32, #tpu.memory_space<vmem>>, %arg7: memref<1x5xf32, #tpu.memory_space<vmem>>, %arg8: memref<4x5xf32, #tpu.memory_space<vmem>>, %arg9: memref<4x512xf32, #tpu.memory_space<vmem>>) attributes {dimension_semantics = [#tpu.dimension_semantics<arbitrary>], iteration_bounds = array<i64: 1>, scalar_prefetch = 0 : i64, scratch_operands = 1 : i64, tpu.core_type = #tpu.core_type<tc>, window_params = [{transform_indices = @transform_0, window_bounds = array<i64: 4, 2048>}, {transform_indices = @transform_1, window_bounds = array<i64: 2048, 512>}, {pipeline_mode = #tpu.pipeline_mode<synchronous>, transform_indices = @transform_2, window_bounds = array<i64: 1, 512>}, {pipeline_mode = #tpu.pipeline_mode<synchronous>, transform_indices = @transform_3, window_bounds = array<i64: 512, 512>}, {pipeline_mode = #tpu.pipeline_mode<synchronous>, transform_indices = @transform_4, window_bounds = array<i64: 1, 512>}, {pipeline_mode = #tpu.pipeline_mode<synchronous>, transform_indices = @transform_5, window_bounds = array<i64: 512, 5>}, {pipeline_mode = #tpu.pipeline_mode<synchronous>, transform_indices = @transform_6, window_bounds = array<i64: 1, 5>}, {pipeline_mode = #tpu.pipeline_mode<synchronous>, transform_indices = @transform_7, window_bounds = array<i64: 4, 5>}]} {
    %c0_i32 = arith.constant 0 : i32
    %0 = arith.cmpi eq, %arg0, %c0_i32 : i32
    %1 = arith.extui %0 : i1 to i32
    %c0_i32_0 = arith.constant 0 : i32
    %2 = arith.cmpi ne, %1, %c0_i32_0 : i32
    scf.if %2 {
      %cst_10 = arith.constant 0.000000e+00 : f32
      %12 = vector.broadcast %cst_10 : f32 to vector<4x512xf32>
      %c0_11 = arith.constant 0 : index
      %c0_12 = arith.constant 0 : index
      %13 = vector.load %arg9[%c0_11, %c0_12] : memref<4x512xf32, #tpu.memory_space<vmem>>, vector<4x512xf32>
      tpu.vector_store %arg9[%c0_11, %c0_12], %12 {strides = array<i32>} : memref<4x512xf32, #tpu.memory_space<vmem>>, vector<4x512xf32>,
    } else {
    }
    %c0 = arith.constant 0 : index
    %c0_1 = arith.constant 0 : index
    %3 = vector.load %arg9[%c0, %c0_1] : memref<4x512xf32, #tpu.memory_space<vmem>>, vector<4x512xf32>
    %c0_2 = arith.constant 0 : index
    %c0_3 = arith.constant 0 : index
    %4 = vector.load %arg1[%c0_2, %c0_3] : memref<4x2048xbf16, #tpu.memory_space<vmem>>, vector<4x2048xbf16>
    %c0_4 = arith.constant 0 : index
    %c0_5 = arith.constant 0 : index
    %5 = vector.load %arg2[%c0_4, %c0_5] : memref<2048x512xbf16, #tpu.memory_space<vmem>>, vector<2048x512xbf16>
    %cst = arith.constant dense<0.000000e+00> : vector<4x512xf32>
    %6 = tpu.matmul %4, %5, %cst {dimension_numbers = #tpu.dot_dimension_numbers<[1], [0], [0], [1], [0, 0, 1, 1], [], []>} : vector<4x2048xbf16>, vector<2048x512xbf16>, vector<4x512xf32> -> vector<4x512xf32>
    %7 = arith.addf %3, %6 : vector<4x512xf32>
    %c0_6 = arith.constant 0 : index
    %c0_7 = arith.constant 0 : index
    %8 = vector.load %arg9[%c0_6, %c0_7] : memref<4x512xf32, #tpu.memory_space<vmem>>, vector<4x512xf32>
    tpu.vector_store %arg9[%c0_6, %c0_7], %7 {strides = array<i32>} : memref<4x512xf32, #tpu.memory_space<vmem>>, vector<4x512xf32>,
    %c0_i32_8 = arith.constant 0 : i32
    %9 = arith.cmpi eq, %arg0, %c0_i32_8 : i32
    %10 = arith.extui %9 : i1 to i32
    %c0_i32_9 = arith.constant 0 : i32
    %11 = arith.cmpi ne, %10, %c0_i32_9 : i32
    scf.if %11 {
      %c0_10 = arith.constant 0 : index
      %c0_11 = arith.constant 0 : index
      %12 = vector.load %arg9[%c0_10, %c0_11] : memref<4x512xf32, #tpu.memory_space<vmem>>, vector<4x512xf32>
      %c0_12 = arith.constant 0 : index
      %c0_13 = arith.constant 0 : index
      %13 = vector.load %arg3[%c0_12, %c0_13] : memref<1x512xf32, #tpu.memory_space<vmem>>, vector<1x512xf32>
      %14 = vector.broadcast %13 : vector<1x512xf32> to vector<4x512xf32>
      %15 = arith.addf %12, %14 : vector<4x512xf32>
      %cst_14 = arith.constant 0.000000e+00 : f32
      %16 = vector.broadcast %cst_14 : f32 to vector<4x512xf32>
      %17 = arith.maximumf %15, %16 : vector<4x512xf32>
      %c0_15 = arith.constant 0 : index
      %c0_16 = arith.constant 0 : index
      %18 = vector.load %arg4[%c0_15, %c0_16] : memref<512x512xf32, #tpu.memory_space<vmem>>, vector<512x512xf32>
      %cst_17 = arith.constant dense<0.000000e+00> : vector<4x512xf32>
      %19 = tpu.matmul %17, %18, %cst_17 {dimension_numbers = #tpu.dot_dimension_numbers<[1], [0], [0], [1], [0, 0, 1, 1], [], []>} : vector<4x512xf32>, vector<512x512xf32>, vector<4x512xf32> -> vector<4x512xf32>
      %c0_18 = arith.constant 0 : index
      %c0_19 = arith.constant 0 : index
      %20 = vector.load %arg5[%c0_18, %c0_19] : memref<1x512xf32, #tpu.memory_space<vmem>>, vector<1x512xf32>
      %21 = vector.broadcast %20 : vector<1x512xf32> to vector<4x512xf32>
      %22 = arith.addf %19, %21 : vector<4x512xf32>
      %cst_20 = arith.constant 0.000000e+00 : f32
      %23 = vector.broadcast %cst_20 : f32 to vector<4x512xf32>
      %24 = arith.maximumf %22, %23 : vector<4x512xf32>
      %c0_21 = arith.constant 0 : index
      %c0_22 = arith.constant 0 : index
      %25 = vector.load %arg6[%c0_21, %c0_22] : memref<512x5xf32, #tpu.memory_space<vmem>>, vector<512x5xf32>
      %cst_23 = arith.constant dense<0.000000e+00> : vector<4x5xf32>
      %26 = tpu.matmul %24, %25, %cst_23 {dimension_numbers = #tpu.dot_dimension_numbers<[1], [0], [0], [1], [0, 0, 1, 1], [], []>} : vector<4x512xf32>, vector<512x5xf32>, vector<4x5xf32> -> vector<4x5xf32>
      %c0_24 = arith.constant 0 : index
      %c0_25 = arith.constant 0 : index
      %27 = vector.load %arg7[%c0_24, %c0_25] : memref<1x5xf32, #tpu.memory_space<vmem>>, vector<1x5xf32>
      %28 = vector.broadcast %27 : vector<1x5xf32> to vector<4x5xf32>
      %29 = arith.addf %26, %28 : vector<4x5xf32>
      %c0_26 = arith.constant 0 : index
      %c0_27 = arith.constant 0 : index
      %30 = vector.load %arg8[%c0_26, %c0_27] : memref<4x5xf32, #tpu.memory_space<vmem>>, vector<4x5xf32>
      tpu.vector_store %arg8[%c0_26, %c0_27], %29 {strides = array<i32>} : memref<4x5xf32, #tpu.memory_space<vmem>>, vector<4x5xf32>,
    } else {
    }
    return
  }
  func.func @transform_0(%arg0: i32) -> (i32, i32) {
    %c0_i32 = arith.constant 0 : i32
    %c0_i32_0 = arith.constant 0 : i32
    return %c0_i32, %arg0 : i32, i32
  }
  func.func @transform_1(%arg0: i32) -> (i32, i32) {
    %c0_i32 = arith.constant 0 : i32
    %c0_i32_0 = arith.constant 0 : i32
    return %arg0, %c0_i32 : i32, i32
  }
  func.func @transform_2(%arg0: i32) -> (i32, i32) {
    %c0_i32 = arith.constant 0 : i32
    %c0_i32_0 = arith.constant 0 : i32
    %c0_i32_1 = arith.constant 0 : i32
    return %c0_i32, %c0_i32_0 : i32, i32
  }
  func.func @transform_3(%arg0: i32) -> (i32, i32) {
    %c0_i32 = arith.constant 0 : i32
    %c0_i32_0 = arith.constant 0 : i32
    %c0_i32_1 = arith.constant 0 : i32
    return %c0_i32, %c0_i32_0 : i32, i32
  }
  func.func @transform_4(%arg0: i32) -> (i32, i32) {
    %c0_i32 = arith.constant 0 : i32
    %c0_i32_0 = arith.constant 0 : i32
    %c0_i32_1 = arith.constant 0 : i32
    return %c0_i32, %c0_i32_0 : i32, i32
  }
  func.func @transform_5(%arg0: i32) -> (i32, i32) {
    %c0_i32 = arith.constant 0 : i32
    %c0_i32_0 = arith.constant 0 : i32
    %c0_i32_1 = arith.constant 0 : i32
    return %c0_i32, %c0_i32_0 : i32, i32
  }
  func.func @transform_6(%arg0: i32) -> (i32, i32) {
    %c0_i32 = arith.constant 0 : i32
    %c0_i32_0 = arith.constant 0 : i32
    %c0_i32_1 = arith.constant 0 : i32
    return %c0_i32, %c0_i32_0 : i32, i32
  }
  func.func @transform_7(%arg0: i32) -> (i32, i32) {
    %c0_i32 = arith.constant 0 : i32
    %c0_i32_0 = arith.constant 0 : i32
    %c0_i32_1 = arith.constant 0 : i32
    return %c0_i32, %c0_i32_0 : i32, i32
  }
}

</mosaic_0001>

<bundles_post_ra>
// kernel: _lambda_.4
= control target key start
LH: loop header
LB: loop body
LE: loop exit
PB: predicated region body
PF: predicated region fallthrough
CT: control target
= control target key end

     0   :  { %8 = vsyncpa [#allocation3], 0  ;;  %s662_s0 = inlined_call_operand.vmem [shape: f32[9,1024], index: 0, kind: input, shape index: {}]   ;;  %s663_s1 = inlined_call_operand.hbm [shape: f32[4,9], index: 1, kind: input, shape index: {}]   ;;  %s664_s2 = inlined_call_operand.hbm [shape: f32[4,3], index: 2, kind: input, shape index: {}]   ;;  %s665_s3 = inlined_call_operand.vmem [shape: f32[4,1024], index: 3, kind: output, shape index: {}]  }
   0x1   :  { %9 = vsyncpa [#allocation5], 0  ;;  %s527_s12 = smov [#allocation2]   ;;  %s528_s14 = smov [#allocation4]  }
   0x2   :  { %s18_s13 = sshll.u32 %s527_s12, 4  ;;  %s28_s15 = sshll.u32 %s528_s14, 4  ;;  %s19_s13 = int_to_ptr.vmem [resolvable:$true] %s18_s13  ;;  %s29_s15 = int_to_ptr.vmem [resolvable:$true] %s28_s15 }
   0x3   :  { %s479_s18 = scalar_lea.hbm %s663_s1, 64 }
   0x4   :  { %p480_p0 = scmp.ne.s32.totalorder %s663_s1, %s479_s18  ;;  %p483_p1 = scmp.lt.u32.totalorder %s479_s18, %s663_s1 }
   0x6   :  { %p485_p2 = pnand %p483_p1, %p480_p0 }
   0x8   :  { %488 = shalt.err (!%p485_p2)
}
   0x9   :  { %s489_s23 = scalar_lea.vmem %s19_s13, 64  ;;  %p494_p4 = scmp.lt.s32.totalorder %s19_s13, %s19_s13 }
   0xa   :  { %p490_p3 = scmp.ne.s32.totalorder %s19_s13, %s489_s23  ;;  %p495_p5 = scmp.lt.s32.totalorder %s489_s23, %s489_s23 }
   0xc   :  { %p496_p6 = por %p495_p5, %p494_p4 }
   0xe   :  { %p497_p7 = pnand %p496_p6, %p490_p3 }
  0x10   :  { %500 = shalt.err (!%p497_p7)
}
  0x11   :  { %21 = dma.hbm_to_vmem [thread:$0]  %s663_s1, 64, %s19_s13, [#allocation3]  }
  0x12   :  { %s501_s28 = scalar_lea.hbm %s664_s2, 64 }
  0x13   :  { %p502_p8 = scmp.ne.s32.totalorder %s664_s2, %s501_s28  ;;  %p505_p9 = scmp.lt.u32.totalorder %s501_s28, %s664_s2 }
  0x15   :  { %p507_p10 = pnand %p505_p9, %p502_p8 }
  0x17   :  { %510 = shalt.err (!%p507_p10)
}
  0x18   :  { %s511_s6 = scalar_lea.vmem %s29_s15, 64  ;;  %p516_p12 = scmp.lt.s32.totalorder %s29_s15, %s29_s15 }
  0x19   :  { %p512_p11 = scmp.ne.s32.totalorder %s29_s15, %s511_s6  ;;  %p517_p13 = scmp.lt.s32.totalorder %s511_s6, %s511_s6 }
  0x1b   :  { %p518_p0 = por %p517_p13, %p516_p12 }
  0x1d   :  { %p519_p1 = pnand %p518_p0, %p512_p11 }
  0x1f   :  { %522 = shalt.err (!%p519_p1)
}
  0x20   :  { %31 = dma.hbm_to_vmem [thread:$0]  %s664_s2, 64, %s29_s15, [#allocation5]  }
  0x21   :  { %523 = dma.done.wait [#allocation3], 64  }
  0x22   :  { %524 = vsyncadd [#allocation3], 4294967232 }
  0x23   :  { %525 = dma.done.wait [#allocation5], 64  }
  0x24   :  { %526 = vsyncadd [#allocation5], 4294967232  ;;  %v529_v0 = vmov 0.0   ;;  %v530_v1 = vmov 0   ;;  %v531_v2 = vmov 2   ;;  %vm65_vm0 = vcmask 1040384  }
  0x25   :  { %154 = vmatprep.mubr.f32.mxu0 %v529_v0  ;;  %225 = vmatprep.mubr.f32.mxu1 %v529_v0  ;;  %vm532_vm1 = vmmov 1   ;;  %v40_v4 = vld [vmem:[%s662_s0 + $0x8] sm:$0xff]  ;;  %v42_v6 = vld [vmem:[%s662_s0 + $0x18] sm:$0xff]  ;;  %v39_v9 = vld [vmem:[%s662_s0] sm:$0xff]  ;;  %vm61_vm3 = vcmask 72704   ;;  %v533_v30 = vmov 1  }
  0x26   :  { %475 = vset.pattern.permute.xlu0 %v530_v1  ;;  %477 = vset.pattern.permute.xlu1 %v531_v2  ;;  %vm578_vm2 = vmpackc.low %vm65_vm0, %vm532_vm1  ;;  %v48_v5 = vld [vmem:[%s662_s0 + $0x48] sm:$0x1]  ;;  %v50_v8 = vld [vmem:[%s662_s0 + $0x58] sm:$0x1] }
  0x27   :  { %v444_v7 = vpack.c.bf16 %v48_v5, %v40_v4  ;;  %v47_v10 = vld [vmem:[%s662_s0 + $0x40] sm:$0x1]  ;;  %v450_v11 = vpack.c.bf16 %v50_v8, %v42_v6  ;;  %v41_v13 = vld [vmem:[%s662_s0 + $0x10] sm:$0xff]  ;;  %v44_v17 = vld [vmem:[%s662_s0 + $0x28] sm:$0xff] }
  0x28   :  { %v447_v12 = vpack.c.bf16 %v47_v10, %v39_v9  ;;  %v49_v14 = vld [vmem:[%s662_s0 + $0x50] sm:$0x1]  ;;  %v38_v15 = vld [vmem:[#allocation2] sm:$0xf]  ;;  %v52_v18 = vld [vmem:[%s662_s0 + $0x68] sm:$0x1] }
  0x29   :  { %446 = vmatprep.subr.msk.bf16.mxu0 %vm578_vm2, %v444_v7  ;;  %v453_v16 = vpack.c.bf16 %v49_v14, %v41_v13  ;;  %v46_v19 = vld [vmem:[%s662_s0 + $0x38] sm:$0xff]  ;;  %452 = vmatprep.subr.msk.bf16.mxu1 %vm578_vm2, %v450_v11  ;;  %v456_v20 = vpack.c.bf16 %v52_v18, %v44_v17  ;;  %v43_v22 = vld [vmem:[%s662_s0 + $0x20] sm:$0xff]  ;;  %v45_v26 = vld [vmem:[%s662_s0 + $0x30] sm:$0xff] }
  0x2a   :  { %449 = vmatpush1.bf16.msk.msra.mxu0 %vm578_vm2, %v447_v12  ;;  %v54_v21 = vld [vmem:[%s662_s0 + $0x78] sm:$0x1]  ;;  %v51_v23 = vld [vmem:[%s662_s0 + $0x60] sm:$0x1]  ;;  %v53_v27 = vld [vmem:[%s662_s0 + $0x70] sm:$0x1] }
  0x2b   :  { %455 = vmatpush1.bf16.msk.msra.mxu1 %vm578_vm2, %v453_v16  ;;  %v462_v24 = vpack.c.bf16 %v54_v21, %v46_v19  ;;  %v459_v25 = vpack.c.bf16 %v51_v23, %v43_v22  ;;  %v55_v28 = vld [vmem:[#allocation4] sm:$0xf]  ;;  %458 = vmatprep.subr.msk.bf16.mxu0 %vm578_vm2, %v456_v20  ;;  %v465_v29 = vpack.c.bf16 %v53_v27, %v45_v26 }
  0x2c   :  { %58 = vperm.xlu0 %475, %v55_v28   ;;  %395 = vperm.xlu1 %477, %v55_v28  }
  0x2d   :  { %434 = vmatmul.mubr.msk.f32.vlgmr.msra.gmra.mrb[0].mxu0 %vm61_vm3, %v38_v15  ;;  %464 = vmatprep.subr.msk.bf16.mxu1 %vm578_vm2, %v462_v24 }
  0x2e   :  { %437 = vmatmul.mubr.msk.f32.vlgmr.msra.gmra.mrb[0].mxu1 %vm61_vm3, %v38_v15  ;;  %461 = vmatpush1.bf16.msk.msra.mxu0 %vm578_vm2, %v459_v25 }
  0x2f   :  { %467 = vmatpush1.bf16.msk.msra.mxu1 %vm578_vm2, %v465_v29  ;;  %296 = vmatprep.mubr.f32.mxu0 %v529_v0 }
  0x30   :  { %367 = vmatprep.mubr.f32.mxu1 %v529_v0  ;;  %476 = vset.pattern.permute.xlu0 %v533_v30 }
  0x31   :  { %440 = vmatmul.mubr.msk.f32.vlgmr.msra.gmra.mrb[2].mxu0 %vm61_vm3, %v38_v15  ;;  %383 = vperm.xlu0 %476, %v55_v28  }
  0x32   :  { %443 = vmatmul.mubr.msk.f32.vlgmr.msra.gmra.mrb[2].mxu1 %vm61_vm3, %v38_v15 }
  0x35   :  { %478 = vset.pattern.permute.xlu0 %v531_v2 }
  0xab   :  { %v59_v31 = vpop.permute.xlu0 %58  ;;  %v396_v45 = vpop.permute.xlu1 %395 }
  0xb0   :  { %v384_v38 = vpop.permute.xlu0 %383 }
 0x100   :  { %v156_v32 = vpop.f32.mrb[0].mxu0 }
 0x101   :  { %v227_v33 = vpop.f32.mrb[0].mxu1  ;;  %v158_v34 = vpop.f32.mrb[1].mxu0  ;;  %v157_v35 = vadd.f32 %v156_v32, %v59_v31 }
 0x102   :  { %v159_v36 = vadd.f32 %v158_v34, %v59_v31  ;;  %v229_v37 = vpop.f32.mrb[1].mxu1  ;;  %v228_v39 = vadd.f32 %v227_v33, %v59_v31 }
 0x103   :  { %v230_v40 = vadd.f32 %v229_v37, %v59_v31  ;;  %v374_v41 = vmax.f32 %v157_v35, 0.0 }
 0x104   :  { %v375_v42 = vmax.f32 %v159_v36, 0.0  ;;  %v298_v43 = vpop.f32.mrb[2].mxu0  ;;  %v376_v44 = vmax.f32 %v228_v39, 0.0 }
 0x105   :  { %v377_v46 = vmax.f32 %v230_v40, 0.0  ;;  %v299_v47 = vadd.f32 %v298_v43, %v59_v31  ;;  %v369_v48 = vpop.f32.mrb[2].mxu1  ;;  %v386_v49 = vmul.f32 %v384_v38, %v374_v41  ;;  %v300_v50 = vpop.f32.mrb[3].mxu0 }
 0x106   :  { %v370_v51 = vadd.f32 %v369_v48, %v59_v31  ;;  %v387_v52 = vmul.f32 %v384_v38, %v375_v42  ;;  %v388_v53 = vmul.f32 %v384_v38, %v376_v44  ;;  %v301_v54 = vadd.f32 %v300_v50, %v59_v31  ;;  %v371_v55 = vpop.f32.mrb[3].mxu1 }
 0x107   :  { %v378_v56 = vmax.f32 %v299_v47, 0.0  ;;  %v389_v57 = vmul.f32 %v384_v38, %v377_v46  ;;  %v372_v58 = vadd.f32 %v371_v55, %v59_v31  ;;  %v398_v59 = vadd.f32 %v396_v45, %v386_v49 }
 0x108   :  { %v380_v60 = vmax.f32 %v370_v51, 0.0  ;;  %v379_v61 = vmax.f32 %v301_v54, 0.0  ;;  %v399_v62 = vadd.f32 %v396_v45, %v387_v52  ;;  %v400_v63 = vadd.f32 %v396_v45, %v388_v53 }
 0x109   :  { %v390_v0 = vmul.f32 %v384_v38, %v378_v56  ;;  %v381_v1 = vmax.f32 %v372_v58, 0.0  ;;  %v401_v2 = vadd.f32 %v396_v45, %v389_v57 }
 0x10a   :  { %v392_v3 = vmul.f32 %v384_v38, %v380_v60  ;;  %v391_v4 = vmul.f32 %v384_v38, %v379_v61  ;;  %v414_v5 = vcombine.low %v398_v59, %v399_v62 }
 0x10b   :  { %v393_v6 = vmul.f32 %v384_v38, %v381_v1  ;;  %v402_v7 = vadd.f32 %v396_v45, %v390_v0  ;;  %v415_v8 = vcombine.low %v400_v63, %v401_v2 }
 0x10c   :  { %v403_v9 = vadd.f32 %v396_v45, %v391_v4  ;;  %v404_v10 = vadd.f32 %v396_v45, %v392_v3  ;;  %422 = vst [vmem:[%s665_s3] sm:$0xff] %v414_v5 }
 0x10d   :  { %v405_v11 = vadd.f32 %v396_v45, %v393_v6  ;;  %423 = vst [vmem:[%s665_s3 + $0x8] sm:$0xff] %v415_v8 }
 0x10e   :  { %v416_v12 = vcombine.low %v402_v7, %v403_v9 }
 0x10f   :  { %v417_v13 = vcombine.low %v404_v10, %v405_v11 }
 0x110   :  { %424 = vst [vmem:[%s665_s3 + $0x10] sm:$0xff] %v416_v12 }
 0x111   :  { %425 = vst [vmem:[%s665_s3 + $0x18] sm:$0xff] %v417_v13 }
 0x112   :  { %430 = vsyncpa [#allocation3], 1 }
 0x113   :  { %431 = vsyncpa [#allocation5], 1 }

// kernel: _lambda_.5
= control target key start
LH: loop header
LB: loop body
LE: loop exit
PB: predicated region body
PF: predicated region fallthrough
CT: control target
= control target key end

     0   :  { %v470_v3 = vmov 0.0   ;;  %v471_v8 = vmov 0   ;;  %v472_v9 = vmov 2   ;;  %vm65_vm0 = vcmask 1043456   ;;  %s662_s0 = inlined_call_operand.vmem [shape: f32[36,1024], index: 0, kind: input, shape index: {}]   ;;  %s663_s1 = inlined_call_operand.vmem [shape: f32[8,36], index: 1, kind: input, shape index: {}]   ;;  %s664_s2 = inlined_call_operand.vmem [shape: f32[8,3], index: 2, kind: input, shape index: {}]   ;;  %s665_s3 = inlined_call_operand.vmem [shape: f32[8,1024], index: 3, kind: output, shape index: {}]  }
   0x1   :  { %v16_v0 = vld [vmem:[%s662_s0 + $0x8] sm:$0xff]  ;;  %v18_v2 = vld [vmem:[%s662_s0 + $0x18] sm:$0xff]  ;;  %154 = vmatprep.mubr.f32.mxu0 %v470_v3  ;;  %225 = vmatprep.mubr.f32.mxu1 %v470_v3  ;;  %v15_v6 = vld [vmem:[%s662_s0] sm:$0xff]  ;;  %vm61_vm1 = vcmask 293888   ;;  %v473_v61 = vmov 1  }
   0x2   :  { %v24_v1 = vld [vmem:[%s662_s0 + $0x48] sm:$0xff]  ;;  %v26_v5 = vld [vmem:[%s662_s0 + $0x58] sm:$0xff]  ;;  %v23_v7 = vld [vmem:[%s662_s0 + $0x40] sm:$0xff]  ;;  %466 = vset.pattern.permute.xlu0 %v471_v8  ;;  %468 = vset.pattern.permute.xlu1 %v472_v9 }
   0x3   :  { %v430_v4 = vpack.c.bf16 %v24_v1, %v16_v0  ;;  %v438_v10 = vpack.c.bf16 %v26_v5, %v18_v2  ;;  %v432_v11 = vpack.c.bf16 %v23_v7, %v15_v6  ;;  %v17_v12 = vld [vmem:[%s662_s0 + $0x10] sm:$0xff]  ;;  %v32_v14 = vld [vmem:[%s662_s0 + $0x88] sm:$0xff]  ;;  %v34_v17 = vld [vmem:[%s662_s0 + $0x98] sm:$0xff] }
   0x4   :  { %v25_v13 = vld [vmem:[%s662_s0 + $0x50] sm:$0xff]  ;;  %v40_v16 = vld [vmem:[%s662_s0 + $0xc8] sm:$0xff]  ;;  %v42_v18 = vld [vmem:[%s662_s0 + $0xd8] sm:$0xff] }
   0x5   :  { %431 = vmatprep.subr.bf16.mxu0 %v430_v4  ;;  %v440_v15 = vpack.c.bf16 %v25_v13, %v17_v12  ;;  %439 = vmatprep.subr.bf16.mxu1 %v438_v10  ;;  %v434_v19 = vpack.c.bf16 %v40_v16, %v32_v14  ;;  %v442_v20 = vpack.c.bf16 %v42_v18, %v34_v17  ;;  %v31_v21 = vld [vmem:[%s662_s0 + $0x80] sm:$0xff]  ;;  %v33_v23 = vld [vmem:[%s662_s0 + $0x90] sm:$0xff]  ;;  %v48_v27 = vld [vmem:[%s662_s0 + $0x108] sm:$0xf] }
   0x6   :  { %433 = vmatpush1.bf16.msra.mxu0 %v432_v11  ;;  %v39_v22 = vld [vmem:[%s662_s0 + $0xc0] sm:$0xff]  ;;  %v41_v25 = vld [vmem:[%s662_s0 + $0xd0] sm:$0xff]  ;;  %v50_v28 = vld [vmem:[%s662_s0 + $0x118] sm:$0xf] }
   0x7   :  { %441 = vmatpush1.bf16.msra.mxu1 %v440_v15  ;;  %v436_v24 = vpack.c.bf16 %v39_v22, %v31_v21  ;;  %435 = vmatprep.subr.bf16.mxu0 %v434_v19  ;;  %v444_v26 = vpack.c.bf16 %v41_v25, %v33_v23  ;;  %v47_v29 = vld [vmem:[%s662_s0 + $0x100] sm:$0xf]  ;;  %v20_v30 = vld [vmem:[%s662_s0 + $0x28] sm:$0xff]  ;;  %v22_v32 = vld [vmem:[%s662_s0 + $0x38] sm:$0xff] }
   0x8   :  { %443 = vmatprep.subr.bf16.mxu1 %v442_v20  ;;  %v28_v31 = vld [vmem:[%s662_s0 + $0x68] sm:$0xff]  ;;  %v49_v33 = vld [vmem:[%s662_s0 + $0x110] sm:$0xf]  ;;  %v14_v34 = vld [vmem:[%s663_s1] sm:$0xff] }
   0x9   :  { %v30_v35 = vld [vmem:[%s662_s0 + $0x78] sm:$0xff]  ;;  %v19_v36 = vld [vmem:[%s662_s0 + $0x20] sm:$0xff]  ;;  %v21_v38 = vld [vmem:[%s662_s0 + $0x30] sm:$0xff]  ;;  %v446_v41 = vpack.c.bf16 %v28_v31, %v20_v30 }
   0xa   :  { %437 = vmatpush1.bf16.msra.mxu0 %v436_v24  ;;  %v27_v37 = vld [vmem:[%s662_s0 + $0x60] sm:$0xff]  ;;  %v29_v39 = vld [vmem:[%s662_s0 + $0x70] sm:$0xff]  ;;  %v36_v40 = vld [vmem:[%s662_s0 + $0xa8] sm:$0xff]  ;;  %v454_v45 = vpack.c.bf16 %v30_v35, %v22_v32 }
   0xb   :  { %445 = vmatpush1.bf16.msra.mxu1 %v444_v26  ;;  %418 = vmatprep.subr.msk.mxu0 %vm65_vm0, %v48_v27  ;;  %v44_v42 = vld [vmem:[%s662_s0 + $0xe8] sm:$0xff]  ;;  %v38_v43 = vld [vmem:[%s662_s0 + $0xb8] sm:$0xff]  ;;  %v448_v46 = vpack.c.bf16 %v27_v37, %v19_v36  ;;  %v456_v47 = vpack.c.bf16 %v29_v39, %v21_v38  ;;  %v35_v49 = vld [vmem:[%s662_s0 + $0xa0] sm:$0xff] }
   0xc   :  { %421 = vmatprep.subr.msk.mxu1 %vm65_vm0, %v50_v28  ;;  %v46_v44 = vld [vmem:[%s662_s0 + $0xf8] sm:$0xff]  ;;  %v450_v48 = vpack.c.bf16 %v44_v42, %v36_v40  ;;  %v43_v50 = vld [vmem:[%s662_s0 + $0xe0] sm:$0xff]  ;;  %v37_v52 = vld [vmem:[%s662_s0 + $0xb0] sm:$0xff] }
   0xd   :  { %v458_v51 = vpack.c.bf16 %v46_v44, %v38_v43  ;;  %v45_v53 = vld [vmem:[%s662_s0 + $0xf0] sm:$0xff]  ;;  %v452_v54 = vpack.c.bf16 %v43_v50, %v35_v49  ;;  %v55_v55 = vld [vmem:[%s664_s2] sm:$0xff]  ;;  %v52_v57 = vld [vmem:[%s662_s0 + $0x128] sm:$0xf] }
   0xe   :  { %419 = vmatpush1.msk.msra.mxu0 %vm65_vm0, %v47_v29  ;;  %v460_v56 = vpack.c.bf16 %v45_v53, %v37_v52  ;;  %v54_v58 = vld [vmem:[%s662_s0 + $0x138] sm:$0xf]  ;;  %58 = vperm.xlu0 %466, %v55_v55   ;;  %v51_v59 = vld [vmem:[%s662_s0 + $0x120] sm:$0xf]  ;;  %v53_v60 = vld [vmem:[%s662_s0 + $0x130] sm:$0xf] }
   0xf   :  { %422 = vmatpush1.msk.msra.mxu1 %vm65_vm0, %v49_v33  ;;  %420 = vmatmul.mubr.msk.f32.vlgmr.msra.gmra.mrb[0].mxu0 %vm61_vm1, %v14_v34 }
  0x10   :  { %423 = vmatmul.mubr.msk.f32.vlgmr.msra.gmra.mrb[0].mxu1 %vm61_vm1, %v14_v34  ;;  %447 = vmatprep.subr.bf16.mxu0 %v446_v41 }
  0x11   :  { %455 = vmatprep.subr.bf16.mxu1 %v454_v45  ;;  %449 = vmatpush1.bf16.msra.mxu0 %v448_v46 }
  0x12   :  { %457 = vmatpush1.bf16.msra.mxu1 %v456_v47  ;;  %451 = vmatprep.subr.bf16.mxu0 %v450_v48 }
  0x13   :  { %459 = vmatprep.subr.bf16.mxu1 %v458_v51  ;;  %296 = vmatprep.mubr.f32.mxu0 %v470_v3 }
  0x14   :  { %367 = vmatprep.mubr.f32.mxu1 %v470_v3  ;;  %395 = vperm.xlu1 %468, %v55_v55  }
  0x15   :  { %453 = vmatpush1.bf16.msra.mxu0 %v452_v54  ;;  %467 = vset.pattern.permute.xlu0 %v473_v61 }
  0x16   :  { %461 = vmatpush1.bf16.msra.mxu1 %v460_v56  ;;  %424 = vmatprep.subr.msk.mxu0 %vm65_vm0, %v52_v57 }
  0x17   :  { %427 = vmatprep.subr.msk.mxu1 %vm65_vm0, %v54_v58  ;;  %383 = vperm.xlu0 %467, %v55_v55  }
  0x19   :  { %425 = vmatpush1.msk.msra.mxu0 %vm65_vm0, %v51_v59 }
  0x1a   :  { %428 = vmatpush1.msk.msra.mxu1 %vm65_vm0, %v53_v60  ;;  %426 = vmatmul.mubr.msk.f32.vlgmr.msra.gmra.mrb[2].mxu0 %vm61_vm1, %v14_v34 }
  0x1b   :  { %429 = vmatmul.mubr.msk.f32.vlgmr.msra.gmra.mrb[2].mxu1 %vm61_vm1, %v14_v34  ;;  %469 = vset.pattern.permute.xlu0 %v472_v9 }
  0x8d   :  { %v59_v62 = vpop.permute.xlu0 %58 }
  0x93   :  { %v396_v12 = vpop.permute.xlu1 %395 }
  0x96   :  { %v384_v5 = vpop.permute.xlu0 %383 }
  0xe2   :  { %v156_v63 = vpop.f32.mrb[0].mxu0 }
  0xe3   :  { %v227_v0 = vpop.f32.mrb[0].mxu1  ;;  %v158_v1 = vpop.f32.mrb[1].mxu0  ;;  %v157_v2 = vadd.f32 %v156_v63, %v59_v62 }
  0xe4   :  { %v159_v3 = vadd.f32 %v158_v1, %v59_v62  ;;  %v229_v4 = vpop.f32.mrb[1].mxu1  ;;  %v228_v6 = vadd.f32 %v227_v0, %v59_v62 }
  0xe5   :  { %v230_v7 = vadd.f32 %v229_v4, %v59_v62  ;;  %v374_v8 = vmax.f32 %v157_v2, 0.0 }
  0xe6   :  { %v375_v10 = vmax.f32 %v159_v3, 0.0  ;;  %v376_v11 = vmax.f32 %v228_v6, 0.0 }
  0xe7   :  { %v377_v13 = vmax.f32 %v230_v7, 0.0  ;;  %v386_v14 = vmul.f32 %v384_v5, %v374_v8 }
  0xe8   :  { %v387_v15 = vmul.f32 %v384_v5, %v375_v10  ;;  %v388_v16 = vmul.f32 %v384_v5, %v376_v11 }
  0xe9   :  { %v389_v17 = vmul.f32 %v384_v5, %v377_v13  ;;  %v398_v9 = vadd.f32 %v396_v12, %v386_v14 }
  0xea   :  { %v399_v18 = vadd.f32 %v396_v12, %v387_v15  ;;  %v400_v19 = vadd.f32 %v396_v12, %v388_v16 }
  0xeb   :  { %v401_v20 = vadd.f32 %v396_v12, %v389_v17  ;;  %406 = vst [vmem:[%s665_s3] sm:$0xff] %v398_v9 }
  0xec   :  { %407 = vst [vmem:[%s665_s3 + $0x8] sm:$0xff] %v399_v18  ;;  %408 = vst [vmem:[%s665_s3 + $0x10] sm:$0xff] %v400_v19 }
  0xed   :  { %409 = vst [vmem:[%s665_s3 + $0x18] sm:$0xff] %v401_v20  ;;  %v298_v21 = vpop.f32.mrb[2].mxu0 }
  0xee   :  { %v299_v22 = vadd.f32 %v298_v21, %v59_v62  ;;  %v369_v23 = vpop.f32.mrb[2].mxu1  ;;  %v300_v24 = vpop.f32.mrb[3].mxu0 }
  0xef   :  { %v370_v25 = vadd.f32 %v369_v23, %v59_v62  ;;  %v301_v26 = vadd.f32 %v300_v24, %v59_v62  ;;  %v371_v27 = vpop.f32.mrb[3].mxu1 }
  0xf0   :  { %v378_v28 = vmax.f32 %v299_v22, 0.0  ;;  %v372_v29 = vadd.f32 %v371_v27, %v59_v62 }
  0xf1   :  { %v380_v30 = vmax.f32 %v370_v25, 0.0  ;;  %v379_v31 = vmax.f32 %v301_v26, 0.0 }
  0xf2   :  { %v390_v32 = vmul.f32 %v384_v5, %v378_v28  ;;  %v381_v33 = vmax.f32 %v372_v29, 0.0 }
  0xf3   :  { %v392_v34 = vmul.f32 %v384_v5, %v380_v30  ;;  %v391_v35 = vmul.f32 %v384_v5, %v379_v31 }
  0xf4   :  { %v402_v36 = vadd.f32 %v396_v12, %v390_v32  ;;  %v393_v37 = vmul.f32 %v384_v5, %v381_v33 }
  0xf5   :  { %v404_v38 = vadd.f32 %v396_v12, %v392_v34  ;;  %v403_v39 = vadd.f32 %v396_v12, %v391_v35 }
  0xf6   :  { %410 = vst [vmem:[%s665_s3 + $0x20] sm:$0xff] %v402_v36  ;;  %v405_v40 = vadd.f32 %v396_v12, %v393_v37 }
  0xf7   :  { %412 = vst [vmem:[%s665_s3 + $0x30] sm:$0xff] %v404_v38  ;;  %411 = vst [vmem:[%s665_s3 + $0x28] sm:$0xff] %v403_v39 }
  0xf8   :  { %413 = vst [vmem:[%s665_s3 + $0x38] sm:$0xff] %v405_v40 }

// kernel: _lambda_.6
= control target key start
LH: loop header
LB: loop body
LE: loop exit
PB: predicated region body
PF: predicated region fallthrough
CT: control target
= control target key end

     0   :  { %v501_v3 = vmov 0.0   ;;  %v502_v8 = vmov 0   ;;  %v503_v9 = vmov 2   ;;  %vm93_vm0 = vcmask 588800   ;;  %s787_s0 = inlined_call_operand.vmem [shape: f32[72,1024], index: 0, kind: input, shape index: {}]   ;;  %s788_s1 = inlined_call_operand.vmem [shape: f32[8,72], index: 1, kind: input, shape index: {}]   ;;  %s789_s2 = inlined_call_operand.vmem [shape: f32[8,3], index: 2, kind: input, shape index: {}]   ;;  %s790_s3 = inlined_call_operand.vmem [shape: f32[8,1024], index: 3, kind: output, shape index: {}]  }
   0x1   :  { %v16_v0 = vld [vmem:[%s787_s0 + $0x8] sm:$0xff]  ;;  %v18_v2 = vld [vmem:[%s787_s0 + $0x18] sm:$0xff]  ;;  %161 = vmatprep.mubr.f32.mxu0 %v501_v3  ;;  %232 = vmatprep.mubr.f32.mxu1 %v501_v3  ;;  %v15_v6 = vld [vmem:[%s787_s0] sm:$0xff] }
   0x2   :  { %v24_v1 = vld [vmem:[%s787_s0 + $0x48] sm:$0xff]  ;;  %v26_v5 = vld [vmem:[%s787_s0 + $0x58] sm:$0xff]  ;;  %v23_v7 = vld [vmem:[%s787_s0 + $0x40] sm:$0xff]  ;;  %497 = vset.pattern.permute.xlu0 %v502_v8  ;;  %499 = vset.pattern.permute.xlu1 %v503_v9 }
   0x3   :  { %v429_v4 = vpack.c.bf16 %v24_v1, %v16_v0  ;;  %v445_v10 = vpack.c.bf16 %v26_v5, %v18_v2  ;;  %v431_v11 = vpack.c.bf16 %v23_v7, %v15_v6  ;;  %v17_v12 = vld [vmem:[%s787_s0 + $0x10] sm:$0xff]  ;;  %v32_v14 = vld [vmem:[%s787_s0 + $0x88] sm:$0xff]  ;;  %v34_v17 = vld [vmem:[%s787_s0 + $0x98] sm:$0xff] }
   0x4   :  { %v25_v13 = vld [vmem:[%s787_s0 + $0x50] sm:$0xff]  ;;  %v40_v16 = vld [vmem:[%s787_s0 + $0xc8] sm:$0xff]  ;;  %v42_v18 = vld [vmem:[%s787_s0 + $0xd8] sm:$0xff] }
   0x5   :  { %430 = vmatprep.subr.bf16.mxu0 %v429_v4  ;;  %v447_v15 = vpack.c.bf16 %v25_v13, %v17_v12  ;;  %446 = vmatprep.subr.bf16.mxu1 %v445_v10  ;;  %v433_v19 = vpack.c.bf16 %v40_v16, %v32_v14  ;;  %v449_v20 = vpack.c.bf16 %v42_v18, %v34_v17  ;;  %v31_v21 = vld [vmem:[%s787_s0 + $0x80] sm:$0xff]  ;;  %v33_v23 = vld [vmem:[%s787_s0 + $0x90] sm:$0xff]  ;;  %v48_v26 = vld [vmem:[%s787_s0 + $0x108] sm:$0xff] }
   0x6   :  { %432 = vmatpush1.bf16.msra.mxu0 %v431_v11  ;;  %v39_v22 = vld [vmem:[%s787_s0 + $0xc0] sm:$0xff]  ;;  %v41_v25 = vld [vmem:[%s787_s0 + $0xd0] sm:$0xff]  ;;  %v56_v27 = vld [vmem:[%s787_s0 + $0x148] sm:$0xff] }
   0x7   :  { %448 = vmatpush1.bf16.msra.mxu1 %v447_v15  ;;  %v435_v24 = vpack.c.bf16 %v39_v22, %v31_v21  ;;  %434 = vmatprep.subr.bf16.mxu0 %v433_v19  ;;  %v451_v28 = vpack.c.bf16 %v41_v25, %v33_v23  ;;  %v437_v29 = vpack.c.bf16 %v56_v27, %v48_v26  ;;  %v50_v30 = vld [vmem:[%s787_s0 + $0x118] sm:$0xff]  ;;  %v47_v32 = vld [vmem:[%s787_s0 + $0x100] sm:$0xff]  ;;  %v49_v35 = vld [vmem:[%s787_s0 + $0x110] sm:$0xff] }
   0x8   :  { %450 = vmatprep.subr.bf16.mxu1 %v449_v20  ;;  %v58_v31 = vld [vmem:[%s787_s0 + $0x158] sm:$0xff]  ;;  %v55_v34 = vld [vmem:[%s787_s0 + $0x140] sm:$0xff]  ;;  %v57_v36 = vld [vmem:[%s787_s0 + $0x150] sm:$0xff] }
   0x9   :  { %v453_v33 = vpack.c.bf16 %v58_v31, %v50_v30  ;;  %v439_v37 = vpack.c.bf16 %v55_v34, %v47_v32  ;;  %v64_v38 = vld [vmem:[%s787_s0 + $0x188] sm:$0xff]  ;;  %v66_v40 = vld [vmem:[%s787_s0 + $0x198] sm:$0xff]  ;;  %v455_v41 = vpack.c.bf16 %v57_v36, %v49_v35  ;;  %v63_v44 = vld [vmem:[%s787_s0 + $0x180] sm:$0xff] }
   0xa   :  { %436 = vmatpush1.bf16.msra.mxu0 %v435_v24  ;;  %v72_v39 = vld [vmem:[%s787_s0 + $0x1c8] sm:$0xff]  ;;  %v74_v43 = vld [vmem:[%s787_s0 + $0x1d8] sm:$0xff]  ;;  %v71_v45 = vld [vmem:[%s787_s0 + $0x1c0] sm:$0xff] }
   0xb   :  { %452 = vmatpush1.bf16.msra.mxu1 %v451_v28  ;;  %438 = vmatprep.subr.bf16.mxu0 %v437_v29  ;;  %v441_v42 = vpack.c.bf16 %v72_v39, %v64_v38  ;;  %v457_v46 = vpack.c.bf16 %v74_v43, %v66_v40  ;;  %v65_v47 = vld [vmem:[%s787_s0 + $0x190] sm:$0xff]  ;;  %v443_v49 = vpack.c.bf16 %v71_v45, %v63_v44  ;;  %v80_v51 = vld [vmem:[%s787_s0 + $0x208] sm:$0xff]  ;;  %v82_v52 = vld [vmem:[%s787_s0 + $0x218] sm:$0xff]  ;;  %v504_v40 = vmov 1  }
   0xc   :  { %454 = vmatprep.subr.bf16.mxu1 %v453_v33  ;;  %v73_v48 = vld [vmem:[%s787_s0 + $0x1d0] sm:$0xff]  ;;  %v20_v53 = vld [vmem:[%s787_s0 + $0x28] sm:$0xff]  ;;  %v79_v54 = vld [vmem:[%s787_s0 + $0x200] sm:$0xff] }
   0xd   :  { %v459_v50 = vpack.c.bf16 %v73_v48, %v65_v47  ;;  %v28_v55 = vld [vmem:[%s787_s0 + $0x68] sm:$0xff]  ;;  %v22_v56 = vld [vmem:[%s787_s0 + $0x38] sm:$0xff]  ;;  %v81_v58 = vld [vmem:[%s787_s0 + $0x210] sm:$0xff] }
   0xe   :  { %440 = vmatpush1.bf16.msra.mxu0 %v439_v37  ;;  %v30_v57 = vld [vmem:[%s787_s0 + $0x78] sm:$0xff]  ;;  %v19_v59 = vld [vmem:[%s787_s0 + $0x20] sm:$0xff]  ;;  %v21_v61 = vld [vmem:[%s787_s0 + $0x30] sm:$0xff]  ;;  %v461_v2 = vpack.c.bf16 %v28_v55, %v20_v53 }
   0xf   :  { %456 = vmatpush1.bf16.msra.mxu1 %v455_v41  ;;  %442 = vmatprep.subr.bf16.mxu0 %v441_v42  ;;  %v27_v60 = vld [vmem:[%s787_s0 + $0x60] sm:$0xff]  ;;  %v29_v62 = vld [vmem:[%s787_s0 + $0x70] sm:$0xff]  ;;  %v36_v63 = vld [vmem:[%s787_s0 + $0xa8] sm:$0xff]  ;;  %v477_v6 = vpack.c.bf16 %v30_v57, %v22_v56 }
  0x10   :  { %458 = vmatprep.subr.bf16.mxu1 %v457_v46  ;;  %v44_v0 = vld [vmem:[%s787_s0 + $0xe8] sm:$0xff]  ;;  %v669_v1 = vld [vmem:[%s788_s1] sm:$0xff]  ;;  %v38_v4 = vld [vmem:[%s787_s0 + $0xb8] sm:$0xff]  ;;  %v463_v7 = vpack.c.bf16 %v27_v60, %v19_v59  ;;  %v479_v8 = vpack.c.bf16 %v29_v62, %v21_v61 }
  0x11   :  { %v46_v5 = vld [vmem:[%s787_s0 + $0xf8] sm:$0xff]  ;;  %v465_v10 = vpack.c.bf16 %v44_v0, %v36_v63  ;;  %v35_v11 = vld [vmem:[%s787_s0 + $0xa0] sm:$0xff]  ;;  %v37_v13 = vld [vmem:[%s787_s0 + $0xb0] sm:$0xff] }
  0x12   :  { %444 = vmatpush1.bf16.msra.mxu0 %v443_v49  ;;  %v43_v12 = vld [vmem:[%s787_s0 + $0xe0] sm:$0xff]  ;;  %v481_v14 = vpack.c.bf16 %v46_v5, %v38_v4  ;;  %v45_v15 = vld [vmem:[%s787_s0 + $0xf0] sm:$0xff]  ;;  %v52_v16 = vld [vmem:[%s787_s0 + $0x128] sm:$0xff] }
  0x13   :  { %460 = vmatpush1.bf16.msra.mxu1 %v459_v50  ;;  %113 = vmatprep.subr.mxu0 %v80_v51  ;;  %v60_v17 = vld [vmem:[%s787_s0 + $0x168] sm:$0xff]  ;;  %v54_v18 = vld [vmem:[%s787_s0 + $0x138] sm:$0xff]  ;;  %v467_v20 = vpack.c.bf16 %v43_v12, %v35_v11  ;;  %v51_v21 = vld [vmem:[%s787_s0 + $0x120] sm:$0xff]  ;;  %v483_v22 = vpack.c.bf16 %v45_v15, %v37_v13 }
  0x14   :  { %184 = vmatprep.subr.mxu1 %v82_v52  ;;  %v62_v19 = vld [vmem:[%s787_s0 + $0x178] sm:$0xff]  ;;  %v469_v23 = vpack.c.bf16 %v60_v17, %v52_v16  ;;  %v59_v24 = vld [vmem:[%s787_s0 + $0x160] sm:$0xff]  ;;  %v53_v25 = vld [vmem:[%s787_s0 + $0x130] sm:$0xff] }
  0x15   :  { %v87_v26 = vld [vmem:[%s789_s2] sm:$0xff]  ;;  %v485_v27 = vpack.c.bf16 %v62_v19, %v54_v18  ;;  %v61_v28 = vld [vmem:[%s787_s0 + $0x170] sm:$0xff]  ;;  %v68_v29 = vld [vmem:[%s787_s0 + $0x1a8] sm:$0xff]  ;;  %v471_v33 = vpack.c.bf16 %v59_v24, %v51_v21 }
  0x16   :  { %114 = vmatpush1.msra.mxu0 %v79_v54  ;;  %v76_v30 = vld [vmem:[%s787_s0 + $0x1e8] sm:$0xff]  ;;  %v70_v31 = vld [vmem:[%s787_s0 + $0x1b8] sm:$0xff]  ;;  %90 = vperm.xlu0 %497, %v87_v26   ;;  %v487_v34 = vpack.c.bf16 %v61_v28, %v53_v25  ;;  %v67_v36 = vld [vmem:[%s787_s0 + $0x1a0] sm:$0xff] }
  0x17   :  { %185 = vmatpush1.msra.mxu1 %v81_v58  ;;  %425 = vmatmul.mubr.msk.f32.vlgmr.msra.gmra.mrb[0].mxu0 %vm93_vm0, %v669_v1  ;;  %v78_v32 = vld [vmem:[%s787_s0 + $0x1f8] sm:$0xff]  ;;  %v473_v35 = vpack.c.bf16 %v76_v30, %v68_v29  ;;  %v75_v37 = vld [vmem:[%s787_s0 + $0x1e0] sm:$0xff]  ;;  %v77_v39 = vld [vmem:[%s787_s0 + $0x1f0] sm:$0xff] }
  0x18   :  { %426 = vmatmul.mubr.msk.f32.vlgmr.msra.gmra.mrb[0].mxu1 %vm93_vm0, %v669_v1  ;;  %462 = vmatprep.subr.bf16.mxu0 %v461_v2  ;;  %v489_v38 = vpack.c.bf16 %v78_v32, %v70_v31  ;;  %v475_v41 = vpack.c.bf16 %v75_v37, %v67_v36  ;;  %v84_v43 = vld [vmem:[%s787_s0 + $0x228] sm:$0xff]  ;;  %v86_v44 = vld [vmem:[%s787_s0 + $0x238] sm:$0xff]  ;;  %v83_v45 = vld [vmem:[%s787_s0 + $0x220] sm:$0xff] }
  0x19   :  { %478 = vmatprep.subr.bf16.mxu1 %v477_v6  ;;  %464 = vmatpush1.bf16.msra.mxu0 %v463_v7  ;;  %v85_v46 = vld [vmem:[%s787_s0 + $0x230] sm:$0xff] }
  0x1a   :  { %480 = vmatpush1.bf16.msra.mxu1 %v479_v8  ;;  %466 = vmatprep.subr.bf16.mxu0 %v465_v10 }
  0x1b   :  { %482 = vmatprep.subr.bf16.mxu1 %v481_v14  ;;  %303 = vmatprep.mubr.f32.mxu0 %v501_v3 }
  0x1c   :  { %374 = vmatprep.mubr.f32.mxu1 %v501_v3  ;;  %402 = vperm.xlu1 %499, %v87_v26   ;;  %v69_v3 = vld [vmem:[%s787_s0 + $0x1b0] sm:$0xff] }
  0x1d   :  { %468 = vmatpush1.bf16.msra.mxu0 %v467_v20  ;;  %498 = vset.pattern.permute.xlu0 %v504_v40  ;;  %v491_v42 = vpack.c.bf16 %v77_v39, %v69_v3 }
  0x1e   :  { %484 = vmatpush1.bf16.msra.mxu1 %v483_v22  ;;  %470 = vmatprep.subr.bf16.mxu0 %v469_v23 }
  0x1f   :  { %486 = vmatprep.subr.bf16.mxu1 %v485_v27  ;;  %390 = vperm.xlu0 %498, %v87_v26  }
  0x21   :  { %472 = vmatpush1.bf16.msra.mxu0 %v471_v33 }
  0x22   :  { %488 = vmatpush1.bf16.msra.mxu1 %v487_v34  ;;  %474 = vmatprep.subr.bf16.mxu0 %v473_v35 }
  0x23   :  { %490 = vmatprep.subr.bf16.mxu1 %v489_v38  ;;  %500 = vset.pattern.permute.xlu0 %v503_v9 }
  0x25   :  { %476 = vmatpush1.bf16.msra.mxu0 %v475_v41 }
  0x26   :  { %492 = vmatpush1.bf16.msra.mxu1 %v491_v42  ;;  %255 = vmatprep.subr.mxu0 %v84_v43 }
  0x27   :  { %326 = vmatprep.subr.mxu1 %v86_v44 }
  0x29   :  { %256 = vmatpush1.msra.mxu0 %v83_v45 }
  0x2a   :  { %327 = vmatpush1.msra.mxu1 %v85_v46  ;;  %427 = vmatmul.mubr.msk.f32.vlgmr.msra.gmra.mrb[2].mxu0 %vm93_vm0, %v669_v1 }
  0x2b   :  { %428 = vmatmul.mubr.msk.f32.vlgmr.msra.gmra.mrb[2].mxu1 %vm93_vm0, %v669_v1 }
  0x95   :  { %v91_v9 = vpop.permute.xlu0 %90 }
  0x9b   :  { %v403_v59 = vpop.permute.xlu1 %402 }
  0x9e   :  { %v391_v53 = vpop.permute.xlu0 %390 }
  0xea   :  { %v163_v47 = vpop.f32.mrb[0].mxu0 }
  0xeb   :  { %v234_v48 = vpop.f32.mrb[0].mxu1  ;;  %v165_v49 = vpop.f32.mrb[1].mxu0  ;;  %v164_v50 = vadd.f32 %v163_v47, %v91_v9 }
  0xec   :  { %v166_v51 = vadd.f32 %v165_v49, %v91_v9  ;;  %v236_v52 = vpop.f32.mrb[1].mxu1  ;;  %v235_v54 = vadd.f32 %v234_v48, %v91_v9 }
  0xed   :  { %v237_v55 = vadd.f32 %v236_v52, %v91_v9  ;;  %v381_v56 = vmax.f32 %v164_v50, 0.0 }
  0xee   :  { %v382_v57 = vmax.f32 %v166_v51, 0.0  ;;  %v383_v58 = vmax.f32 %v235_v54, 0.0 }
  0xef   :  { %v384_v60 = vmax.f32 %v237_v55, 0.0  ;;  %v393_v61 = vmul.f32 %v391_v53, %v381_v56 }
  0xf0   :  { %v394_v62 = vmul.f32 %v391_v53, %v382_v57  ;;  %v395_v63 = vmul.f32 %v391_v53, %v383_v58 }
  0xf1   :  { %v396_v0 = vmul.f32 %v391_v53, %v384_v60  ;;  %v405_v1 = vadd.f32 %v403_v59, %v393_v61 }
  0xf2   :  { %v406_v2 = vadd.f32 %v403_v59, %v394_v62  ;;  %v407_v4 = vadd.f32 %v403_v59, %v395_v63 }
  0xf3   :  { %v408_v5 = vadd.f32 %v403_v59, %v396_v0  ;;  %413 = vst [vmem:[%s790_s3] sm:$0xff] %v405_v1 }
  0xf4   :  { %414 = vst [vmem:[%s790_s3 + $0x8] sm:$0xff] %v406_v2  ;;  %415 = vst [vmem:[%s790_s3 + $0x10] sm:$0xff] %v407_v4 }
  0xf5   :  { %416 = vst [vmem:[%s790_s3 + $0x18] sm:$0xff] %v408_v5 }
  0xfd   :  { %v305_v6 = vpop.f32.mrb[2].mxu0 }
  0xfe   :  { %v306_v7 = vadd.f32 %v305_v6, %v91_v9  ;;  %v376_v8 = vpop.f32.mrb[2].mxu1  ;;  %v307_v10 = vpop.f32.mrb[3].mxu0 }
  0xff   :  { %v377_v11 = vadd.f32 %v376_v8, %v91_v9  ;;  %v308_v12 = vadd.f32 %v307_v10, %v91_v9  ;;  %v378_v13 = vpop.f32.mrb[3].mxu1 }
 0x100   :  { %v385_v14 = vmax.f32 %v306_v7, 0.0  ;;  %v379_v15 = vadd.f32 %v378_v13, %v91_v9 }
 0x101   :  { %v387_v16 = vmax.f32 %v377_v11, 0.0  ;;  %v386_v17 = vmax.f32 %v308_v12, 0.0 }
 0x102   :  { %v397_v18 = vmul.f32 %v391_v53, %v385_v14  ;;  %v388_v19 = vmax.f32 %v379_v15, 0.0 }
 0x103   :  { %v399_v20 = vmul.f32 %v391_v53, %v387_v16  ;;  %v398_v21 = vmul.f32 %v391_v53, %v386_v17 }
 0x104   :  { %v409_v22 = vadd.f32 %v403_v59, %v397_v18  ;;  %v400_v23 = vmul.f32 %v391_v53, %v388_v19 }
 0x105   :  { %v411_v24 = vadd.f32 %v403_v59, %v399_v20  ;;  %v410_v25 = vadd.f32 %v403_v59, %v398_v21 }
 0x106   :  { %417 = vst [vmem:[%s790_s3 + $0x20] sm:$0xff] %v409_v22  ;;  %v412_v26 = vadd.f32 %v403_v59, %v400_v23 }
 0x107   :  { %419 = vst [vmem:[%s790_s3 + $0x30] sm:$0xff] %v411_v24  ;;  %418 = vst [vmem:[%s790_s3 + $0x28] sm:$0xff] %v410_v25 }
 0x108   :  { %420 = vst [vmem:[%s790_s3 + $0x38] sm:$0xff] %v412_v26 }

// kernel: _lambda_.7
= control target key start
LH: loop header
LB: loop body
LE: loop exit
PB: predicated region body
PF: predicated region fallthrough
CT: control target
= control target key end

     0   :  { %v6426_v36 = vmov 1983009808   ;;  %v558_v38 = vlaneseq  ;;  %vm4680_vm0 = vcmask 35840   ;;  %s9083_s1 = inlined_call_operand.vmem [shape: bf16[2048,512], index: 1, kind: input, shape index: {}]   ;;  %s9084_s0 = inlined_call_operand.vmem [shape: bf16[4,2048], index: 0, kind: input, shape index: {}]   ;;  %s9085_s3 = inlined_call_operand.vmem [shape: f32[512,512], index: 3, kind: input, shape index: {}]   ;;  %s9086_s2 = inlined_call_operand.vmem [shape: f32[1,512], index: 2, kind: input, shape index: {}]   ;;  %s9087_s5 = inlined_call_operand.vmem [shape: f32[512,5], index: 5, kind: input, shape index: {}]   ;;  %s9088_s4 = inlined_call_operand.vmem [shape: f32[1,512], index: 4, kind: input, shape index: {}]   ;;  %s9089_s6 = inlined_call_operand.vmem [shape: f32[1,5], index: 6, kind: input, shape index: {}]   ;;  %s9090_s7 = inlined_call_operand.vmem [shape: f32[4,5], index: 7, kind: output, shape index: {}]  }
   0x1   :  { %v5654_v0 = vld [vmem:[%s9083_s1 + $0x4] ss:$16 sps:$4 sm:$0xff]   ;;  %v5656_v1 = vld [vmem:[%s9083_s1 + $0xc] ss:$16 sps:$4 sm:$0xff]   ;;  %v5658_v2 = vld [vmem:[%s9083_s1] ss:$16 sps:$4 sm:$0xff]   ;;  %v556_v37 = vunpack.c.l.s4 %v6426_v36 }
   0x2   :  { %3198 = vmatprep.subr.bf16.mxu0 %v5654_v0  ;;  %v5659_v3 = vld [vmem:[%s9083_s1 + $0x8] ss:$16 sps:$4 sm:$0xff]   ;;  %3526 = vmatprep.subr.bf16.mxu1 %v5656_v1  ;;  %v5660_v4 = vld [vmem:[%s9083_s1 + $0x24] ss:$16 sps:$4 sm:$0xff]   ;;  %v5662_v5 = vld [vmem:[%s9083_s1 + $0x2c] ss:$16 sps:$4 sm:$0xff]  }
   0x3   :  { %3199 = vmatpush1.bf16.msra.mxu0 %v5658_v2  ;;  %3527 = vmatpush1.bf16.msra.mxu1 %v5659_v3  ;;  %v5664_v6 = vld [vmem:[%s9083_s1 + $0x20] ss:$16 sps:$4 sm:$0xff]   ;;  %v5665_v7 = vld [vmem:[%s9083_s1 + $0x28] ss:$16 sps:$4 sm:$0xff]   ;;  %v5666_v8 = vld [vmem:[%s9083_s1 + $0x44] ss:$16 sps:$4 sm:$0xff]   ;;  %v557_v42 = vunpack.c.0.s8 %v556_v37 }
   0x4   :  { %3200 = vmatprep.subr.bf16.mxu0 %v5660_v4  ;;  %3528 = vmatprep.subr.bf16.mxu1 %v5662_v5  ;;  %v5668_v9 = vld [vmem:[%s9083_s1 + $0x4c] ss:$16 sps:$4 sm:$0xff]   ;;  %v5670_v10 = vld [vmem:[%s9083_s1 + $0x40] ss:$16 sps:$4 sm:$0xff]   ;;  %v5671_v11 = vld [vmem:[%s9083_s1 + $0x48] ss:$16 sps:$4 sm:$0xff]  }
   0x5   :  { %v5672_v12 = vld [vmem:[%s9083_s1 + $0x64] ss:$16 sps:$4 sm:$0xff]   ;;  %v5674_v13 = vld [vmem:[%s9083_s1 + $0x6c] ss:$16 sps:$4 sm:$0xff]   ;;  %v5676_v14 = vld [vmem:[%s9083_s1 + $0x60] ss:$16 sps:$4 sm:$0xff]  }
   0x6   :  { %v5677_v15 = vld [vmem:[%s9083_s1 + $0x68] ss:$16 sps:$4 sm:$0xff]   ;;  %v5678_v16 = vld [vmem:[%s9083_s1 + $0x84] ss:$16 sps:$4 sm:$0xff]   ;;  %v5680_v17 = vld [vmem:[%s9083_s1 + $0x8c] ss:$16 sps:$4 sm:$0xff]  }
   0x7   :  { %3201 = vmatpush1.bf16.msra.mxu0 %v5664_v6  ;;  %3529 = vmatpush1.bf16.msra.mxu1 %v5665_v7  ;;  %v5682_v18 = vld [vmem:[%s9083_s1 + $0x80] ss:$16 sps:$4 sm:$0xff]   ;;  %v5683_v19 = vld [vmem:[%s9083_s1 + $0x88] ss:$16 sps:$4 sm:$0xff]   ;;  %v5684_v20 = vld [vmem:[%s9083_s1 + $0xa4] ss:$16 sps:$4 sm:$0xff]  }
   0x8   :  { %3202 = vmatprep.subr.bf16.mxu0 %v5666_v8  ;;  %3530 = vmatprep.subr.bf16.mxu1 %v5668_v9  ;;  %v5686_v21 = vld [vmem:[%s9083_s1 + $0xac] ss:$16 sps:$4 sm:$0xff]   ;;  %v5688_v22 = vld [vmem:[%s9083_s1 + $0xa0] ss:$16 sps:$4 sm:$0xff]   ;;  %v5689_v23 = vld [vmem:[%s9083_s1 + $0xa8] ss:$16 sps:$4 sm:$0xff]  }
   0x9   :  { %v5690_v24 = vld [vmem:[%s9083_s1 + $0xc4] ss:$16 sps:$4 sm:$0xff]   ;;  %v5692_v25 = vld [vmem:[%s9083_s1 + $0xcc] ss:$16 sps:$4 sm:$0xff]   ;;  %v5694_v26 = vld [vmem:[%s9083_s1 + $0xc0] ss:$16 sps:$4 sm:$0xff]  }
   0xa   :  { %v5695_v27 = vld [vmem:[%s9083_s1 + $0xc8] ss:$16 sps:$4 sm:$0xff]   ;;  %v5696_v28 = vld [vmem:[%s9083_s1 + $0xe4] ss:$16 sps:$4 sm:$0xff]   ;;  %v5698_v29 = vld [vmem:[%s9083_s1 + $0xec] ss:$16 sps:$4 sm:$0xff]  }
   0xb   :  { %3203 = vmatpush1.bf16.msra.mxu0 %v5670_v10  ;;  %3531 = vmatpush1.bf16.msra.mxu1 %v5671_v11  ;;  %v5700_v30 = vld [vmem:[%s9083_s1 + $0xe0] ss:$16 sps:$4 sm:$0xff]   ;;  %v5701_v31 = vld [vmem:[%s9083_s1 + $0xe8] ss:$16 sps:$4 sm:$0xff]   ;;  %v5702_v32 = vld [vmem:[%s9083_s1 + $0x104] ss:$16 sps:$4 sm:$0xff]  }
   0xc   :  { %3204 = vmatprep.subr.bf16.mxu0 %v5672_v12  ;;  %3532 = vmatprep.subr.bf16.mxu1 %v5674_v13  ;;  %v5704_v33 = vld [vmem:[%s9083_s1 + $0x10c] ss:$16 sps:$4 sm:$0xff]   ;;  %v5706_v34 = vld [vmem:[%s9083_s1 + $0x100] ss:$16 sps:$4 sm:$0xff]   ;;  %v5707_v35 = vld [vmem:[%s9083_s1 + $0x108] ss:$16 sps:$4 sm:$0xff]  }
   0xd   :  { %v5708_v39 = vld [vmem:[%s9083_s1 + $0x124] ss:$16 sps:$4 sm:$0xff]   ;;  %v5710_v40 = vld [vmem:[%s9083_s1 + $0x12c] ss:$16 sps:$4 sm:$0xff]   ;;  %v5712_v41 = vld [vmem:[%s9083_s1 + $0x120] ss:$16 sps:$4 sm:$0xff]  }
   0xe   :  { %v6584_v43 = vshrl.u32 %v558_v38, 7  ;;  %v5713_v44 = vld [vmem:[%s9083_s1 + $0x128] ss:$16 sps:$4 sm:$0xff]   ;;  %v5714_v45 = vld [vmem:[%s9083_s1 + $0x144] ss:$16 sps:$4 sm:$0xff]  }
   0xf   :  { %3205 = vmatpush1.bf16.msra.mxu0 %v5676_v14  ;;  %3533 = vmatpush1.bf16.msra.mxu1 %v5677_v15  ;;  %v5716_v46 = vld [vmem:[%s9083_s1 + $0x14c] ss:$16 sps:$4 sm:$0xff]   ;;  %v5718_v47 = vld [vmem:[%s9083_s1 + $0x140] ss:$16 sps:$4 sm:$0xff]   ;;  %v5719_v48 = vld [vmem:[%s9083_s1 + $0x148] ss:$16 sps:$4 sm:$0xff]  }
  0x10   :  { %3206 = vmatprep.subr.bf16.mxu0 %v5678_v16  ;;  %3534 = vmatprep.subr.bf16.mxu1 %v5680_v17  ;;  %v6602_v49 = vsub.s32 %v557_v42, %v6584_v43  ;;  %v5720_v50 = vld [vmem:[%s9083_s1 + $0x164] ss:$16 sps:$4 sm:$0xff]   ;;  %v5722_v51 = vld [vmem:[%s9083_s1 + $0x16c] ss:$16 sps:$4 sm:$0xff]   ;;  %v5724_v53 = vld [vmem:[%s9083_s1 + $0x160] ss:$16 sps:$4 sm:$0xff]  }
  0x11   :  { %v34_v52 = vld [vmem:[%s9084_s0] sm:$0xff]  ;;  %v5725_v55 = vld [vmem:[%s9083_s1 + $0x168] ss:$16 sps:$4 sm:$0xff]   ;;  %v5728_v57 = vld [vmem:[%s9083_s1 + $0x18c] ss:$16 sps:$4 sm:$0xff]  }
  0x12   :  { %v561_v54 = vrot.slane %v34_v52, %v6602_v49  ;;  %v5726_v56 = vld [vmem:[%s9083_s1 + $0x184] ss:$16 sps:$4 sm:$0xff]   ;;  %v5730_v59 = vld [vmem:[%s9083_s1 + $0x180] ss:$16 sps:$4 sm:$0xff]   ;;  %v5731_v60 = vld [vmem:[%s9083_s1 + $0x188] ss:$16 sps:$4 sm:$0xff]   ;;  %v554_v7 = vcombine.high %v34_v52, %v34_v52 }
  0x13   :  { %3207 = vmatpush1.bf16.msra.mxu0 %v5682_v18  ;;  %3535 = vmatpush1.bf16.msra.mxu1 %v5683_v19  ;;  %v5732_v61 = vld [vmem:[%s9083_s1 + $0x1a4] ss:$16 sps:$4 sm:$0xff]   ;;  %v5734_v62 = vld [vmem:[%s9083_s1 + $0x1ac] ss:$16 sps:$4 sm:$0xff]   ;;  %v5736_v63 = vld [vmem:[%s9083_s1 + $0x1a0] ss:$16 sps:$4 sm:$0xff]  }
  0x14   :  { %3208 = vmatprep.subr.bf16.mxu0 %v5684_v20  ;;  %3536 = vmatprep.subr.bf16.mxu1 %v5686_v21  ;;  %v569_v58 = vcombine.high %v561_v54, %v561_v54  ;;  %v5737_v0 = vld [vmem:[%s9083_s1 + $0x1a8] ss:$16 sps:$4 sm:$0xff]   ;;  %v5738_v1 = vld [vmem:[%s9083_s1 + $0x1c4] ss:$16 sps:$4 sm:$0xff]   ;;  %v5740_v2 = vld [vmem:[%s9083_s1 + $0x1cc] ss:$16 sps:$4 sm:$0xff]   ;;  %v6675_v12 = vrot.slane %v554_v7, %v6602_v49 }
  0x15   :  { %v5742_v3 = vld [vmem:[%s9083_s1 + $0x1c0] ss:$16 sps:$4 sm:$0xff]   ;;  %v5743_v4 = vld [vmem:[%s9083_s1 + $0x1c8] ss:$16 sps:$4 sm:$0xff]   ;;  %v5744_v5 = vld [vmem:[%s9083_s1 + $0x1e4] ss:$16 sps:$4 sm:$0xff]  }
  0x16   :  { %3230 = vmatprep.mubr.bf16.mxu0 %v569_v58  ;;  %3558 = vmatprep.mubr.bf16.mxu1 %v569_v58  ;;  %v5746_v6 = vld [vmem:[%s9083_s1 + $0x1ec] ss:$16 sps:$4 sm:$0xff]   ;;  %v5748_v8 = vld [vmem:[%s9083_s1 + $0x1e0] ss:$16 sps:$4 sm:$0xff]   ;;  %v5749_v9 = vld [vmem:[%s9083_s1 + $0x1e8] ss:$16 sps:$4 sm:$0xff]   ;;  %v570_v17 = vcombine.high %v6675_v12, %v6675_v12 }
  0x17   :  { %3209 = vmatpush1.bf16.msra.mxu0 %v5688_v22  ;;  %3537 = vmatpush1.bf16.msra.mxu1 %v5689_v23  ;;  %v5753_v10 = vld [vmem:[%s9083_s1 + $0x204] ss:$16 sps:$4 sm:$0xff]   ;;  %v5756_v11 = vld [vmem:[%s9083_s1 + $0x20c] ss:$16 sps:$4 sm:$0xff]   ;;  %v5751_v13 = vld [vmem:[%s9083_s1 + $0x200] ss:$16 sps:$4 sm:$0xff]  }
  0x18   :  { %3210 = vmatprep.subr.bf16.mxu0 %v5690_v24  ;;  %3538 = vmatprep.subr.bf16.mxu1 %v5692_v25  ;;  %v5754_v14 = vld [vmem:[%s9083_s1 + $0x208] ss:$16 sps:$4 sm:$0xff]   ;;  %v5759_v15 = vld [vmem:[%s9083_s1 + $0x224] ss:$16 sps:$4 sm:$0xff]   ;;  %v5762_v16 = vld [vmem:[%s9083_s1 + $0x22c] ss:$16 sps:$4 sm:$0xff]  }
  0x19   :  { %v5757_v18 = vld [vmem:[%s9083_s1 + $0x220] ss:$16 sps:$4 sm:$0xff]   ;;  %v5760_v19 = vld [vmem:[%s9083_s1 + $0x228] ss:$16 sps:$4 sm:$0xff]   ;;  %v5765_v20 = vld [vmem:[%s9083_s1 + $0x244] ss:$16 sps:$4 sm:$0xff]  }
  0x1a   :  { %v5768_v21 = vld [vmem:[%s9083_s1 + $0x24c] ss:$16 sps:$4 sm:$0xff]   ;;  %v5763_v22 = vld [vmem:[%s9083_s1 + $0x240] ss:$16 sps:$4 sm:$0xff]   ;;  %v5766_v23 = vld [vmem:[%s9083_s1 + $0x248] ss:$16 sps:$4 sm:$0xff]  }
  0x1b   :  { %3211 = vmatpush1.bf16.msra.mxu0 %v5694_v26  ;;  %3539 = vmatpush1.bf16.msra.mxu1 %v5695_v27  ;;  %v5771_v24 = vld [vmem:[%s9083_s1 + $0x264] ss:$16 sps:$4 sm:$0xff]   ;;  %v5774_v25 = vld [vmem:[%s9083_s1 + $0x26c] ss:$16 sps:$4 sm:$0xff]   ;;  %v5769_v26 = vld [vmem:[%s9083_s1 + $0x260] ss:$16 sps:$4 sm:$0xff]  }
  0x1c   :  { %3212 = vmatprep.subr.bf16.mxu0 %v5696_v28  ;;  %3540 = vmatprep.subr.bf16.mxu1 %v5698_v29  ;;  %v5772_v27 = vld [vmem:[%s9083_s1 + $0x268] ss:$16 sps:$4 sm:$0xff]   ;;  %v5777_v28 = vld [vmem:[%s9083_s1 + $0x284] ss:$16 sps:$4 sm:$0xff]   ;;  %v5780_v29 = vld [vmem:[%s9083_s1 + $0x28c] ss:$16 sps:$4 sm:$0xff]  }
  0x1d   :  { %v5789_v36 = vld [vmem:[%s9083_s1 + $0x2c4] ss:$16 sps:$4 sm:$0xff]   ;;  %v5792_v37 = vld [vmem:[%s9083_s1 + $0x2cc] ss:$16 sps:$4 sm:$0xff]   ;;  %v5787_v38 = vld [vmem:[%s9083_s1 + $0x2c0] ss:$16 sps:$4 sm:$0xff]  }
  0x1e   :  { %v5793_v42 = vld [vmem:[%s9083_s1 + $0x2e0] ss:$16 sps:$4 sm:$0xff]   ;;  %v5819_v58 = vld [vmem:[%s9083_s1 + $0x364] ss:$16 sps:$4 sm:$0xff]   ;;  %v5840_v7 = vld [vmem:[%s9083_s1 + $0x3cc] ss:$16 sps:$4 sm:$0xff]  }
  0x1f   :  { %3213 = vmatpush1.bf16.msra.mxu0 %v5700_v30  ;;  %3541 = vmatpush1.bf16.msra.mxu1 %v5701_v31  ;;  %v5775_v30 = vld [vmem:[%s9083_s1 + $0x280] ss:$16 sps:$4 sm:$0xff]   ;;  %v5778_v31 = vld [vmem:[%s9083_s1 + $0x288] ss:$16 sps:$4 sm:$0xff]  }
  0x20   :  { %3214 = vmatprep.subr.bf16.mxu0 %v5702_v32  ;;  %3542 = vmatprep.subr.bf16.mxu1 %v5704_v33  ;;  %v5783_v32 = vld [vmem:[%s9083_s1 + $0x2a4] ss:$16 sps:$4 sm:$0xff]   ;;  %v5786_v33 = vld [vmem:[%s9083_s1 + $0x2ac] ss:$16 sps:$4 sm:$0xff]   ;;  %v5805_v52 = vld [vmem:[%s9083_s1 + $0x320] ss:$16 sps:$4 sm:$0xff]  }
  0x23   :  { %3215 = vmatpush1.bf16.msra.mxu0 %v5706_v34  ;;  %3543 = vmatpush1.bf16.msra.mxu1 %v5707_v35  ;;  %v5781_v34 = vld [vmem:[%s9083_s1 + $0x2a0] ss:$16 sps:$4 sm:$0xff]   ;;  %v5784_v35 = vld [vmem:[%s9083_s1 + $0x2a8] ss:$16 sps:$4 sm:$0xff]  }
  0x24   :  { %3216 = vmatprep.subr.bf16.mxu0 %v5708_v39  ;;  %3544 = vmatprep.subr.bf16.mxu1 %v5710_v40  ;;  %v5790_v39 = vld [vmem:[%s9083_s1 + $0x2c8] ss:$16 sps:$4 sm:$0xff]   ;;  %v5795_v40 = vld [vmem:[%s9083_s1 + $0x2e4] ss:$16 sps:$4 sm:$0xff]  }
  0x27   :  { %3217 = vmatpush1.bf16.msra.mxu0 %v5712_v41  ;;  %3545 = vmatpush1.bf16.msra.mxu1 %v5713_v44  ;;  %v5798_v41 = vld [vmem:[%s9083_s1 + $0x2ec] ss:$16 sps:$4 sm:$0xff]   ;;  %v5796_v44 = vld [vmem:[%s9083_s1 + $0x2e8] ss:$16 sps:$4 sm:$0xff]  }
  0x28   :  { %3218 = vmatprep.subr.bf16.mxu0 %v5714_v45  ;;  %3546 = vmatprep.subr.bf16.mxu1 %v5716_v46  ;;  %v5801_v45 = vld [vmem:[%s9083_s1 + $0x304] ss:$16 sps:$4 sm:$0xff]   ;;  %v5804_v46 = vld [vmem:[%s9083_s1 + $0x30c] ss:$16 sps:$4 sm:$0xff]  }
  0x2b   :  { %3219 = vmatpush1.bf16.msra.mxu0 %v5718_v47  ;;  %3547 = vmatpush1.bf16.msra.mxu1 %v5719_v48  ;;  %v5799_v47 = vld [vmem:[%s9083_s1 + $0x300] ss:$16 sps:$4 sm:$0xff]   ;;  %v5802_v48 = vld [vmem:[%s9083_s1 + $0x308] ss:$16 sps:$4 sm:$0xff]  }
  0x2c   :  { %3220 = vmatprep.subr.bf16.mxu0 %v5720_v50  ;;  %3548 = vmatprep.subr.bf16.mxu1 %v5722_v51  ;;  %v5807_v50 = vld [vmem:[%s9083_s1 + $0x324] ss:$16 sps:$4 sm:$0xff]   ;;  %v5810_v51 = vld [vmem:[%s9083_s1 + $0x32c] ss:$16 sps:$4 sm:$0xff]  }
  0x2f   :  { %3221 = vmatpush1.bf16.msra.mxu0 %v5724_v53  ;;  %3549 = vmatpush1.bf16.msra.mxu1 %v5725_v55  ;;  %v5808_v53 = vld [vmem:[%s9083_s1 + $0x328] ss:$16 sps:$4 sm:$0xff]   ;;  %v5816_v55 = vld [vmem:[%s9083_s1 + $0x34c] ss:$16 sps:$4 sm:$0xff]  }
  0x30   :  { %3222 = vmatprep.subr.bf16.mxu0 %v5726_v56  ;;  %3550 = vmatprep.subr.bf16.mxu1 %v5728_v57  ;;  %v5811_v56 = vld [vmem:[%s9083_s1 + $0x340] ss:$16 sps:$4 sm:$0xff]   ;;  %v5814_v57 = vld [vmem:[%s9083_s1 + $0x348] ss:$16 sps:$4 sm:$0xff]  }
  0x33   :  { %3223 = vmatpush1.bf16.msra.mxu0 %v5730_v59  ;;  %3551 = vmatpush1.bf16.msra.mxu1 %v5731_v60  ;;  %v5822_v59 = vld [vmem:[%s9083_s1 + $0x36c] ss:$16 sps:$4 sm:$0xff]   ;;  %v5817_v60 = vld [vmem:[%s9083_s1 + $0x360] ss:$16 sps:$4 sm:$0xff]  }
  0x34   :  { %3224 = vmatprep.subr.bf16.mxu0 %v5732_v61  ;;  %3552 = vmatprep.subr.bf16.mxu1 %v5734_v62  ;;  %v5820_v61 = vld [vmem:[%s9083_s1 + $0x368] ss:$16 sps:$4 sm:$0xff]   ;;  %v5825_v62 = vld [vmem:[%s9083_s1 + $0x384] ss:$16 sps:$4 sm:$0xff]  }
  0x37   :  { %3225 = vmatpush1.bf16.msra.mxu0 %v5736_v63  ;;  %3553 = vmatpush1.bf16.msra.mxu1 %v5737_v0  ;;  %v5828_v63 = vld [vmem:[%s9083_s1 + $0x38c] ss:$16 sps:$4 sm:$0xff]   ;;  %v5823_v0 = vld [vmem:[%s9083_s1 + $0x380] ss:$16 sps:$4 sm:$0xff]  }
  0x38   :  { %3226 = vmatprep.subr.bf16.mxu0 %v5738_v1  ;;  %3554 = vmatprep.subr.bf16.mxu1 %v5740_v2  ;;  %v5826_v1 = vld [vmem:[%s9083_s1 + $0x388] ss:$16 sps:$4 sm:$0xff]   ;;  %v5831_v2 = vld [vmem:[%s9083_s1 + $0x3a4] ss:$16 sps:$4 sm:$0xff]  }
  0x3b   :  { %3227 = vmatpush1.bf16.msra.mxu0 %v5742_v3  ;;  %3555 = vmatpush1.bf16.msra.mxu1 %v5743_v4  ;;  %v5834_v3 = vld [vmem:[%s9083_s1 + $0x3ac] ss:$16 sps:$4 sm:$0xff]   ;;  %v5829_v4 = vld [vmem:[%s9083_s1 + $0x3a0] ss:$16 sps:$4 sm:$0xff]  }
  0x3c   :  { %3228 = vmatprep.subr.bf16.mxu0 %v5744_v5  ;;  %3556 = vmatprep.subr.bf16.mxu1 %v5746_v6  ;;  %v5832_v5 = vld [vmem:[%s9083_s1 + $0x3a8] ss:$16 sps:$4 sm:$0xff]   ;;  %v5837_v6 = vld [vmem:[%s9083_s1 + $0x3c4] ss:$16 sps:$4 sm:$0xff]  }
  0x3f   :  { %3229 = vmatpush1.bf16.msra.mxu0 %v5748_v8  ;;  %3557 = vmatpush1.bf16.msra.mxu1 %v5749_v9  ;;  %v5835_v8 = vld [vmem:[%s9083_s1 + $0x3c0] ss:$16 sps:$4 sm:$0xff]   ;;  %v5838_v9 = vld [vmem:[%s9083_s1 + $0x3c8] ss:$16 sps:$4 sm:$0xff]  }
  0x40   :  { %3239 = vmatprep.subr.bf16.mxu0 %v5753_v10  ;;  %3567 = vmatprep.subr.bf16.mxu1 %v5756_v11  ;;  %v5843_v10 = vld [vmem:[%s9083_s1 + $0x3e4] ss:$16 sps:$4 sm:$0xff]   ;;  %v5846_v11 = vld [vmem:[%s9083_s1 + $0x3ec] ss:$16 sps:$4 sm:$0xff]  }
  0x42   :  { %3231 = vmatmul.mubr.bf16.vlgmr.msra.gmra.mrb[0].mxu0 %v561_v54  ;;  %3559 = vmatmul.mubr.bf16.vlgmr.msra.gmra.mrb[0].mxu1 %v561_v54  ;;  %v5813_v54 = vld [vmem:[%s9083_s1 + $0x344] ss:$16 sps:$4 sm:$0xff]  }
  0x43   :  { %3240 = vmatpush1.bf16.msra.mxu0 %v5751_v13  ;;  %3568 = vmatpush1.bf16.msra.mxu1 %v5754_v14  ;;  %v5841_v13 = vld [vmem:[%s9083_s1 + $0x3e0] ss:$16 sps:$4 sm:$0xff]   ;;  %v5844_v14 = vld [vmem:[%s9083_s1 + $0x3e8] ss:$16 sps:$4 sm:$0xff]  }
  0x44   :  { %3241 = vmatprep.subr.bf16.mxu0 %v5759_v15  ;;  %3569 = vmatprep.subr.bf16.mxu1 %v5762_v16  ;;  %v5849_v15 = vld [vmem:[%s9083_s1 + $0x404] ss:$16 sps:$4 sm:$0xff]   ;;  %v5852_v16 = vld [vmem:[%s9083_s1 + $0x40c] ss:$16 sps:$4 sm:$0xff]  }
  0x45   :  { %3271 = vmatprep.mubr.bf16.mxu0 %v570_v17  ;;  %3599 = vmatprep.mubr.bf16.mxu1 %v570_v17  ;;  %v5847_v17 = vld [vmem:[%s9083_s1 + $0x400] ss:$16 sps:$4 sm:$0xff]  }
  0x47   :  { %3242 = vmatpush1.bf16.msra.mxu0 %v5757_v18  ;;  %3570 = vmatpush1.bf16.msra.mxu1 %v5760_v19  ;;  %v5850_v18 = vld [vmem:[%s9083_s1 + $0x408] ss:$16 sps:$4 sm:$0xff]  }
  0x48   :  { %3243 = vmatprep.subr.bf16.mxu0 %v5765_v20  ;;  %3571 = vmatprep.subr.bf16.mxu1 %v5768_v21  ;;  %v6880_v19 = vld [vmem:[%s9084_s0 + $0x8] sm:$0xff]  ;;  %v5855_v20 = vld [vmem:[%s9083_s1 + $0x424] ss:$16 sps:$4 sm:$0xff]  }
  0x49   :  { %v5858_v21 = vld [vmem:[%s9083_s1 + $0x42c] ss:$16 sps:$4 sm:$0xff]  }
  0x4b   :  { %3244 = vmatpush1.bf16.msra.mxu0 %v5763_v22  ;;  %3572 = vmatpush1.bf16.msra.mxu1 %v5766_v23  ;;  %v6890_v22 = vrot.slane %v6880_v19, %v6602_v49 }
  0x4c   :  { %3245 = vmatprep.subr.bf16.mxu0 %v5771_v24  ;;  %3573 = vmatprep.subr.bf16.mxu1 %v5774_v25  ;;  %v5853_v24 = vld [vmem:[%s9083_s1 + $0x420] ss:$16 sps:$4 sm:$0xff]   ;;  %v5856_v25 = vld [vmem:[%s9083_s1 + $0x428] ss:$16 sps:$4 sm:$0xff]  }
  0x4d   :  { %v586_v23 = vcombine.high %v6890_v22, %v6890_v22 }
  0x4f   :  { %3246 = vmatpush1.bf16.msra.mxu0 %v5769_v26  ;;  %3574 = vmatpush1.bf16.msra.mxu1 %v5772_v27  ;;  %v5861_v26 = vld [vmem:[%s9083_s1 + $0x444] ss:$16 sps:$4 sm:$0xff]   ;;  %v5859_v27 = vld [vmem:[%s9083_s1 + $0x440] ss:$16 sps:$4 sm:$0xff]  }
  0x50   :  { %3247 = vmatprep.subr.bf16.mxu0 %v5777_v28  ;;  %3575 = vmatprep.subr.bf16.mxu1 %v5780_v29  ;;  %v5862_v28 = vld [vmem:[%s9083_s1 + $0x448] ss:$16 sps:$4 sm:$0xff]   ;;  %v5867_v29 = vld [vmem:[%s9083_s1 + $0x464] ss:$16 sps:$4 sm:$0xff]  }
  0x53   :  { %3248 = vmatpush1.bf16.msra.mxu0 %v5775_v30  ;;  %3576 = vmatpush1.bf16.msra.mxu1 %v5778_v31  ;;  %v5870_v30 = vld [vmem:[%s9083_s1 + $0x46c] ss:$16 sps:$4 sm:$0xff]   ;;  %v5865_v31 = vld [vmem:[%s9083_s1 + $0x460] ss:$16 sps:$4 sm:$0xff]  }
  0x54   :  { %3249 = vmatprep.subr.bf16.mxu0 %v5783_v32  ;;  %3577 = vmatprep.subr.bf16.mxu1 %v5786_v33  ;;  %v5868_v32 = vld [vmem:[%s9083_s1 + $0x468] ss:$16 sps:$4 sm:$0xff]   ;;  %v5873_v33 = vld [vmem:[%s9083_s1 + $0x484] ss:$16 sps:$4 sm:$0xff]  }
  0x57   :  { %3250 = vmatpush1.bf16.msra.mxu0 %v5781_v34  ;;  %3578 = vmatpush1.bf16.msra.mxu1 %v5784_v35  ;;  %v5876_v34 = vld [vmem:[%s9083_s1 + $0x48c] ss:$16 sps:$4 sm:$0xff]   ;;  %v5871_v35 = vld [vmem:[%s9083_s1 + $0x480] ss:$16 sps:$4 sm:$0xff]  }
  0x58   :  { %3251 = vmatprep.subr.bf16.mxu0 %v5789_v36  ;;  %3579 = vmatprep.subr.bf16.mxu1 %v5792_v37  ;;  %v5874_v36 = vld [vmem:[%s9083_s1 + $0x488] ss:$16 sps:$4 sm:$0xff]   ;;  %v5879_v37 = vld [vmem:[%s9083_s1 + $0x4a4] ss:$16 sps:$4 sm:$0xff]  }
  0x5b   :  { %3252 = vmatpush1.bf16.msra.mxu0 %v5787_v38  ;;  %3580 = vmatpush1.bf16.msra.mxu1 %v5790_v39  ;;  %v5882_v38 = vld [vmem:[%s9083_s1 + $0x4ac] ss:$16 sps:$4 sm:$0xff]   ;;  %v5877_v39 = vld [vmem:[%s9083_s1 + $0x4a0] ss:$16 sps:$4 sm:$0xff]  }
  0x5c   :  { %3253 = vmatprep.subr.bf16.mxu0 %v5795_v40  ;;  %3581 = vmatprep.subr.bf16.mxu1 %v5798_v41  ;;  %v5880_v40 = vld [vmem:[%s9083_s1 + $0x4a8] ss:$16 sps:$4 sm:$0xff]   ;;  %v5885_v41 = vld [vmem:[%s9083_s1 + $0x4c4] ss:$16 sps:$4 sm:$0xff]  }
  0x5f   :  { %3254 = vmatpush1.bf16.msra.mxu0 %v5793_v42  ;;  %3582 = vmatpush1.bf16.msra.mxu1 %v5796_v44  ;;  %v5888_v42 = vld [vmem:[%s9083_s1 + $0x4cc] ss:$16 sps:$4 sm:$0xff]   ;;  %v5883_v44 = vld [vmem:[%s9083_s1 + $0x4c0] ss:$16 sps:$4 sm:$0xff]  }
  0x60   :  { %3255 = vmatprep.subr.bf16.mxu0 %v5801_v45  ;;  %3583 = vmatprep.subr.bf16.mxu1 %v5804_v46  ;;  %v5886_v45 = vld [vmem:[%s9083_s1 + $0x4c8] ss:$16 sps:$4 sm:$0xff]   ;;  %v5891_v46 = vld [vmem:[%s9083_s1 + $0x4e4] ss:$16 sps:$4 sm:$0xff]  }
  0x63   :  { %3256 = vmatpush1.bf16.msra.mxu0 %v5799_v47  ;;  %3584 = vmatpush1.bf16.msra.mxu1 %v5802_v48  ;;  %v5894_v47 = vld [vmem:[%s9083_s1 + $0x4ec] ss:$16 sps:$4 sm:$0xff]   ;;  %v5889_v48 = vld [vmem:[%s9083_s1 + $0x4e0] ss:$16 sps:$4 sm:$0xff]  }
  0x64   :  { %3257 = vmatprep.subr.bf16.mxu0 %v5807_v50  ;;  %3585 = vmatprep.subr.bf16.mxu1 %v5810_v51  ;;  %v5892_v50 = vld [vmem:[%s9083_s1 + $0x4e8] ss:$16 sps:$4 sm:$0xff]   ;;  %v5897_v51 = vld [vmem:[%s9083_s1 + $0x504] ss:$16 sps:$4 sm:$0xff]  }
  0x67   :  { %3258 = vmatpush1.bf16.msra.mxu0 %v5805_v52  ;;  %3586 = vmatpush1.bf16.msra.mxu1 %v5808_v53  ;;  %v5900_v52 = vld [vmem:[%s9083_s1 + $0x50c] ss:$16 sps:$4 sm:$0xff]   ;;  %v5895_v53 = vld [vmem:[%s9083_s1 + $0x500] ss:$16 sps:$4 sm:$0xff]  }
  0x68   :  { %3259 = vmatprep.subr.bf16.mxu0 %v5813_v54  ;;  %3587 = vmatprep.subr.bf16.mxu1 %v5816_v55  ;;  %v5898_v54 = vld [vmem:[%s9083_s1 + $0x508] ss:$16 sps:$4 sm:$0xff]   ;;  %v5903_v55 = vld [vmem:[%s9083_s1 + $0x524] ss:$16 sps:$4 sm:$0xff]  }
  0x6b   :  { %3260 = vmatpush1.bf16.msra.mxu0 %v5811_v56  ;;  %3588 = vmatpush1.bf16.msra.mxu1 %v5814_v57  ;;  %v5906_v56 = vld [vmem:[%s9083_s1 + $0x52c] ss:$16 sps:$4 sm:$0xff]   ;;  %v5901_v57 = vld [vmem:[%s9083_s1 + $0x520] ss:$16 sps:$4 sm:$0xff]  }
  0x6c   :  { %3261 = vmatprep.subr.bf16.mxu0 %v5819_v58  ;;  %3589 = vmatprep.subr.bf16.mxu1 %v5822_v59  ;;  %v5904_v58 = vld [vmem:[%s9083_s1 + $0x528] ss:$16 sps:$4 sm:$0xff]   ;;  %v5909_v59 = vld [vmem:[%s9083_s1 + $0x544] ss:$16 sps:$4 sm:$0xff]  }
  0x6f   :  { %3262 = vmatpush1.bf16.msra.mxu0 %v5817_v60  ;;  %3590 = vmatpush1.bf16.msra.mxu1 %v5820_v61  ;;  %v5912_v60 = vld [vmem:[%s9083_s1 + $0x54c] ss:$16 sps:$4 sm:$0xff]   ;;  %v5907_v61 = vld [vmem:[%s9083_s1 + $0x540] ss:$16 sps:$4 sm:$0xff]  }
  0x70   :  { %3263 = vmatprep.subr.bf16.mxu0 %v5825_v62  ;;  %3591 = vmatprep.subr.bf16.mxu1 %v5828_v63  ;;  %v5910_v62 = vld [vmem:[%s9083_s1 + $0x548] ss:$16 sps:$4 sm:$0xff]   ;;  %v5915_v63 = vld [vmem:[%s9083_s1 + $0x564] ss:$16 sps:$4 sm:$0xff]  }
  0x73   :  { %3264 = vmatpush1.bf16.msra.mxu0 %v5823_v0  ;;  %3592 = vmatpush1.bf16.msra.mxu1 %v5826_v1  ;;  %v5918_v0 = vld [vmem:[%s9083_s1 + $0x56c] ss:$16 sps:$4 sm:$0xff]   ;;  %v5913_v1 = vld [vmem:[%s9083_s1 + $0x560] ss:$16 sps:$4 sm:$0xff]  }
  0x74   :  { %3265 = vmatprep.subr.bf16.mxu0 %v5831_v2  ;;  %3593 = vmatprep.subr.bf16.mxu1 %v5834_v3  ;;  %v5916_v2 = vld [vmem:[%s9083_s1 + $0x568] ss:$16 sps:$4 sm:$0xff]   ;;  %v5921_v3 = vld [vmem:[%s9083_s1 + $0x584] ss:$16 sps:$4 sm:$0xff]  }
  0x77   :  { %3266 = vmatpush1.bf16.msra.mxu0 %v5829_v4  ;;  %3594 = vmatpush1.bf16.msra.mxu1 %v5832_v5  ;;  %v5924_v4 = vld [vmem:[%s9083_s1 + $0x58c] ss:$16 sps:$4 sm:$0xff]   ;;  %v5919_v5 = vld [vmem:[%s9083_s1 + $0x580] ss:$16 sps:$4 sm:$0xff]  }
  0x78   :  { %3267 = vmatprep.subr.bf16.mxu0 %v5837_v6  ;;  %3595 = vmatprep.subr.bf16.mxu1 %v5840_v7  ;;  %v5922_v6 = vld [vmem:[%s9083_s1 + $0x588] ss:$16 sps:$4 sm:$0xff]   ;;  %v5927_v7 = vld [vmem:[%s9083_s1 + $0x5a4] ss:$16 sps:$4 sm:$0xff]  }
  0x7b   :  { %3268 = vmatpush1.bf16.msra.mxu0 %v5835_v8  ;;  %3596 = vmatpush1.bf16.msra.mxu1 %v5838_v9  ;;  %v5930_v8 = vld [vmem:[%s9083_s1 + $0x5ac] ss:$16 sps:$4 sm:$0xff]   ;;  %v5925_v9 = vld [vmem:[%s9083_s1 + $0x5a0] ss:$16 sps:$4 sm:$0xff]  }
  0x7c   :  { %3269 = vmatprep.subr.bf16.mxu0 %v5843_v10  ;;  %3597 = vmatprep.subr.bf16.mxu1 %v5846_v11  ;;  %v5928_v10 = vld [vmem:[%s9083_s1 + $0x5a8] ss:$16 sps:$4 sm:$0xff]   ;;  %v5933_v11 = vld [vmem:[%s9083_s1 + $0x5c4] ss:$16 sps:$4 sm:$0xff]  }
  0x7f   :  { %3270 = vmatpush1.bf16.msra.mxu0 %v5841_v13  ;;  %3598 = vmatpush1.bf16.msra.mxu1 %v5844_v14  ;;  %v5936_v13 = vld [vmem:[%s9083_s1 + $0x5cc] ss:$16 sps:$4 sm:$0xff]   ;;  %v5931_v14 = vld [vmem:[%s9083_s1 + $0x5c0] ss:$16 sps:$4 sm:$0xff]  }
  0x80   :  { %3280 = vmatprep.subr.bf16.mxu0 %v5849_v15  ;;  %3608 = vmatprep.subr.bf16.mxu1 %v5852_v16  ;;  %v5934_v15 = vld [vmem:[%s9083_s1 + $0x5c8] ss:$16 sps:$4 sm:$0xff]   ;;  %v5939_v16 = vld [vmem:[%s9083_s1 + $0x5e4] ss:$16 sps:$4 sm:$0xff]  }
  0x82   :  { %3272 = vmatmul.mubr.bf16.vlgmr.msra.gmra.mrb[0].mxu0 %v6675_v12  ;;  %3600 = vmatmul.mubr.bf16.vlgmr.msra.gmra.mrb[0].mxu1 %v6675_v12  ;;  %v5864_v12 = vld [vmem:[%s9083_s1 + $0x44c] ss:$16 sps:$4 sm:$0xff]  }
  0x83   :  { %3281 = vmatpush1.bf16.msra.mxu0 %v5847_v17  ;;  %3609 = vmatpush1.bf16.msra.mxu1 %v5850_v18  ;;  %v5942_v17 = vld [vmem:[%s9083_s1 + $0x5ec] ss:$16 sps:$4 sm:$0xff]   ;;  %v571_v18 = vcombine.high %v6880_v19, %v6880_v19 }
  0x84   :  { %3282 = vmatprep.subr.bf16.mxu0 %v5855_v20  ;;  %3610 = vmatprep.subr.bf16.mxu1 %v5858_v21  ;;  %v5937_v20 = vld [vmem:[%s9083_s1 + $0x5e0] ss:$16 sps:$4 sm:$0xff]   ;;  %v5940_v21 = vld [vmem:[%s9083_s1 + $0x5e8] ss:$16 sps:$4 sm:$0xff]   ;;  %v5948_v19 = vld [vmem:[%s9083_s1 + $0x60c] ss:$16 sps:$4 sm:$0xff]  }
  0x85   :  { %3312 = vmatprep.mubr.bf16.mxu0 %v586_v23  ;;  %3640 = vmatprep.mubr.bf16.mxu1 %v586_v23  ;;  %v5945_v23 = vld [vmem:[%s9083_s1 + $0x604] ss:$16 sps:$4 sm:$0xff]  }
  0x87   :  { %3283 = vmatpush1.bf16.msra.mxu0 %v5853_v24  ;;  %3611 = vmatpush1.bf16.msra.mxu1 %v5856_v25  ;;  %v7079_v24 = vrot.slane %v571_v18, %v6602_v49  ;;  %v5943_v25 = vld [vmem:[%s9083_s1 + $0x600] ss:$16 sps:$4 sm:$0xff]   ;;  %v6032_v18 = vld [vmem:[%s9083_s1 + $0x7cc] ss:$16 sps:$4 sm:$0xff]  }
  0x88   :  { %3284 = vmatprep.subr.bf16.mxu0 %v5861_v26  ;;  %3612 = vmatprep.subr.bf16.mxu1 %v5864_v12  ;;  %v5946_v26 = vld [vmem:[%s9083_s1 + $0x608] ss:$16 sps:$4 sm:$0xff]   ;;  %v5951_v12 = vld [vmem:[%s9083_s1 + $0x624] ss:$16 sps:$4 sm:$0xff]  }
  0x8b   :  { %3285 = vmatpush1.bf16.msra.mxu0 %v5859_v27  ;;  %3613 = vmatpush1.bf16.msra.mxu1 %v5862_v28  ;;  %v5954_v27 = vld [vmem:[%s9083_s1 + $0x62c] ss:$16 sps:$4 sm:$0xff]   ;;  %v587_v28 = vcombine.high %v7079_v24, %v7079_v24 }
  0x8c   :  { %3286 = vmatprep.subr.bf16.mxu0 %v5867_v29  ;;  %3614 = vmatprep.subr.bf16.mxu1 %v5870_v30  ;;  %v5949_v29 = vld [vmem:[%s9083_s1 + $0x620] ss:$16 sps:$4 sm:$0xff]   ;;  %v5952_v30 = vld [vmem:[%s9083_s1 + $0x628] ss:$16 sps:$4 sm:$0xff]  }
  0x8f   :  { %3287 = vmatpush1.bf16.msra.mxu0 %v5865_v31  ;;  %3615 = vmatpush1.bf16.msra.mxu1 %v5868_v32  ;;  %v5957_v31 = vld [vmem:[%s9083_s1 + $0x644] ss:$16 sps:$4 sm:$0xff]   ;;  %v5955_v32 = vld [vmem:[%s9083_s1 + $0x640] ss:$16 sps:$4 sm:$0xff]  }
  0x90   :  { %3288 = vmatprep.subr.bf16.mxu0 %v5873_v33  ;;  %3616 = vmatprep.subr.bf16.mxu1 %v5876_v34  ;;  %v5958_v33 = vld [vmem:[%s9083_s1 + $0x648] ss:$16 sps:$4 sm:$0xff]   ;;  %v5963_v34 = vld [vmem:[%s9083_s1 + $0x664] ss:$16 sps:$4 sm:$0xff]  }
  0x93   :  { %3289 = vmatpush1.bf16.msra.mxu0 %v5871_v35  ;;  %3617 = vmatpush1.bf16.msra.mxu1 %v5874_v36  ;;  %v5966_v35 = vld [vmem:[%s9083_s1 + $0x66c] ss:$16 sps:$4 sm:$0xff]   ;;  %v5961_v36 = vld [vmem:[%s9083_s1 + $0x660] ss:$16 sps:$4 sm:$0xff]  }
  0x94   :  { %3290 = vmatprep.subr.bf16.mxu0 %v5879_v37  ;;  %3618 = vmatprep.subr.bf16.mxu1 %v5882_v38  ;;  %v5964_v37 = vld [vmem:[%s9083_s1 + $0x668] ss:$16 sps:$4 sm:$0xff]   ;;  %v5969_v38 = vld [vmem:[%s9083_s1 + $0x684] ss:$16 sps:$4 sm:$0xff]  }
  0x97   :  { %3291 = vmatpush1.bf16.msra.mxu0 %v5877_v39  ;;  %3619 = vmatpush1.bf16.msra.mxu1 %v5880_v40  ;;  %v5972_v39 = vld [vmem:[%s9083_s1 + $0x68c] ss:$16 sps:$4 sm:$0xff]   ;;  %v5967_v40 = vld [vmem:[%s9083_s1 + $0x680] ss:$16 sps:$4 sm:$0xff]  }
  0x98   :  { %3292 = vmatprep.subr.bf16.mxu0 %v5885_v41  ;;  %3620 = vmatprep.subr.bf16.mxu1 %v5888_v42  ;;  %v5970_v41 = vld [vmem:[%s9083_s1 + $0x688] ss:$16 sps:$4 sm:$0xff]   ;;  %v5975_v42 = vld [vmem:[%s9083_s1 + $0x6a4] ss:$16 sps:$4 sm:$0xff]  }
  0x9b   :  { %3293 = vmatpush1.bf16.msra.mxu0 %v5883_v44  ;;  %3621 = vmatpush1.bf16.msra.mxu1 %v5886_v45  ;;  %v5978_v44 = vld [vmem:[%s9083_s1 + $0x6ac] ss:$16 sps:$4 sm:$0xff]   ;;  %v5973_v45 = vld [vmem:[%s9083_s1 + $0x6a0] ss:$16 sps:$4 sm:$0xff]  }
  0x9c   :  { %3294 = vmatprep.subr.bf16.mxu0 %v5891_v46  ;;  %3622 = vmatprep.subr.bf16.mxu1 %v5894_v47  ;;  %v5976_v46 = vld [vmem:[%s9083_s1 + $0x6a8] ss:$16 sps:$4 sm:$0xff]   ;;  %v5981_v47 = vld [vmem:[%s9083_s1 + $0x6c4] ss:$16 sps:$4 sm:$0xff]  }
  0x9f   :  { %3295 = vmatpush1.bf16.msra.mxu0 %v5889_v48  ;;  %3623 = vmatpush1.bf16.msra.mxu1 %v5892_v50  ;;  %v5984_v48 = vld [vmem:[%s9083_s1 + $0x6cc] ss:$16 sps:$4 sm:$0xff]   ;;  %v5979_v50 = vld [vmem:[%s9083_s1 + $0x6c0] ss:$16 sps:$4 sm:$0xff]  }
  0xa0   :  { %3296 = vmatprep.subr.bf16.mxu0 %v5897_v51  ;;  %3624 = vmatprep.subr.bf16.mxu1 %v5900_v52  ;;  %v5982_v51 = vld [vmem:[%s9083_s1 + $0x6c8] ss:$16 sps:$4 sm:$0xff]   ;;  %v5987_v52 = vld [vmem:[%s9083_s1 + $0x6e4] ss:$16 sps:$4 sm:$0xff]  }
  0xa3   :  { %3297 = vmatpush1.bf16.msra.mxu0 %v5895_v53  ;;  %3625 = vmatpush1.bf16.msra.mxu1 %v5898_v54  ;;  %v5990_v53 = vld [vmem:[%s9083_s1 + $0x6ec] ss:$16 sps:$4 sm:$0xff]   ;;  %v5985_v54 = vld [vmem:[%s9083_s1 + $0x6e0] ss:$16 sps:$4 sm:$0xff]  }
  0xa4   :  { %3298 = vmatprep.subr.bf16.mxu0 %v5903_v55  ;;  %3626 = vmatprep.subr.bf16.mxu1 %v5906_v56  ;;  %v5988_v55 = vld [vmem:[%s9083_s1 + $0x6e8] ss:$16 sps:$4 sm:$0xff]   ;;  %v5993_v56 = vld [vmem:[%s9083_s1 + $0x704] ss:$16 sps:$4 sm:$0xff]  }
  0xa7   :  { %3299 = vmatpush1.bf16.msra.mxu0 %v5901_v57  ;;  %3627 = vmatpush1.bf16.msra.mxu1 %v5904_v58  ;;  %v5996_v57 = vld [vmem:[%s9083_s1 + $0x70c] ss:$16 sps:$4 sm:$0xff]   ;;  %v5991_v58 = vld [vmem:[%s9083_s1 + $0x700] ss:$16 sps:$4 sm:$0xff]  }
  0xa8   :  { %3300 = vmatprep.subr.bf16.mxu0 %v5909_v59  ;;  %3628 = vmatprep.subr.bf16.mxu1 %v5912_v60  ;;  %v5994_v59 = vld [vmem:[%s9083_s1 + $0x708] ss:$16 sps:$4 sm:$0xff]   ;;  %v5999_v60 = vld [vmem:[%s9083_s1 + $0x724] ss:$16 sps:$4 sm:$0xff]  }
  0xab   :  { %3301 = vmatpush1.bf16.msra.mxu0 %v5907_v61  ;;  %3629 = vmatpush1.bf16.msra.mxu1 %v5910_v62  ;;  %v6002_v61 = vld [vmem:[%s9083_s1 + $0x72c] ss:$16 sps:$4 sm:$0xff]   ;;  %v5997_v62 = vld [vmem:[%s9083_s1 + $0x720] ss:$16 sps:$4 sm:$0xff]  }
  0xac   :  { %3302 = vmatprep.subr.bf16.mxu0 %v5915_v63  ;;  %3630 = vmatprep.subr.bf16.mxu1 %v5918_v0  ;;  %v6000_v63 = vld [vmem:[%s9083_s1 + $0x728] ss:$16 sps:$4 sm:$0xff]   ;;  %v6005_v0 = vld [vmem:[%s9083_s1 + $0x744] ss:$16 sps:$4 sm:$0xff]  }
  0xaf   :  { %3303 = vmatpush1.bf16.msra.mxu0 %v5913_v1  ;;  %3631 = vmatpush1.bf16.msra.mxu1 %v5916_v2  ;;  %v6008_v1 = vld [vmem:[%s9083_s1 + $0x74c] ss:$16 sps:$4 sm:$0xff]   ;;  %v6003_v2 = vld [vmem:[%s9083_s1 + $0x740] ss:$16 sps:$4 sm:$0xff]  }
  0xb0   :  { %3304 = vmatprep.subr.bf16.mxu0 %v5921_v3  ;;  %3632 = vmatprep.subr.bf16.mxu1 %v5924_v4  ;;  %v6006_v3 = vld [vmem:[%s9083_s1 + $0x748] ss:$16 sps:$4 sm:$0xff]   ;;  %v6011_v4 = vld [vmem:[%s9083_s1 + $0x764] ss:$16 sps:$4 sm:$0xff]  }
  0xb3   :  { %3305 = vmatpush1.bf16.msra.mxu0 %v5919_v5  ;;  %3633 = vmatpush1.bf16.msra.mxu1 %v5922_v6  ;;  %v6014_v5 = vld [vmem:[%s9083_s1 + $0x76c] ss:$16 sps:$4 sm:$0xff]   ;;  %v6009_v6 = vld [vmem:[%s9083_s1 + $0x760] ss:$16 sps:$4 sm:$0xff]  }
  0xb4   :  { %3306 = vmatprep.subr.bf16.mxu0 %v5927_v7  ;;  %3634 = vmatprep.subr.bf16.mxu1 %v5930_v8  ;;  %v6012_v7 = vld [vmem:[%s9083_s1 + $0x768] ss:$16 sps:$4 sm:$0xff]   ;;  %v6017_v8 = vld [vmem:[%s9083_s1 + $0x784] ss:$16 sps:$4 sm:$0xff]  }
  0xb7   :  { %3307 = vmatpush1.bf16.msra.mxu0 %v5925_v9  ;;  %3635 = vmatpush1.bf16.msra.mxu1 %v5928_v10  ;;  %v6020_v9 = vld [vmem:[%s9083_s1 + $0x78c] ss:$16 sps:$4 sm:$0xff]   ;;  %v6015_v10 = vld [vmem:[%s9083_s1 + $0x780] ss:$16 sps:$4 sm:$0xff]  }
  0xb8   :  { %3308 = vmatprep.subr.bf16.mxu0 %v5933_v11  ;;  %3636 = vmatprep.subr.bf16.mxu1 %v5936_v13  ;;  %v6018_v11 = vld [vmem:[%s9083_s1 + $0x788] ss:$16 sps:$4 sm:$0xff]   ;;  %v6023_v13 = vld [vmem:[%s9083_s1 + $0x7a4] ss:$16 sps:$4 sm:$0xff]  }
  0xbb   :  { %3309 = vmatpush1.bf16.msra.mxu0 %v5931_v14  ;;  %3637 = vmatpush1.bf16.msra.mxu1 %v5934_v15  ;;  %v6026_v14 = vld [vmem:[%s9083_s1 + $0x7ac] ss:$16 sps:$4 sm:$0xff]   ;;  %v6021_v15 = vld [vmem:[%s9083_s1 + $0x7a0] ss:$16 sps:$4 sm:$0xff]  }
  0xbc   :  { %3310 = vmatprep.subr.bf16.mxu0 %v5939_v16  ;;  %3638 = vmatprep.subr.bf16.mxu1 %v5942_v17  ;;  %v6024_v16 = vld [vmem:[%s9083_s1 + $0x7a8] ss:$16 sps:$4 sm:$0xff]   ;;  %v6029_v17 = vld [vmem:[%s9083_s1 + $0x7c4] ss:$16 sps:$4 sm:$0xff]  }
  0xbf   :  { %3311 = vmatpush1.bf16.msra.mxu0 %v5937_v20  ;;  %3639 = vmatpush1.bf16.msra.mxu1 %v5940_v21  ;;  %v6027_v20 = vld [vmem:[%s9083_s1 + $0x7c0] ss:$16 sps:$4 sm:$0xff]   ;;  %v6030_v21 = vld [vmem:[%s9083_s1 + $0x7c8] ss:$16 sps:$4 sm:$0xff]  }
  0xc0   :  { %3321 = vmatprep.subr.bf16.mxu0 %v5945_v23  ;;  %3649 = vmatprep.subr.bf16.mxu1 %v5948_v19  ;;  %v6035_v23 = vld [vmem:[%s9083_s1 + $0x7e4] ss:$16 sps:$4 sm:$0xff]   ;;  %v6038_v19 = vld [vmem:[%s9083_s1 + $0x7ec] ss:$16 sps:$4 sm:$0xff]  }
  0xc2   :  { %3313 = vmatmul.mubr.bf16.vlgmr.msra.gmra.mrb[0].mxu0 %v6890_v22  ;;  %3641 = vmatmul.mubr.bf16.vlgmr.msra.gmra.mrb[0].mxu1 %v6890_v22  ;;  %v5960_v22 = vld [vmem:[%s9083_s1 + $0x64c] ss:$16 sps:$4 sm:$0xff]  }
  0xc3   :  { %3322 = vmatpush1.bf16.msra.mxu0 %v5943_v25  ;;  %3650 = vmatpush1.bf16.msra.mxu1 %v5946_v26  ;;  %v6033_v25 = vld [vmem:[%s9083_s1 + $0x7e0] ss:$16 sps:$4 sm:$0xff]  }
  0xc4   :  { %3323 = vmatprep.subr.bf16.mxu0 %v5951_v12  ;;  %3651 = vmatprep.subr.bf16.mxu1 %v5954_v27  ;;  %v7271_v26 = vld [vmem:[%s9084_s0 + $0x10] sm:$0xff]  ;;  %v6036_v12 = vld [vmem:[%s9083_s1 + $0x7e8] ss:$16 sps:$4 sm:$0xff]  }
  0xc5   :  { %3353 = vmatprep.mubr.bf16.mxu0 %v587_v28  ;;  %3681 = vmatprep.mubr.bf16.mxu1 %v587_v28  ;;  %v6042_v27 = vld [vmem:[%s9083_s1 + $0x804] ss:$16 sps:$4 sm:$0xff]   ;;  %v6045_v28 = vld [vmem:[%s9083_s1 + $0x80c] ss:$16 sps:$4 sm:$0xff]  }
  0xc7   :  { %3324 = vmatpush1.bf16.msra.mxu0 %v5949_v29  ;;  %3652 = vmatpush1.bf16.msra.mxu1 %v5952_v30  ;;  %v7284_v29 = vrot.slane %v7271_v26, %v6602_v49  ;;  %v6040_v30 = vld [vmem:[%s9083_s1 + $0x800] ss:$16 sps:$4 sm:$0xff]  }
  0xc8   :  { %3325 = vmatprep.subr.bf16.mxu0 %v5957_v31  ;;  %3653 = vmatprep.subr.bf16.mxu1 %v5960_v22  ;;  %v6043_v31 = vld [vmem:[%s9083_s1 + $0x808] ss:$16 sps:$4 sm:$0xff]   ;;  %v6048_v22 = vld [vmem:[%s9083_s1 + $0x824] ss:$16 sps:$4 sm:$0xff]  }
  0xcb   :  { %3326 = vmatpush1.bf16.msra.mxu0 %v5955_v32  ;;  %3654 = vmatpush1.bf16.msra.mxu1 %v5958_v33  ;;  %v6051_v32 = vld [vmem:[%s9083_s1 + $0x82c] ss:$16 sps:$4 sm:$0xff]   ;;  %v603_v33 = vcombine.high %v7284_v29, %v7284_v29 }
  0xcc   :  { %3327 = vmatprep.subr.bf16.mxu0 %v5963_v34  ;;  %3655 = vmatprep.subr.bf16.mxu1 %v5966_v35  ;;  %v6046_v34 = vld [vmem:[%s9083_s1 + $0x820] ss:$16 sps:$4 sm:$0xff]   ;;  %v6049_v35 = vld [vmem:[%s9083_s1 + $0x828] ss:$16 sps:$4 sm:$0xff]  }
  0xcf   :  { %3328 = vmatpush1.bf16.msra.mxu0 %v5961_v36  ;;  %3656 = vmatpush1.bf16.msra.mxu1 %v5964_v37  ;;  %v6054_v36 = vld [vmem:[%s9083_s1 + $0x844] ss:$16 sps:$4 sm:$0xff]   ;;  %v6052_v37 = vld [vmem:[%s9083_s1 + $0x840] ss:$16 sps:$4 sm:$0xff]  }
  0xd0   :  { %3329 = vmatprep.subr.bf16.mxu0 %v5969_v38  ;;  %3657 = vmatprep.subr.bf16.mxu1 %v5972_v39  ;;  %v6055_v38 = vld [vmem:[%s9083_s1 + $0x848] ss:$16 sps:$4 sm:$0xff]   ;;  %v6060_v39 = vld [vmem:[%s9083_s1 + $0x864] ss:$16 sps:$4 sm:$0xff]  }
  0xd3   :  { %3330 = vmatpush1.bf16.msra.mxu0 %v5967_v40  ;;  %3658 = vmatpush1.bf16.msra.mxu1 %v5970_v41  ;;  %v6063_v40 = vld [vmem:[%s9083_s1 + $0x86c] ss:$16 sps:$4 sm:$0xff]   ;;  %v6058_v41 = vld [vmem:[%s9083_s1 + $0x860] ss:$16 sps:$4 sm:$0xff]  }
  0xd4   :  { %3331 = vmatprep.subr.bf16.mxu0 %v5975_v42  ;;  %3659 = vmatprep.subr.bf16.mxu1 %v5978_v44  ;;  %v6061_v42 = vld [vmem:[%s9083_s1 + $0x868] ss:$16 sps:$4 sm:$0xff]   ;;  %v6066_v44 = vld [vmem:[%s9083_s1 + $0x884] ss:$16 sps:$4 sm:$0xff]  }
  0xd7   :  { %3332 = vmatpush1.bf16.msra.mxu0 %v5973_v45  ;;  %3660 = vmatpush1.bf16.msra.mxu1 %v5976_v46  ;;  %v6069_v45 = vld [vmem:[%s9083_s1 + $0x88c] ss:$16 sps:$4 sm:$0xff]   ;;  %v6064_v46 = vld [vmem:[%s9083_s1 + $0x880] ss:$16 sps:$4 sm:$0xff]  }
  0xd8   :  { %3333 = vmatprep.subr.bf16.mxu0 %v5981_v47  ;;  %3661 = vmatprep.subr.bf16.mxu1 %v5984_v48  ;;  %v6067_v47 = vld [vmem:[%s9083_s1 + $0x888] ss:$16 sps:$4 sm:$0xff]   ;;  %v6072_v48 = vld [vmem:[%s9083_s1 + $0x8a4] ss:$16 sps:$4 sm:$0xff]  }
  0xdb   :  { %3334 = vmatpush1.bf16.msra.mxu0 %v5979_v50  ;;  %3662 = vmatpush1.bf16.msra.mxu1 %v5982_v51  ;;  %v6075_v50 = vld [vmem:[%s9083_s1 + $0x8ac] ss:$16 sps:$4 sm:$0xff]   ;;  %v6070_v51 = vld [vmem:[%s9083_s1 + $0x8a0] ss:$16 sps:$4 sm:$0xff]  }
  0xdc   :  { %3335 = vmatprep.subr.bf16.mxu0 %v5987_v52  ;;  %3663 = vmatprep.subr.bf16.mxu1 %v5990_v53  ;;  %v6073_v52 = vld [vmem:[%s9083_s1 + $0x8a8] ss:$16 sps:$4 sm:$0xff]   ;;  %v6078_v53 = vld [vmem:[%s9083_s1 + $0x8c4] ss:$16 sps:$4 sm:$0xff]  }
  0xdf   :  { %3336 = vmatpush1.bf16.msra.mxu0 %v5985_v54  ;;  %3664 = vmatpush1.bf16.msra.mxu1 %v5988_v55  ;;  %v6081_v54 = vld [vmem:[%s9083_s1 + $0x8cc] ss:$16 sps:$4 sm:$0xff]   ;;  %v6076_v55 = vld [vmem:[%s9083_s1 + $0x8c0] ss:$16 sps:$4 sm:$0xff]  }
  0xe0   :  { %3337 = vmatprep.subr.bf16.mxu0 %v5993_v56  ;;  %3665 = vmatprep.subr.bf16.mxu1 %v5996_v57  ;;  %v6079_v56 = vld [vmem:[%s9083_s1 + $0x8c8] ss:$16 sps:$4 sm:$0xff]   ;;  %v6084_v57 = vld [vmem:[%s9083_s1 + $0x8e4] ss:$16 sps:$4 sm:$0xff]  }
  0xe3   :  { %3338 = vmatpush1.bf16.msra.mxu0 %v5991_v58  ;;  %3666 = vmatpush1.bf16.msra.mxu1 %v5994_v59  ;;  %v6087_v58 = vld [vmem:[%s9083_s1 + $0x8ec] ss:$16 sps:$4 sm:$0xff]   ;;  %v6082_v59 = vld [vmem:[%s9083_s1 + $0x8e0] ss:$16 sps:$4 sm:$0xff]  }
  0xe4   :  { %3339 = vmatprep.subr.bf16.mxu0 %v5999_v60  ;;  %3667 = vmatprep.subr.bf16.mxu1 %v6002_v61  ;;  %v6085_v60 = vld [vmem:[%s9083_s1 + $0x8e8] ss:$16 sps:$4 sm:$0xff]   ;;  %v6090_v61 = vld [vmem:[%s9083_s1 + $0x904] ss:$16 sps:$4 sm:$0xff]  }
  0xe7   :  { %3340 = vmatpush1.bf16.msra.mxu0 %v5997_v62  ;;  %3668 = vmatpush1.bf16.msra.mxu1 %v6000_v63  ;;  %v6093_v62 = vld [vmem:[%s9083_s1 + $0x90c] ss:$16 sps:$4 sm:$0xff]   ;;  %v6088_v63 = vld [vmem:[%s9083_s1 + $0x900] ss:$16 sps:$4 sm:$0xff]  }
  0xe8   :  { %3341 = vmatprep.subr.bf16.mxu0 %v6005_v0  ;;  %3669 = vmatprep.subr.bf16.mxu1 %v6008_v1  ;;  %v6091_v0 = vld [vmem:[%s9083_s1 + $0x908] ss:$16 sps:$4 sm:$0xff]   ;;  %v6096_v1 = vld [vmem:[%s9083_s1 + $0x924] ss:$16 sps:$4 sm:$0xff]  }
  0xeb   :  { %3342 = vmatpush1.bf16.msra.mxu0 %v6003_v2  ;;  %3670 = vmatpush1.bf16.msra.mxu1 %v6006_v3  ;;  %v6099_v2 = vld [vmem:[%s9083_s1 + $0x92c] ss:$16 sps:$4 sm:$0xff]   ;;  %v6094_v3 = vld [vmem:[%s9083_s1 + $0x920] ss:$16 sps:$4 sm:$0xff]  }
  0xec   :  { %3343 = vmatprep.subr.bf16.mxu0 %v6011_v4  ;;  %3671 = vmatprep.subr.bf16.mxu1 %v6014_v5  ;;  %v6097_v4 = vld [vmem:[%s9083_s1 + $0x928] ss:$16 sps:$4 sm:$0xff]   ;;  %v6102_v5 = vld [vmem:[%s9083_s1 + $0x944] ss:$16 sps:$4 sm:$0xff]  }
  0xef   :  { %3344 = vmatpush1.bf16.msra.mxu0 %v6009_v6  ;;  %3672 = vmatpush1.bf16.msra.mxu1 %v6012_v7  ;;  %v6105_v6 = vld [vmem:[%s9083_s1 + $0x94c] ss:$16 sps:$4 sm:$0xff]   ;;  %v6100_v7 = vld [vmem:[%s9083_s1 + $0x940] ss:$16 sps:$4 sm:$0xff]  }
  0xf0   :  { %3345 = vmatprep.subr.bf16.mxu0 %v6017_v8  ;;  %3673 = vmatprep.subr.bf16.mxu1 %v6020_v9  ;;  %v6103_v8 = vld [vmem:[%s9083_s1 + $0x948] ss:$16 sps:$4 sm:$0xff]   ;;  %v6108_v9 = vld [vmem:[%s9083_s1 + $0x964] ss:$16 sps:$4 sm:$0xff]  }
  0xf3   :  { %3346 = vmatpush1.bf16.msra.mxu0 %v6015_v10  ;;  %3674 = vmatpush1.bf16.msra.mxu1 %v6018_v11  ;;  %v6111_v10 = vld [vmem:[%s9083_s1 + $0x96c] ss:$16 sps:$4 sm:$0xff]   ;;  %v6106_v11 = vld [vmem:[%s9083_s1 + $0x960] ss:$16 sps:$4 sm:$0xff]  }
  0xf4   :  { %3347 = vmatprep.subr.bf16.mxu0 %v6023_v13  ;;  %3675 = vmatprep.subr.bf16.mxu1 %v6026_v14  ;;  %v6109_v13 = vld [vmem:[%s9083_s1 + $0x968] ss:$16 sps:$4 sm:$0xff]   ;;  %v6114_v14 = vld [vmem:[%s9083_s1 + $0x984] ss:$16 sps:$4 sm:$0xff]  }
  0xf7   :  { %3348 = vmatpush1.bf16.msra.mxu0 %v6021_v15  ;;  %3676 = vmatpush1.bf16.msra.mxu1 %v6024_v16  ;;  %v6117_v15 = vld [vmem:[%s9083_s1 + $0x98c] ss:$16 sps:$4 sm:$0xff]   ;;  %v6112_v16 = vld [vmem:[%s9083_s1 + $0x980] ss:$16 sps:$4 sm:$0xff]  }
  0xf8   :  { %3349 = vmatprep.subr.bf16.mxu0 %v6029_v17  ;;  %3677 = vmatprep.subr.bf16.mxu1 %v6032_v18  ;;  %v6115_v17 = vld [vmem:[%s9083_s1 + $0x988] ss:$16 sps:$4 sm:$0xff]   ;;  %v6120_v18 = vld [vmem:[%s9083_s1 + $0x9a4] ss:$16 sps:$4 sm:$0xff]  }
  0xfb   :  { %3350 = vmatpush1.bf16.msra.mxu0 %v6027_v20  ;;  %3678 = vmatpush1.bf16.msra.mxu1 %v6030_v21  ;;  %v6123_v20 = vld [vmem:[%s9083_s1 + $0x9ac] ss:$16 sps:$4 sm:$0xff]   ;;  %v6118_v21 = vld [vmem:[%s9083_s1 + $0x9a0] ss:$16 sps:$4 sm:$0xff]  }
  0xfc   :  { %3351 = vmatprep.subr.bf16.mxu0 %v6035_v23  ;;  %3679 = vmatprep.subr.bf16.mxu1 %v6038_v19  ;;  %v6121_v23 = vld [vmem:[%s9083_s1 + $0x9a8] ss:$16 sps:$4 sm:$0xff]   ;;  %v6126_v19 = vld [vmem:[%s9083_s1 + $0x9c4] ss:$16 sps:$4 sm:$0xff]  }
  0xff   :  { %3352 = vmatpush1.bf16.msra.mxu0 %v6033_v25  ;;  %3680 = vmatpush1.bf16.msra.mxu1 %v6036_v12  ;;  %v6129_v25 = vld [vmem:[%s9083_s1 + $0x9cc] ss:$16 sps:$4 sm:$0xff]   ;;  %v6124_v12 = vld [vmem:[%s9083_s1 + $0x9c0] ss:$16 sps:$4 sm:$0xff]  }
 0x100   :  { %3362 = vmatprep.subr.bf16.mxu0 %v6042_v27  ;;  %3690 = vmatprep.subr.bf16.mxu1 %v6045_v28  ;;  %v6127_v27 = vld [vmem:[%s9083_s1 + $0x9c8] ss:$16 sps:$4 sm:$0xff]   ;;  %v6132_v28 = vld [vmem:[%s9083_s1 + $0x9e4] ss:$16 sps:$4 sm:$0xff]  }
 0x102   :  { %3354 = vmatmul.mubr.bf16.vlgmr.msra.gmra.mrb[0].mxu0 %v7079_v24  ;;  %3682 = vmatmul.mubr.bf16.vlgmr.msra.gmra.mrb[0].mxu1 %v7079_v24  ;;  %v6057_v24 = vld [vmem:[%s9083_s1 + $0x84c] ss:$16 sps:$4 sm:$0xff]  }
 0x103   :  { %3363 = vmatpush1.bf16.msra.mxu0 %v6040_v30  ;;  %3691 = vmatpush1.bf16.msra.mxu1 %v6043_v31  ;;  %v6135_v30 = vld [vmem:[%s9083_s1 + $0x9ec] ss:$16 sps:$4 sm:$0xff]   ;;  %v588_v31 = vcombine.high %v7271_v26, %v7271_v26 }
 0x104   :  { %3364 = vmatprep.subr.bf16.mxu0 %v6048_v22  ;;  %3692 = vmatprep.subr.bf16.mxu1 %v6051_v32  ;;  %v6130_v22 = vld [vmem:[%s9083_s1 + $0x9e0] ss:$16 sps:$4 sm:$0xff]   ;;  %v6133_v32 = vld [vmem:[%s9083_s1 + $0x9e8] ss:$16 sps:$4 sm:$0xff]   ;;  %v6141_v26 = vld [vmem:[%s9083_s1 + $0xa0c] ss:$16 sps:$4 sm:$0xff]  }
 0x105   :  { %3394 = vmatprep.mubr.bf16.mxu0 %v603_v33  ;;  %3722 = vmatprep.mubr.bf16.mxu1 %v603_v33  ;;  %v6138_v33 = vld [vmem:[%s9083_s1 + $0xa04] ss:$16 sps:$4 sm:$0xff]  }
 0x107   :  { %3365 = vmatpush1.bf16.msra.mxu0 %v6046_v34  ;;  %3693 = vmatpush1.bf16.msra.mxu1 %v6049_v35  ;;  %v7485_v34 = vrot.slane %v588_v31, %v6602_v49  ;;  %v6136_v35 = vld [vmem:[%s9083_s1 + $0xa00] ss:$16 sps:$4 sm:$0xff]   ;;  %v6225_v31 = vld [vmem:[%s9083_s1 + $0xbcc] ss:$16 sps:$4 sm:$0xff]  }
 0x108   :  { %3366 = vmatprep.subr.bf16.mxu0 %v6054_v36  ;;  %3694 = vmatprep.subr.bf16.mxu1 %v6057_v24  ;;  %v6139_v36 = vld [vmem:[%s9083_s1 + $0xa08] ss:$16 sps:$4 sm:$0xff]   ;;  %v6144_v24 = vld [vmem:[%s9083_s1 + $0xa24] ss:$16 sps:$4 sm:$0xff]  }
 0x10b   :  { %3367 = vmatpush1.bf16.msra.mxu0 %v6052_v37  ;;  %3695 = vmatpush1.bf16.msra.mxu1 %v6055_v38  ;;  %v6147_v37 = vld [vmem:[%s9083_s1 + $0xa2c] ss:$16 sps:$4 sm:$0xff]   ;;  %v604_v38 = vcombine.high %v7485_v34, %v7485_v34 }
 0x10c   :  { %3368 = vmatprep.subr.bf16.mxu0 %v6060_v39  ;;  %3696 = vmatprep.subr.bf16.mxu1 %v6063_v40  ;;  %v6142_v39 = vld [vmem:[%s9083_s1 + $0xa20] ss:$16 sps:$4 sm:$0xff]   ;;  %v6145_v40 = vld [vmem:[%s9083_s1 + $0xa28] ss:$16 sps:$4 sm:$0xff]  }
 0x10f   :  { %3369 = vmatpush1.bf16.msra.mxu0 %v6058_v41  ;;  %3697 = vmatpush1.bf16.msra.mxu1 %v6061_v42  ;;  %v6150_v41 = vld [vmem:[%s9083_s1 + $0xa44] ss:$16 sps:$4 sm:$0xff]   ;;  %v6148_v42 = vld [vmem:[%s9083_s1 + $0xa40] ss:$16 sps:$4 sm:$0xff]  }
 0x110   :  { %3370 = vmatprep.subr.bf16.mxu0 %v6066_v44  ;;  %3698 = vmatprep.subr.bf16.mxu1 %v6069_v45  ;;  %v6151_v44 = vld [vmem:[%s9083_s1 + $0xa48] ss:$16 sps:$4 sm:$0xff]   ;;  %v6156_v45 = vld [vmem:[%s9083_s1 + $0xa64] ss:$16 sps:$4 sm:$0xff]  }
 0x113   :  { %3371 = vmatpush1.bf16.msra.mxu0 %v6064_v46  ;;  %3699 = vmatpush1.bf16.msra.mxu1 %v6067_v47  ;;  %v6159_v46 = vld [vmem:[%s9083_s1 + $0xa6c] ss:$16 sps:$4 sm:$0xff]   ;;  %v6154_v47 = vld [vmem:[%s9083_s1 + $0xa60] ss:$16 sps:$4 sm:$0xff]  }
 0x114   :  { %3372 = vmatprep.subr.bf16.mxu0 %v6072_v48  ;;  %3700 = vmatprep.subr.bf16.mxu1 %v6075_v50  ;;  %v6157_v48 = vld [vmem:[%s9083_s1 + $0xa68] ss:$16 sps:$4 sm:$0xff]   ;;  %v6162_v50 = vld [vmem:[%s9083_s1 + $0xa84] ss:$16 sps:$4 sm:$0xff]  }
 0x117   :  { %3373 = vmatpush1.bf16.msra.mxu0 %v6070_v51  ;;  %3701 = vmatpush1.bf16.msra.mxu1 %v6073_v52  ;;  %v6165_v51 = vld [vmem:[%s9083_s1 + $0xa8c] ss:$16 sps:$4 sm:$0xff]   ;;  %v6160_v52 = vld [vmem:[%s9083_s1 + $0xa80] ss:$16 sps:$4 sm:$0xff]  }
 0x118   :  { %3374 = vmatprep.subr.bf16.mxu0 %v6078_v53  ;;  %3702 = vmatprep.subr.bf16.mxu1 %v6081_v54  ;;  %v6163_v53 = vld [vmem:[%s9083_s1 + $0xa88] ss:$16 sps:$4 sm:$0xff]   ;;  %v6168_v54 = vld [vmem:[%s9083_s1 + $0xaa4] ss:$16 sps:$4 sm:$0xff]  }
 0x11b   :  { %3375 = vmatpush1.bf16.msra.mxu0 %v6076_v55  ;;  %3703 = vmatpush1.bf16.msra.mxu1 %v6079_v56  ;;  %v6171_v55 = vld [vmem:[%s9083_s1 + $0xaac] ss:$16 sps:$4 sm:$0xff]   ;;  %v6166_v56 = vld [vmem:[%s9083_s1 + $0xaa0] ss:$16 sps:$4 sm:$0xff]  }
 0x11c   :  { %3376 = vmatprep.subr.bf16.mxu0 %v6084_v57  ;;  %3704 = vmatprep.subr.bf16.mxu1 %v6087_v58  ;;  %v6169_v57 = vld [vmem:[%s9083_s1 + $0xaa8] ss:$16 sps:$4 sm:$0xff]   ;;  %v6174_v58 = vld [vmem:[%s9083_s1 + $0xac4] ss:$16 sps:$4 sm:$0xff]  }
 0x11f   :  { %3377 = vmatpush1.bf16.msra.mxu0 %v6082_v59  ;;  %3705 = vmatpush1.bf16.msra.mxu1 %v6085_v60  ;;  %v6177_v59 = vld [vmem:[%s9083_s1 + $0xacc] ss:$16 sps:$4 sm:$0xff]   ;;  %v6172_v60 = vld [vmem:[%s9083_s1 + $0xac0] ss:$16 sps:$4 sm:$0xff]  }
 0x120   :  { %3378 = vmatprep.subr.bf16.mxu0 %v6090_v61  ;;  %3706 = vmatprep.subr.bf16.mxu1 %v6093_v62  ;;  %v6175_v61 = vld [vmem:[%s9083_s1 + $0xac8] ss:$16 sps:$4 sm:$0xff]   ;;  %v6180_v62 = vld [vmem:[%s9083_s1 + $0xae4] ss:$16 sps:$4 sm:$0xff]  }
 0x123   :  { %3379 = vmatpush1.bf16.msra.mxu0 %v6088_v63  ;;  %3707 = vmatpush1.bf16.msra.mxu1 %v6091_v0  ;;  %v6183_v63 = vld [vmem:[%s9083_s1 + $0xaec] ss:$16 sps:$4 sm:$0xff]   ;;  %v6178_v0 = vld [vmem:[%s9083_s1 + $0xae0] ss:$16 sps:$4 sm:$0xff]  }
 0x124   :  { %3380 = vmatprep.subr.bf16.mxu0 %v6096_v1  ;;  %3708 = vmatprep.subr.bf16.mxu1 %v6099_v2  ;;  %v6181_v1 = vld [vmem:[%s9083_s1 + $0xae8] ss:$16 sps:$4 sm:$0xff]   ;;  %v6186_v2 = vld [vmem:[%s9083_s1 + $0xb04] ss:$16 sps:$4 sm:$0xff]  }
 0x127   :  { %3381 = vmatpush1.bf16.msra.mxu0 %v6094_v3  ;;  %3709 = vmatpush1.bf16.msra.mxu1 %v6097_v4  ;;  %v6189_v3 = vld [vmem:[%s9083_s1 + $0xb0c] ss:$16 sps:$4 sm:$0xff]   ;;  %v6184_v4 = vld [vmem:[%s9083_s1 + $0xb00] ss:$16 sps:$4 sm:$0xff]  }
 0x128   :  { %3382 = vmatprep.subr.bf16.mxu0 %v6102_v5  ;;  %3710 = vmatprep.subr.bf16.mxu1 %v6105_v6  ;;  %v6187_v5 = vld [vmem:[%s9083_s1 + $0xb08] ss:$16 sps:$4 sm:$0xff]   ;;  %v6192_v6 = vld [vmem:[%s9083_s1 + $0xb24] ss:$16 sps:$4 sm:$0xff]  }
 0x12b   :  { %3383 = vmatpush1.bf16.msra.mxu0 %v6100_v7  ;;  %3711 = vmatpush1.bf16.msra.mxu1 %v6103_v8  ;;  %v6195_v7 = vld [vmem:[%s9083_s1 + $0xb2c] ss:$16 sps:$4 sm:$0xff]   ;;  %v6190_v8 = vld [vmem:[%s9083_s1 + $0xb20] ss:$16 sps:$4 sm:$0xff]  }
 0x12c   :  { %3384 = vmatprep.subr.bf16.mxu0 %v6108_v9  ;;  %3712 = vmatprep.subr.bf16.mxu1 %v6111_v10  ;;  %v6193_v9 = vld [vmem:[%s9083_s1 + $0xb28] ss:$16 sps:$4 sm:$0xff]   ;;  %v6198_v10 = vld [vmem:[%s9083_s1 + $0xb44] ss:$16 sps:$4 sm:$0xff]  }
 0x12f   :  { %3385 = vmatpush1.bf16.msra.mxu0 %v6106_v11  ;;  %3713 = vmatpush1.bf16.msra.mxu1 %v6109_v13  ;;  %v6201_v11 = vld [vmem:[%s9083_s1 + $0xb4c] ss:$16 sps:$4 sm:$0xff]   ;;  %v6196_v13 = vld [vmem:[%s9083_s1 + $0xb40] ss:$16 sps:$4 sm:$0xff]  }
 0x130   :  { %3386 = vmatprep.subr.bf16.mxu0 %v6114_v14  ;;  %3714 = vmatprep.subr.bf16.mxu1 %v6117_v15  ;;  %v6199_v14 = vld [vmem:[%s9083_s1 + $0xb48] ss:$16 sps:$4 sm:$0xff]   ;;  %v6204_v15 = vld [vmem:[%s9083_s1 + $0xb64] ss:$16 sps:$4 sm:$0xff]  }
 0x133   :  { %3387 = vmatpush1.bf16.msra.mxu0 %v6112_v16  ;;  %3715 = vmatpush1.bf16.msra.mxu1 %v6115_v17  ;;  %v6207_v16 = vld [vmem:[%s9083_s1 + $0xb6c] ss:$16 sps:$4 sm:$0xff]   ;;  %v6202_v17 = vld [vmem:[%s9083_s1 + $0xb60] ss:$16 sps:$4 sm:$0xff]  }
 0x134   :  { %3388 = vmatprep.subr.bf16.mxu0 %v6120_v18  ;;  %3716 = vmatprep.subr.bf16.mxu1 %v6123_v20  ;;  %v6205_v18 = vld [vmem:[%s9083_s1 + $0xb68] ss:$16 sps:$4 sm:$0xff]   ;;  %v6210_v20 = vld [vmem:[%s9083_s1 + $0xb84] ss:$16 sps:$4 sm:$0xff]  }
 0x137   :  { %3389 = vmatpush1.bf16.msra.mxu0 %v6118_v21  ;;  %3717 = vmatpush1.bf16.msra.mxu1 %v6121_v23  ;;  %v6213_v21 = vld [vmem:[%s9083_s1 + $0xb8c] ss:$16 sps:$4 sm:$0xff]   ;;  %v6208_v23 = vld [vmem:[%s9083_s1 + $0xb80] ss:$16 sps:$4 sm:$0xff]  }
 0x138   :  { %3390 = vmatprep.subr.bf16.mxu0 %v6126_v19  ;;  %3718 = vmatprep.subr.bf16.mxu1 %v6129_v25  ;;  %v6211_v19 = vld [vmem:[%s9083_s1 + $0xb88] ss:$16 sps:$4 sm:$0xff]   ;;  %v6216_v25 = vld [vmem:[%s9083_s1 + $0xba4] ss:$16 sps:$4 sm:$0xff]  }
 0x13b   :  { %3391 = vmatpush1.bf16.msra.mxu0 %v6124_v12  ;;  %3719 = vmatpush1.bf16.msra.mxu1 %v6127_v27  ;;  %v6219_v12 = vld [vmem:[%s9083_s1 + $0xbac] ss:$16 sps:$4 sm:$0xff]   ;;  %v6214_v27 = vld [vmem:[%s9083_s1 + $0xba0] ss:$16 sps:$4 sm:$0xff]  }
 0x13c   :  { %3392 = vmatprep.subr.bf16.mxu0 %v6132_v28  ;;  %3720 = vmatprep.subr.bf16.mxu1 %v6135_v30  ;;  %v6217_v28 = vld [vmem:[%s9083_s1 + $0xba8] ss:$16 sps:$4 sm:$0xff]   ;;  %v6222_v30 = vld [vmem:[%s9083_s1 + $0xbc4] ss:$16 sps:$4 sm:$0xff]  }
 0x13f   :  { %3393 = vmatpush1.bf16.msra.mxu0 %v6130_v22  ;;  %3721 = vmatpush1.bf16.msra.mxu1 %v6133_v32  ;;  %v6220_v22 = vld [vmem:[%s9083_s1 + $0xbc0] ss:$16 sps:$4 sm:$0xff]   ;;  %v6223_v32 = vld [vmem:[%s9083_s1 + $0xbc8] ss:$16 sps:$4 sm:$0xff]  }
 0x140   :  { %3403 = vmatprep.subr.bf16.mxu0 %v6138_v33  ;;  %3731 = vmatprep.subr.bf16.mxu1 %v6141_v26  ;;  %v6228_v33 = vld [vmem:[%s9083_s1 + $0xbe4] ss:$16 sps:$4 sm:$0xff]   ;;  %v6231_v26 = vld [vmem:[%s9083_s1 + $0xbec] ss:$16 sps:$4 sm:$0xff]  }
 0x142   :  { %3395 = vmatmul.mubr.bf16.vlgmr.msra.gmra.mrb[0].mxu0 %v7284_v29  ;;  %3723 = vmatmul.mubr.bf16.vlgmr.msra.gmra.mrb[0].mxu1 %v7284_v29  ;;  %v6153_v29 = vld [vmem:[%s9083_s1 + $0xa4c] ss:$16 sps:$4 sm:$0xff]  }
 0x143   :  { %3404 = vmatpush1.bf16.msra.mxu0 %v6136_v35  ;;  %3732 = vmatpush1.bf16.msra.mxu1 %v6139_v36  ;;  %v7674_v35 = vld [vmem:[%s9084_s0 + $0x18] sm:$0xff]  ;;  %v6226_v36 = vld [vmem:[%s9083_s1 + $0xbe0] ss:$16 sps:$4 sm:$0xff]  }
 0x144   :  { %3405 = vmatprep.subr.bf16.mxu0 %v6144_v24  ;;  %3733 = vmatprep.subr.bf16.mxu1 %v6147_v37  ;;  %v6229_v24 = vld [vmem:[%s9083_s1 + $0xbe8] ss:$16 sps:$4 sm:$0xff]   ;;  %v6235_v37 = vld [vmem:[%s9083_s1 + $0xc04] ss:$16 sps:$4 sm:$0xff]  }
 0x145   :  { %3435 = vmatprep.mubr.bf16.mxu0 %v604_v38  ;;  %3763 = vmatprep.mubr.bf16.mxu1 %v604_v38  ;;  %v6238_v38 = vld [vmem:[%s9083_s1 + $0xc0c] ss:$16 sps:$4 sm:$0xff]  }
 0x147   :  { %3406 = vmatpush1.bf16.msra.mxu0 %v6142_v39  ;;  %3734 = vmatpush1.bf16.msra.mxu1 %v6145_v40  ;;  %v7690_v39 = vrot.slane %v7674_v35, %v6602_v49  ;;  %v6233_v40 = vld [vmem:[%s9083_s1 + $0xc00] ss:$16 sps:$4 sm:$0xff]  }
 0x148   :  { %3407 = vmatprep.subr.bf16.mxu0 %v6150_v41  ;;  %3735 = vmatprep.subr.bf16.mxu1 %v6153_v29  ;;  %v6236_v41 = vld [vmem:[%s9083_s1 + $0xc08] ss:$16 sps:$4 sm:$0xff]   ;;  %v6241_v29 = vld [vmem:[%s9083_s1 + $0xc24] ss:$16 sps:$4 sm:$0xff]  }
 0x14b   :  { %3408 = vmatpush1.bf16.msra.mxu0 %v6148_v42  ;;  %3736 = vmatpush1.bf16.msra.mxu1 %v6151_v44  ;;  %v6244_v42 = vld [vmem:[%s9083_s1 + $0xc2c] ss:$16 sps:$4 sm:$0xff]   ;;  %v620_v44 = vcombine.high %v7690_v39, %v7690_v39 }
 0x14c   :  { %3409 = vmatprep.subr.bf16.mxu0 %v6156_v45  ;;  %3737 = vmatprep.subr.bf16.mxu1 %v6159_v46  ;;  %v6239_v45 = vld [vmem:[%s9083_s1 + $0xc20] ss:$16 sps:$4 sm:$0xff]   ;;  %v6242_v46 = vld [vmem:[%s9083_s1 + $0xc28] ss:$16 sps:$4 sm:$0xff]  }
 0x14f   :  { %3410 = vmatpush1.bf16.msra.mxu0 %v6154_v47  ;;  %3738 = vmatpush1.bf16.msra.mxu1 %v6157_v48  ;;  %v6247_v47 = vld [vmem:[%s9083_s1 + $0xc44] ss:$16 sps:$4 sm:$0xff]   ;;  %v6245_v48 = vld [vmem:[%s9083_s1 + $0xc40] ss:$16 sps:$4 sm:$0xff]  }
 0x150   :  { %3411 = vmatprep.subr.bf16.mxu0 %v6162_v50  ;;  %3739 = vmatprep.subr.bf16.mxu1 %v6165_v51  ;;  %v6248_v50 = vld [vmem:[%s9083_s1 + $0xc48] ss:$16 sps:$4 sm:$0xff]   ;;  %v6253_v51 = vld [vmem:[%s9083_s1 + $0xc64] ss:$16 sps:$4 sm:$0xff]  }
 0x153   :  { %3412 = vmatpush1.bf16.msra.mxu0 %v6160_v52  ;;  %3740 = vmatpush1.bf16.msra.mxu1 %v6163_v53  ;;  %v6256_v52 = vld [vmem:[%s9083_s1 + $0xc6c] ss:$16 sps:$4 sm:$0xff]   ;;  %v6251_v53 = vld [vmem:[%s9083_s1 + $0xc60] ss:$16 sps:$4 sm:$0xff]  }
 0x154   :  { %3413 = vmatprep.subr.bf16.mxu0 %v6168_v54  ;;  %3741 = vmatprep.subr.bf16.mxu1 %v6171_v55  ;;  %v6254_v54 = vld [vmem:[%s9083_s1 + $0xc68] ss:$16 sps:$4 sm:$0xff]   ;;  %v6259_v55 = vld [vmem:[%s9083_s1 + $0xc84] ss:$16 sps:$4 sm:$0xff]  }
 0x157   :  { %3414 = vmatpush1.bf16.msra.mxu0 %v6166_v56  ;;  %3742 = vmatpush1.bf16.msra.mxu1 %v6169_v57  ;;  %v6262_v56 = vld [vmem:[%s9083_s1 + $0xc8c] ss:$16 sps:$4 sm:$0xff]   ;;  %v6257_v57 = vld [vmem:[%s9083_s1 + $0xc80] ss:$16 sps:$4 sm:$0xff]  }
 0x158   :  { %3415 = vmatprep.subr.bf16.mxu0 %v6174_v58  ;;  %3743 = vmatprep.subr.bf16.mxu1 %v6177_v59  ;;  %v6260_v58 = vld [vmem:[%s9083_s1 + $0xc88] ss:$16 sps:$4 sm:$0xff]   ;;  %v6265_v59 = vld [vmem:[%s9083_s1 + $0xca4] ss:$16 sps:$4 sm:$0xff]  }
 0x15b   :  { %3416 = vmatpush1.bf16.msra.mxu0 %v6172_v60  ;;  %3744 = vmatpush1.bf16.msra.mxu1 %v6175_v61  ;;  %v6268_v60 = vld [vmem:[%s9083_s1 + $0xcac] ss:$16 sps:$4 sm:$0xff]   ;;  %v6263_v61 = vld [vmem:[%s9083_s1 + $0xca0] ss:$16 sps:$4 sm:$0xff]  }
 0x15c   :  { %3417 = vmatprep.subr.bf16.mxu0 %v6180_v62  ;;  %3745 = vmatprep.subr.bf16.mxu1 %v6183_v63  ;;  %v6266_v62 = vld [vmem:[%s9083_s1 + $0xca8] ss:$16 sps:$4 sm:$0xff]   ;;  %v6271_v63 = vld [vmem:[%s9083_s1 + $0xcc4] ss:$16 sps:$4 sm:$0xff]  }
 0x15f   :  { %3418 = vmatpush1.bf16.msra.mxu0 %v6178_v0  ;;  %3746 = vmatpush1.bf16.msra.mxu1 %v6181_v1  ;;  %v6274_v0 = vld [vmem:[%s9083_s1 + $0xccc] ss:$16 sps:$4 sm:$0xff]   ;;  %v6269_v1 = vld [vmem:[%s9083_s1 + $0xcc0] ss:$16 sps:$4 sm:$0xff]  }
 0x160   :  { %3419 = vmatprep.subr.bf16.mxu0 %v6186_v2  ;;  %3747 = vmatprep.subr.bf16.mxu1 %v6189_v3  ;;  %v6272_v2 = vld [vmem:[%s9083_s1 + $0xcc8] ss:$16 sps:$4 sm:$0xff]   ;;  %v6277_v3 = vld [vmem:[%s9083_s1 + $0xce4] ss:$16 sps:$4 sm:$0xff]  }
 0x163   :  { %3420 = vmatpush1.bf16.msra.mxu0 %v6184_v4  ;;  %3748 = vmatpush1.bf16.msra.mxu1 %v6187_v5  ;;  %v6280_v4 = vld [vmem:[%s9083_s1 + $0xcec] ss:$16 sps:$4 sm:$0xff]   ;;  %v6275_v5 = vld [vmem:[%s9083_s1 + $0xce0] ss:$16 sps:$4 sm:$0xff]  }
 0x164   :  { %3421 = vmatprep.subr.bf16.mxu0 %v6192_v6  ;;  %3749 = vmatprep.subr.bf16.mxu1 %v6195_v7  ;;  %v6278_v6 = vld [vmem:[%s9083_s1 + $0xce8] ss:$16 sps:$4 sm:$0xff]   ;;  %v6283_v7 = vld [vmem:[%s9083_s1 + $0xd04] ss:$16 sps:$4 sm:$0xff]  }
 0x167   :  { %3422 = vmatpush1.bf16.msra.mxu0 %v6190_v8  ;;  %3750 = vmatpush1.bf16.msra.mxu1 %v6193_v9  ;;  %v6286_v8 = vld [vmem:[%s9083_s1 + $0xd0c] ss:$16 sps:$4 sm:$0xff]   ;;  %v6281_v9 = vld [vmem:[%s9083_s1 + $0xd00] ss:$16 sps:$4 sm:$0xff]  }
 0x168   :  { %3423 = vmatprep.subr.bf16.mxu0 %v6198_v10  ;;  %3751 = vmatprep.subr.bf16.mxu1 %v6201_v11  ;;  %v6284_v10 = vld [vmem:[%s9083_s1 + $0xd08] ss:$16 sps:$4 sm:$0xff]   ;;  %v6289_v11 = vld [vmem:[%s9083_s1 + $0xd24] ss:$16 sps:$4 sm:$0xff]  }
 0x16b   :  { %3424 = vmatpush1.bf16.msra.mxu0 %v6196_v13  ;;  %3752 = vmatpush1.bf16.msra.mxu1 %v6199_v14  ;;  %v6292_v13 = vld [vmem:[%s9083_s1 + $0xd2c] ss:$16 sps:$4 sm:$0xff]   ;;  %v6287_v14 = vld [vmem:[%s9083_s1 + $0xd20] ss:$16 sps:$4 sm:$0xff]  }
 0x16c   :  { %3425 = vmatprep.subr.bf16.mxu0 %v6204_v15  ;;  %3753 = vmatprep.subr.bf16.mxu1 %v6207_v16  ;;  %v6290_v15 = vld [vmem:[%s9083_s1 + $0xd28] ss:$16 sps:$4 sm:$0xff]   ;;  %v6295_v16 = vld [vmem:[%s9083_s1 + $0xd44] ss:$16 sps:$4 sm:$0xff]  }
 0x16f   :  { %3426 = vmatpush1.bf16.msra.mxu0 %v6202_v17  ;;  %3754 = vmatpush1.bf16.msra.mxu1 %v6205_v18  ;;  %v6298_v17 = vld [vmem:[%s9083_s1 + $0xd4c] ss:$16 sps:$4 sm:$0xff]   ;;  %v6293_v18 = vld [vmem:[%s9083_s1 + $0xd40] ss:$16 sps:$4 sm:$0xff]  }
 0x170   :  { %3427 = vmatprep.subr.bf16.mxu0 %v6210_v20  ;;  %3755 = vmatprep.subr.bf16.mxu1 %v6213_v21  ;;  %v6296_v20 = vld [vmem:[%s9083_s1 + $0xd48] ss:$16 sps:$4 sm:$0xff]   ;;  %v6301_v21 = vld [vmem:[%s9083_s1 + $0xd64] ss:$16 sps:$4 sm:$0xff]  }
 0x173   :  { %3428 = vmatpush1.bf16.msra.mxu0 %v6208_v23  ;;  %3756 = vmatpush1.bf16.msra.mxu1 %v6211_v19  ;;  %v6304_v23 = vld [vmem:[%s9083_s1 + $0xd6c] ss:$16 sps:$4 sm:$0xff]   ;;  %v6299_v19 = vld [vmem:[%s9083_s1 + $0xd60] ss:$16 sps:$4 sm:$0xff]  }
 0x174   :  { %3429 = vmatprep.subr.bf16.mxu0 %v6216_v25  ;;  %3757 = vmatprep.subr.bf16.mxu1 %v6219_v12  ;;  %v6302_v25 = vld [vmem:[%s9083_s1 + $0xd68] ss:$16 sps:$4 sm:$0xff]   ;;  %v6307_v12 = vld [vmem:[%s9083_s1 + $0xd84] ss:$16 sps:$4 sm:$0xff]  }
 0x177   :  { %3430 = vmatpush1.bf16.msra.mxu0 %v6214_v27  ;;  %3758 = vmatpush1.bf16.msra.mxu1 %v6217_v28  ;;  %v6310_v27 = vld [vmem:[%s9083_s1 + $0xd8c] ss:$16 sps:$4 sm:$0xff]   ;;  %v6305_v28 = vld [vmem:[%s9083_s1 + $0xd80] ss:$16 sps:$4 sm:$0xff]  }
 0x178   :  { %3431 = vmatprep.subr.bf16.mxu0 %v6222_v30  ;;  %3759 = vmatprep.subr.bf16.mxu1 %v6225_v31  ;;  %v6308_v30 = vld [vmem:[%s9083_s1 + $0xd88] ss:$16 sps:$4 sm:$0xff]   ;;  %v6313_v31 = vld [vmem:[%s9083_s1 + $0xda4] ss:$16 sps:$4 sm:$0xff]  }
 0x17b   :  { %3432 = vmatpush1.bf16.msra.mxu0 %v6220_v22  ;;  %3760 = vmatpush1.bf16.msra.mxu1 %v6223_v32  ;;  %v6316_v22 = vld [vmem:[%s9083_s1 + $0xdac] ss:$16 sps:$4 sm:$0xff]   ;;  %v6311_v32 = vld [vmem:[%s9083_s1 + $0xda0] ss:$16 sps:$4 sm:$0xff]  }
 0x17c   :  { %3433 = vmatprep.subr.bf16.mxu0 %v6228_v33  ;;  %3761 = vmatprep.subr.bf16.mxu1 %v6231_v26  ;;  %v6314_v33 = vld [vmem:[%s9083_s1 + $0xda8] ss:$16 sps:$4 sm:$0xff]   ;;  %v6319_v26 = vld [vmem:[%s9083_s1 + $0xdc4] ss:$16 sps:$4 sm:$0xff]  }
 0x17f   :  { %3434 = vmatpush1.bf16.msra.mxu0 %v6226_v36  ;;  %3762 = vmatpush1.bf16.msra.mxu1 %v6229_v24  ;;  %v6322_v36 = vld [vmem:[%s9083_s1 + $0xdcc] ss:$16 sps:$4 sm:$0xff]   ;;  %v6317_v24 = vld [vmem:[%s9083_s1 + $0xdc0] ss:$16 sps:$4 sm:$0xff]  }
 0x180   :  { %3444 = vmatprep.subr.bf16.mxu0 %v6235_v37  ;;  %3772 = vmatprep.subr.bf16.mxu1 %v6238_v38  ;;  %v6320_v37 = vld [vmem:[%s9083_s1 + $0xdc8] ss:$16 sps:$4 sm:$0xff]   ;;  %v6325_v38 = vld [vmem:[%s9083_s1 + $0xde4] ss:$16 sps:$4 sm:$0xff]  }
 0x182   :  { %3436 = vmatmul.mubr.bf16.vlgmr.msra.gmra.mrb[0].mxu0 %v7485_v34  ;;  %3764 = vmatmul.mubr.bf16.vlgmr.msra.gmra.mrb[0].mxu1 %v7485_v34  ;;  %v6250_v34 = vld [vmem:[%s9083_s1 + $0xc4c] ss:$16 sps:$4 sm:$0xff]  }
 0x183   :  { %3445 = vmatpush1.bf16.msra.mxu0 %v6233_v40  ;;  %3773 = vmatpush1.bf16.msra.mxu1 %v6236_v41  ;;  %v6328_v40 = vld [vmem:[%s9083_s1 + $0xdec] ss:$16 sps:$4 sm:$0xff]   ;;  %v605_v41 = vcombine.high %v7674_v35, %v7674_v35 }
 0x184   :  { %3446 = vmatprep.subr.bf16.mxu0 %v6241_v29  ;;  %3774 = vmatprep.subr.bf16.mxu1 %v6244_v42  ;;  %v6323_v29 = vld [vmem:[%s9083_s1 + $0xde0] ss:$16 sps:$4 sm:$0xff]   ;;  %v6326_v42 = vld [vmem:[%s9083_s1 + $0xde8] ss:$16 sps:$4 sm:$0xff]   ;;  %v6334_v35 = vld [vmem:[%s9083_s1 + $0xe0c] ss:$16 sps:$4 sm:$0xff]  }
 0x185   :  { %3476 = vmatprep.mubr.bf16.mxu0 %v620_v44  ;;  %3804 = vmatprep.mubr.bf16.mxu1 %v620_v44  ;;  %v6331_v44 = vld [vmem:[%s9083_s1 + $0xe04] ss:$16 sps:$4 sm:$0xff]  }
 0x187   :  { %3447 = vmatpush1.bf16.msra.mxu0 %v6239_v45  ;;  %3775 = vmatpush1.bf16.msra.mxu1 %v6242_v46  ;;  %v7891_v45 = vrot.slane %v605_v41, %v6602_v49  ;;  %v6329_v46 = vld [vmem:[%s9083_s1 + $0xe00] ss:$16 sps:$4 sm:$0xff]   ;;  %v6340_v49 = vld [vmem:[%s9083_s1 + $0xe2c] ss:$16 sps:$4 sm:$0xff]  }
 0x188   :  { %3448 = vmatprep.subr.bf16.mxu0 %v6247_v47  ;;  %3776 = vmatprep.subr.bf16.mxu1 %v6250_v34  ;;  %v6332_v47 = vld [vmem:[%s9083_s1 + $0xe08] ss:$16 sps:$4 sm:$0xff]   ;;  %v6337_v34 = vld [vmem:[%s9083_s1 + $0xe24] ss:$16 sps:$4 sm:$0xff]   ;;  %v6413_v41 = vld [vmem:[%s9083_s1 + $0xfc0] ss:$16 sps:$4 sm:$0xff]  }
 0x18b   :  { %3449 = vmatpush1.bf16.msra.mxu0 %v6245_v48  ;;  %3777 = vmatpush1.bf16.msra.mxu1 %v6248_v50  ;;  %v621_v48 = vcombine.high %v7891_v45, %v7891_v45  ;;  %v6335_v50 = vld [vmem:[%s9083_s1 + $0xe20] ss:$16 sps:$4 sm:$0xff]  }
 0x18c   :  { %3450 = vmatprep.subr.bf16.mxu0 %v6253_v51  ;;  %3778 = vmatprep.subr.bf16.mxu1 %v6256_v52  ;;  %v6338_v51 = vld [vmem:[%s9083_s1 + $0xe28] ss:$16 sps:$4 sm:$0xff]   ;;  %v6343_v52 = vld [vmem:[%s9083_s1 + $0xe44] ss:$16 sps:$4 sm:$0xff]  }
 0x18f   :  { %3451 = vmatpush1.bf16.msra.mxu0 %v6251_v53  ;;  %3779 = vmatpush1.bf16.msra.mxu1 %v6254_v54  ;;  %v6341_v53 = vld [vmem:[%s9083_s1 + $0xe40] ss:$16 sps:$4 sm:$0xff]   ;;  %v6344_v54 = vld [vmem:[%s9083_s1 + $0xe48] ss:$16 sps:$4 sm:$0xff]  }
 0x190   :  { %3452 = vmatprep.subr.bf16.mxu0 %v6259_v55  ;;  %3780 = vmatprep.subr.bf16.mxu1 %v6262_v56  ;;  %v6349_v55 = vld [vmem:[%s9083_s1 + $0xe64] ss:$16 sps:$4 sm:$0xff]   ;;  %v6352_v56 = vld [vmem:[%s9083_s1 + $0xe6c] ss:$16 sps:$4 sm:$0xff]  }
 0x193   :  { %3453 = vmatpush1.bf16.msra.mxu0 %v6257_v57  ;;  %3781 = vmatpush1.bf16.msra.mxu1 %v6260_v58  ;;  %v6347_v57 = vld [vmem:[%s9083_s1 + $0xe60] ss:$16 sps:$4 sm:$0xff]   ;;  %v6350_v58 = vld [vmem:[%s9083_s1 + $0xe68] ss:$16 sps:$4 sm:$0xff]  }
 0x194   :  { %3454 = vmatprep.subr.bf16.mxu0 %v6265_v59  ;;  %3782 = vmatprep.subr.bf16.mxu1 %v6268_v60  ;;  %v6355_v59 = vld [vmem:[%s9083_s1 + $0xe84] ss:$16 sps:$4 sm:$0xff]   ;;  %v6358_v60 = vld [vmem:[%s9083_s1 + $0xe8c] ss:$16 sps:$4 sm:$0xff]  }
 0x197   :  { %3455 = vmatpush1.bf16.msra.mxu0 %v6263_v61  ;;  %3783 = vmatpush1.bf16.msra.mxu1 %v6266_v62  ;;  %v6353_v61 = vld [vmem:[%s9083_s1 + $0xe80] ss:$16 sps:$4 sm:$0xff]   ;;  %v6356_v62 = vld [vmem:[%s9083_s1 + $0xe88] ss:$16 sps:$4 sm:$0xff]  }
 0x198   :  { %3456 = vmatprep.subr.bf16.mxu0 %v6271_v63  ;;  %3784 = vmatprep.subr.bf16.mxu1 %v6274_v0  ;;  %v6361_v63 = vld [vmem:[%s9083_s1 + $0xea4] ss:$16 sps:$4 sm:$0xff]   ;;  %v6364_v0 = vld [vmem:[%s9083_s1 + $0xeac] ss:$16 sps:$4 sm:$0xff]  }
 0x19b   :  { %3457 = vmatpush1.bf16.msra.mxu0 %v6269_v1  ;;  %3785 = vmatpush1.bf16.msra.mxu1 %v6272_v2  ;;  %v6359_v1 = vld [vmem:[%s9083_s1 + $0xea0] ss:$16 sps:$4 sm:$0xff]   ;;  %v6362_v2 = vld [vmem:[%s9083_s1 + $0xea8] ss:$16 sps:$4 sm:$0xff]  }
 0x19c   :  { %3458 = vmatprep.subr.bf16.mxu0 %v6277_v3  ;;  %3786 = vmatprep.subr.bf16.mxu1 %v6280_v4  ;;  %v6367_v3 = vld [vmem:[%s9083_s1 + $0xec4] ss:$16 sps:$4 sm:$0xff]   ;;  %v6370_v4 = vld [vmem:[%s9083_s1 + $0xecc] ss:$16 sps:$4 sm:$0xff]  }
 0x19f   :  { %3459 = vmatpush1.bf16.msra.mxu0 %v6275_v5  ;;  %3787 = vmatpush1.bf16.msra.mxu1 %v6278_v6  ;;  %v6365_v5 = vld [vmem:[%s9083_s1 + $0xec0] ss:$16 sps:$4 sm:$0xff]   ;;  %v6368_v6 = vld [vmem:[%s9083_s1 + $0xec8] ss:$16 sps:$4 sm:$0xff]  }
 0x1a0   :  { %3460 = vmatprep.subr.bf16.mxu0 %v6283_v7  ;;  %3788 = vmatprep.subr.bf16.mxu1 %v6286_v8  ;;  %v6373_v7 = vld [vmem:[%s9083_s1 + $0xee4] ss:$16 sps:$4 sm:$0xff]   ;;  %v6376_v8 = vld [vmem:[%s9083_s1 + $0xeec] ss:$16 sps:$4 sm:$0xff]  }
 0x1a3   :  { %3461 = vmatpush1.bf16.msra.mxu0 %v6281_v9  ;;  %3789 = vmatpush1.bf16.msra.mxu1 %v6284_v10  ;;  %v6371_v9 = vld [vmem:[%s9083_s1 + $0xee0] ss:$16 sps:$4 sm:$0xff]   ;;  %v6374_v10 = vld [vmem:[%s9083_s1 + $0xee8] ss:$16 sps:$4 sm:$0xff]  }
 0x1a4   :  { %3462 = vmatprep.subr.bf16.mxu0 %v6289_v11  ;;  %3790 = vmatprep.subr.bf16.mxu1 %v6292_v13  ;;  %v6379_v11 = vld [vmem:[%s9083_s1 + $0xf04] ss:$16 sps:$4 sm:$0xff]   ;;  %v6382_v13 = vld [vmem:[%s9083_s1 + $0xf0c] ss:$16 sps:$4 sm:$0xff]  }
 0x1a7   :  { %3463 = vmatpush1.bf16.msra.mxu0 %v6287_v14  ;;  %3791 = vmatpush1.bf16.msra.mxu1 %v6290_v15  ;;  %v6377_v14 = vld [vmem:[%s9083_s1 + $0xf00] ss:$16 sps:$4 sm:$0xff]   ;;  %v6380_v15 = vld [vmem:[%s9083_s1 + $0xf08] ss:$16 sps:$4 sm:$0xff]  }
 0x1a8   :  { %3464 = vmatprep.subr.bf16.mxu0 %v6295_v16  ;;  %3792 = vmatprep.subr.bf16.mxu1 %v6298_v17  ;;  %v6385_v16 = vld [vmem:[%s9083_s1 + $0xf24] ss:$16 sps:$4 sm:$0xff]   ;;  %v6388_v17 = vld [vmem:[%s9083_s1 + $0xf2c] ss:$16 sps:$4 sm:$0xff]  }
 0x1ab   :  { %3465 = vmatpush1.bf16.msra.mxu0 %v6293_v18  ;;  %3793 = vmatpush1.bf16.msra.mxu1 %v6296_v20  ;;  %v6383_v18 = vld [vmem:[%s9083_s1 + $0xf20] ss:$16 sps:$4 sm:$0xff]   ;;  %v6386_v20 = vld [vmem:[%s9083_s1 + $0xf28] ss:$16 sps:$4 sm:$0xff]  }
 0x1ac   :  { %3466 = vmatprep.subr.bf16.mxu0 %v6301_v21  ;;  %3794 = vmatprep.subr.bf16.mxu1 %v6304_v23  ;;  %v6391_v21 = vld [vmem:[%s9083_s1 + $0xf44] ss:$16 sps:$4 sm:$0xff]   ;;  %v6394_v23 = vld [vmem:[%s9083_s1 + $0xf4c] ss:$16 sps:$4 sm:$0xff]  }
 0x1af   :  { %3467 = vmatpush1.bf16.msra.mxu0 %v6299_v19  ;;  %3795 = vmatpush1.bf16.msra.mxu1 %v6302_v25  ;;  %v6389_v19 = vld [vmem:[%s9083_s1 + $0xf40] ss:$16 sps:$4 sm:$0xff]   ;;  %v6392_v25 = vld [vmem:[%s9083_s1 + $0xf48] ss:$16 sps:$4 sm:$0xff]  }
 0x1b0   :  { %3468 = vmatprep.subr.bf16.mxu0 %v6307_v12  ;;  %3796 = vmatprep.subr.bf16.mxu1 %v6310_v27  ;;  %v6397_v12 = vld [vmem:[%s9083_s1 + $0xf64] ss:$16 sps:$4 sm:$0xff]   ;;  %v6400_v27 = vld [vmem:[%s9083_s1 + $0xf6c] ss:$16 sps:$4 sm:$0xff]  }
 0x1b3   :  { %3469 = vmatpush1.bf16.msra.mxu0 %v6305_v28  ;;  %3797 = vmatpush1.bf16.msra.mxu1 %v6308_v30  ;;  %v6395_v28 = vld [vmem:[%s9083_s1 + $0xf60] ss:$16 sps:$4 sm:$0xff]   ;;  %v6398_v30 = vld [vmem:[%s9083_s1 + $0xf68] ss:$16 sps:$4 sm:$0xff]  }
 0x1b4   :  { %3470 = vmatprep.subr.bf16.mxu0 %v6313_v31  ;;  %3798 = vmatprep.subr.bf16.mxu1 %v6316_v22  ;;  %v6403_v31 = vld [vmem:[%s9083_s1 + $0xf84] ss:$16 sps:$4 sm:$0xff]   ;;  %v6406_v22 = vld [vmem:[%s9083_s1 + $0xf8c] ss:$16 sps:$4 sm:$0xff]  }
 0x1b7   :  { %3471 = vmatpush1.bf16.msra.mxu0 %v6311_v32  ;;  %3799 = vmatpush1.bf16.msra.mxu1 %v6314_v33  ;;  %v6401_v32 = vld [vmem:[%s9083_s1 + $0xf80] ss:$16 sps:$4 sm:$0xff]   ;;  %v6404_v33 = vld [vmem:[%s9083_s1 + $0xf88] ss:$16 sps:$4 sm:$0xff]  }
 0x1b8   :  { %3472 = vmatprep.subr.bf16.mxu0 %v6319_v26  ;;  %3800 = vmatprep.subr.bf16.mxu1 %v6322_v36  ;;  %v6409_v26 = vld [vmem:[%s9083_s1 + $0xfa4] ss:$16 sps:$4 sm:$0xff]   ;;  %v6412_v36 = vld [vmem:[%s9083_s1 + $0xfac] ss:$16 sps:$4 sm:$0xff]  }
 0x1bb   :  { %3473 = vmatpush1.bf16.msra.mxu0 %v6317_v24  ;;  %3801 = vmatpush1.bf16.msra.mxu1 %v6320_v37  ;;  %v6407_v24 = vld [vmem:[%s9083_s1 + $0xfa0] ss:$16 sps:$4 sm:$0xff]   ;;  %v6410_v37 = vld [vmem:[%s9083_s1 + $0xfa8] ss:$16 sps:$4 sm:$0xff]  }
 0x1bc   :  { %3474 = vmatprep.subr.bf16.mxu0 %v6325_v38  ;;  %3802 = vmatprep.subr.bf16.mxu1 %v6328_v40  ;;  %v6415_v38 = vld [vmem:[%s9083_s1 + $0xfc4] ss:$16 sps:$4 sm:$0xff]   ;;  %v6418_v40 = vld [vmem:[%s9083_s1 + $0xfcc] ss:$16 sps:$4 sm:$0xff]  }
 0x1bf   :  { %3475 = vmatpush1.bf16.msra.mxu0 %v6323_v29  ;;  %3803 = vmatpush1.bf16.msra.mxu1 %v6326_v42  ;;  %v6416_v29 = vld [vmem:[%s9083_s1 + $0xfc8] ss:$16 sps:$4 sm:$0xff]   ;;  %v6421_v42 = vld [vmem:[%s9083_s1 + $0xfe4] ss:$16 sps:$4 sm:$0xff]  }
 0x1c0   :  { %3485 = vmatprep.subr.bf16.mxu0 %v6331_v44  ;;  %3813 = vmatprep.subr.bf16.mxu1 %v6334_v35  ;;  %v6424_v44 = vld [vmem:[%s9083_s1 + $0xfec] ss:$16 sps:$4 sm:$0xff]  }
 0x1c1   :  { %v3898_v35 = vld [vmem:[%s9085_s3 + $0x8] sm:$0xff] }
 0x1c2   :  { %3477 = vmatmul.mubr.bf16.vlgmr.msra.gmra.mrb[0].mxu0 %v7690_v39  ;;  %3805 = vmatmul.mubr.bf16.vlgmr.msra.gmra.mrb[0].mxu1 %v7690_v39  ;;  %v6346_v39 = vld [vmem:[%s9083_s1 + $0xe4c] ss:$16 sps:$4 sm:$0xff]  }
 0x1c3   :  { %3486 = vmatpush1.bf16.msra.mxu0 %v6329_v46  ;;  %3814 = vmatpush1.bf16.msra.mxu1 %v6332_v47  ;;  %v3902_v46 = vld [vmem:[%s9085_s3 + $0x28] sm:$0xff]  ;;  %v3900_v47 = vld [vmem:[%s9085_s3 + $0x18] sm:$0xff] }
 0x1c4   :  { %3487 = vmatprep.subr.bf16.mxu0 %v6337_v34  ;;  %3815 = vmatprep.subr.bf16.mxu1 %v6340_v49  ;;  %v3904_v34 = vld [vmem:[%s9085_s3 + $0x38] sm:$0xff]  ;;  %v6419_v49 = vld [vmem:[%s9083_s1 + $0xfe0] ss:$16 sps:$4 sm:$0xff]  }
 0x1c5   :  { %3517 = vmatprep.mubr.bf16.mxu0 %v621_v48  ;;  %3845 = vmatprep.mubr.bf16.mxu1 %v621_v48  ;;  %v6422_v48 = vld [vmem:[%s9083_s1 + $0xfe8] ss:$16 sps:$4 sm:$0xff]  }
 0x1c7   :  { %3488 = vmatpush1.bf16.msra.mxu0 %v6335_v50  ;;  %3816 = vmatpush1.bf16.msra.mxu1 %v6338_v51  ;;  %v3897_v50 = vld [vmem:[%s9085_s3] sm:$0xff] }
 0x1c8   :  { %3489 = vmatprep.subr.bf16.mxu0 %v6343_v52  ;;  %3817 = vmatprep.subr.bf16.mxu1 %v6346_v39  ;;  %v3901_v51 = vld [vmem:[%s9085_s3 + $0x20] sm:$0xff]  ;;  %v5269_v52 = vpack.c.bf16 %v3902_v46, %v3898_v35  ;;  %v5397_v39 = vpack.c.bf16 %v3904_v34, %v3900_v47  ;;  %v3944_v35 = vld [vmem:[%s9085_s3 + $0x178] sm:$0xff] }
 0x1c9   :  { %v3937_v34 = vld [vmem:[%s9085_s3 + $0x140] sm:$0xff] }
 0x1cb   :  { %3490 = vmatpush1.bf16.msra.mxu0 %v6341_v53  ;;  %3818 = vmatpush1.bf16.msra.mxu1 %v6344_v54  ;;  %v3899_v53 = vld [vmem:[%s9085_s3 + $0x10] sm:$0xff] }
 0x1cc   :  { %3491 = vmatprep.subr.bf16.mxu0 %v6349_v55  ;;  %3819 = vmatprep.subr.bf16.mxu1 %v6352_v56  ;;  %v3903_v54 = vld [vmem:[%s9085_s3 + $0x30] sm:$0xff]  ;;  %v3906_v55 = vld [vmem:[%s9085_s3 + $0x48] sm:$0xff] }
 0x1cd   :  { %v3910_v56 = vld [vmem:[%s9085_s3 + $0x68] sm:$0xff] }
 0x1cf   :  { %3492 = vmatpush1.bf16.msra.mxu0 %v6347_v57  ;;  %3820 = vmatpush1.bf16.msra.mxu1 %v6350_v58  ;;  %v3908_v57 = vld [vmem:[%s9085_s3 + $0x58] sm:$0xff] }
 0x1d0   :  { %3493 = vmatprep.subr.bf16.mxu0 %v6355_v59  ;;  %3821 = vmatprep.subr.bf16.mxu1 %v6358_v60  ;;  %v3912_v58 = vld [vmem:[%s9085_s3 + $0x78] sm:$0xff]  ;;  %v5271_v59 = vpack.c.bf16 %v3901_v51, %v3897_v50  ;;  %v5399_v60 = vpack.c.bf16 %v3903_v54, %v3899_v53  ;;  %v3939_v51 = vld [vmem:[%s9085_s3 + $0x150] sm:$0xff]  ;;  %v3950_v53 = vld [vmem:[%s9085_s3 + $0x1a8] sm:$0xff] }
 0x1d1   :  { %v3948_v54 = vld [vmem:[%s9085_s3 + $0x198] sm:$0xff] }
 0x1d3   :  { %3494 = vmatpush1.bf16.msra.mxu0 %v6353_v61  ;;  %3822 = vmatpush1.bf16.msra.mxu1 %v6356_v62  ;;  %v3905_v61 = vld [vmem:[%s9085_s3 + $0x40] sm:$0xff] }
 0x1d4   :  { %3495 = vmatprep.subr.bf16.mxu0 %v6361_v63  ;;  %3823 = vmatprep.subr.bf16.mxu1 %v6364_v0  ;;  %v3909_v62 = vld [vmem:[%s9085_s3 + $0x60] sm:$0xff]  ;;  %v5273_v63 = vpack.c.bf16 %v3910_v56, %v3906_v55  ;;  %v5401_v0 = vpack.c.bf16 %v3912_v58, %v3908_v57  ;;  %v3952_v55 = vld [vmem:[%s9085_s3 + $0x1b8] sm:$0xff] }
 0x1d5   :  { %v3945_v58 = vld [vmem:[%s9085_s3 + $0x180] sm:$0xff] }
 0x1d7   :  { %3496 = vmatpush1.bf16.msra.mxu0 %v6359_v1  ;;  %3824 = vmatpush1.bf16.msra.mxu1 %v6362_v2  ;;  %v3907_v1 = vld [vmem:[%s9085_s3 + $0x50] sm:$0xff] }
 0x1d8   :  { %3497 = vmatprep.subr.bf16.mxu0 %v6367_v3  ;;  %3825 = vmatprep.subr.bf16.mxu1 %v6370_v4  ;;  %v3911_v2 = vld [vmem:[%s9085_s3 + $0x70] sm:$0xff]  ;;  %v3914_v3 = vld [vmem:[%s9085_s3 + $0x88] sm:$0xff] }
 0x1d9   :  { %v3918_v4 = vld [vmem:[%s9085_s3 + $0xa8] sm:$0xff] }
 0x1db   :  { %3498 = vmatpush1.bf16.msra.mxu0 %v6365_v5  ;;  %3826 = vmatpush1.bf16.msra.mxu1 %v6368_v6  ;;  %v3916_v5 = vld [vmem:[%s9085_s3 + $0x98] sm:$0xff] }
 0x1dc   :  { %3499 = vmatprep.subr.bf16.mxu0 %v6373_v7  ;;  %3827 = vmatprep.subr.bf16.mxu1 %v6376_v8  ;;  %v3920_v6 = vld [vmem:[%s9085_s3 + $0xb8] sm:$0xff]  ;;  %v5275_v7 = vpack.c.bf16 %v3909_v62, %v3905_v61  ;;  %v5403_v8 = vpack.c.bf16 %v3911_v2, %v3907_v1  ;;  %v5421_v61 = vpack.c.bf16 %v3952_v55, %v3948_v54  ;;  %v3947_v62 = vld [vmem:[%s9085_s3 + $0x190] sm:$0xff]  ;;  %v3958_v1 = vld [vmem:[%s9085_s3 + $0x1e8] sm:$0xff] }
 0x1dd   :  { %v3956_v2 = vld [vmem:[%s9085_s3 + $0x1d8] sm:$0xff]  ;;  %v3985_v55 = vld [vmem:[%s9085_s3 + $0x2c0] sm:$0xff] }
 0x1df   :  { %3500 = vmatpush1.bf16.msra.mxu0 %v6371_v9  ;;  %3828 = vmatpush1.bf16.msra.mxu1 %v6374_v10  ;;  %v3913_v9 = vld [vmem:[%s9085_s3 + $0x80] sm:$0xff] }
 0x1e0   :  { %3501 = vmatprep.subr.bf16.mxu0 %v6379_v11  ;;  %3829 = vmatprep.subr.bf16.mxu1 %v6382_v13  ;;  %v3917_v10 = vld [vmem:[%s9085_s3 + $0xa0] sm:$0xff]  ;;  %v5277_v11 = vpack.c.bf16 %v3918_v4, %v3914_v3  ;;  %v5405_v13 = vpack.c.bf16 %v3920_v6, %v3916_v5  ;;  %v3960_v3 = vld [vmem:[%s9085_s3 + $0x1f8] sm:$0xff] }
 0x1e1   :  { %v3953_v6 = vld [vmem:[%s9085_s3 + $0x1c0] sm:$0xff] }
 0x1e3   :  { %3502 = vmatpush1.bf16.msra.mxu0 %v6377_v14  ;;  %3830 = vmatpush1.bf16.msra.mxu1 %v6380_v15  ;;  %v3919_v14 = vld [vmem:[%s9085_s3 + $0xb0] sm:$0xff]  ;;  %v3922_v15 = vld [vmem:[%s9085_s3 + $0xc8] sm:$0xff] }
 0x1e4   :  { %3503 = vmatprep.subr.bf16.mxu0 %v6385_v16  ;;  %3831 = vmatprep.subr.bf16.mxu1 %v6388_v17  ;;  %v3926_v16 = vld [vmem:[%s9085_s3 + $0xe8] sm:$0xff]  ;;  %v3924_v17 = vld [vmem:[%s9085_s3 + $0xd8] sm:$0xff] }
 0x1e7   :  { %3504 = vmatpush1.bf16.msra.mxu0 %v6383_v18  ;;  %3832 = vmatpush1.bf16.msra.mxu1 %v6386_v20  ;;  %v3928_v18 = vld [vmem:[%s9085_s3 + $0xf8] sm:$0xff]  ;;  %v5279_v20 = vpack.c.bf16 %v3917_v10, %v3913_v9  ;;  %v5425_v9 = vpack.c.bf16 %v3960_v3, %v3956_v2  ;;  %v3955_v10 = vld [vmem:[%s9085_s3 + $0x1d0] sm:$0xff]  ;;  %v3993_v3 = vld [vmem:[%s9085_s3 + $0x300] sm:$0xff] }
 0x1e8   :  { %3505 = vmatprep.subr.bf16.mxu0 %v6391_v21  ;;  %3833 = vmatprep.subr.bf16.mxu1 %v6394_v23  ;;  %v3921_v23 = vld [vmem:[%s9085_s3 + $0xc0] sm:$0xff] }
 0x1eb   :  { %3506 = vmatpush1.bf16.msra.mxu0 %v6389_v19  ;;  %3834 = vmatpush1.bf16.msra.mxu1 %v6392_v25  ;;  %v3925_v19 = vld [vmem:[%s9085_s3 + $0xe0] sm:$0xff]  ;;  %v5281_v25 = vpack.c.bf16 %v3926_v16, %v3922_v15  ;;  %v3968_v15 = vld [vmem:[%s9085_s3 + $0x238] sm:$0xff] }
 0x1ec   :  { %3507 = vmatprep.subr.bf16.mxu0 %v6397_v12  ;;  %3835 = vmatprep.subr.bf16.mxu1 %v6400_v27  ;;  %v5409_v12 = vpack.c.bf16 %v3928_v18, %v3924_v17  ;;  %v3923_v27 = vld [vmem:[%s9085_s3 + $0xd0] sm:$0xff]  ;;  %v3961_v18 = vld [vmem:[%s9085_s3 + $0x200] sm:$0xff] }
 0x1ef   :  { %3508 = vmatpush1.bf16.msra.mxu0 %v6395_v28  ;;  %3836 = vmatpush1.bf16.msra.mxu1 %v6398_v30  ;;  %v3927_v28 = vld [vmem:[%s9085_s3 + $0xf0] sm:$0xff]  ;;  %v3930_v30 = vld [vmem:[%s9085_s3 + $0x108] sm:$0xff] }
 0x1f0   :  { %3509 = vmatprep.subr.bf16.mxu0 %v6403_v31  ;;  %3837 = vmatprep.subr.bf16.mxu1 %v6406_v22  ;;  %v3934_v31 = vld [vmem:[%s9085_s3 + $0x128] sm:$0xff]  ;;  %v3932_v22 = vld [vmem:[%s9085_s3 + $0x118] sm:$0xff] }
 0x1f3   :  { %3510 = vmatpush1.bf16.msra.mxu0 %v6401_v32  ;;  %3838 = vmatpush1.bf16.msra.mxu1 %v6404_v33  ;;  %v3936_v32 = vld [vmem:[%s9085_s3 + $0x138] sm:$0xff]  ;;  %v5283_v33 = vpack.c.bf16 %v3925_v19, %v3921_v23  ;;  %v3963_v19 = vld [vmem:[%s9085_s3 + $0x210] sm:$0xff] }
 0x1f4   :  { %3511 = vmatprep.subr.bf16.mxu0 %v6409_v26  ;;  %3839 = vmatprep.subr.bf16.mxu1 %v6412_v36  ;;  %v5411_v26 = vpack.c.bf16 %v3927_v28, %v3923_v27  ;;  %v3929_v36 = vld [vmem:[%s9085_s3 + $0x100] sm:$0xff]  ;;  %v3974_v27 = vld [vmem:[%s9085_s3 + $0x268] sm:$0xff]  ;;  %v3972_v28 = vld [vmem:[%s9085_s3 + $0x258] sm:$0xff] }
 0x1f7   :  { %3512 = vmatpush1.bf16.msra.mxu0 %v6407_v24  ;;  %3840 = vmatpush1.bf16.msra.mxu1 %v6410_v37  ;;  %v3933_v24 = vld [vmem:[%s9085_s3 + $0x120] sm:$0xff]  ;;  %v5285_v37 = vpack.c.bf16 %v3934_v31, %v3930_v30  ;;  %v3976_v30 = vld [vmem:[%s9085_s3 + $0x278] sm:$0xff] }
 0x1f8   :  { %3513 = vmatprep.subr.bf16.mxu0 %v6415_v38  ;;  %3841 = vmatprep.subr.bf16.mxu1 %v6418_v40  ;;  %v5413_v38 = vpack.c.bf16 %v3936_v32, %v3932_v22  ;;  %v3931_v40 = vld [vmem:[%s9085_s3 + $0x110] sm:$0xff]  ;;  %v5287_v46 = vpack.c.bf16 %v3933_v24, %v3929_v36  ;;  %v3969_v32 = vld [vmem:[%s9085_s3 + $0x240] sm:$0xff]  ;;  %v5433_v36 = vpack.c.bf16 %v3976_v30, %v3972_v28  ;;  %v4016_v28 = vld [vmem:[%s9085_s3 + $0x3b8] sm:$0xff] }
 0x1f9   :  { %v3971_v24 = vld [vmem:[%s9085_s3 + $0x250] sm:$0xff]  ;;  %v4009_v30 = vld [vmem:[%s9085_s3 + $0x380] sm:$0xff] }
 0x1fb   :  { %3514 = vmatpush1.bf16.msra.mxu0 %v6413_v41  ;;  %3842 = vmatpush1.bf16.msra.mxu1 %v6416_v29  ;;  %v3935_v41 = vld [vmem:[%s9085_s3 + $0x130] sm:$0xff]  ;;  %v3938_v29 = vld [vmem:[%s9085_s3 + $0x148] sm:$0xff] }
 0x1fc   :  { %3515 = vmatprep.subr.bf16.mxu0 %v6421_v42  ;;  %3843 = vmatprep.subr.bf16.mxu1 %v6424_v44  ;;  %v3942_v42 = vld [vmem:[%s9085_s3 + $0x168] sm:$0xff]  ;;  %v3940_v44 = vld [vmem:[%s9085_s3 + $0x158] sm:$0xff]  ;;  %v5415_v47 = vpack.c.bf16 %v3935_v41, %v3931_v40 }
 0x1fd   :  { %v5417_v50 = vpack.c.bf16 %v3944_v35, %v3940_v44  ;;  %v3982_v40 = vld [vmem:[%s9085_s3 + $0x2a8] sm:$0xff]  ;;  %v3980_v41 = vld [vmem:[%s9085_s3 + $0x298] sm:$0xff]  ;;  %v3977_v35 = vld [vmem:[%s9085_s3 + $0x280] sm:$0xff] }
 0x1ff   :  { %3516 = vmatpush1.bf16.msra.mxu0 %v6419_v49  ;;  %3844 = vmatpush1.bf16.msra.mxu1 %v6422_v48  ;;  %v3941_v49 = vld [vmem:[%s9085_s3 + $0x160] sm:$0xff]  ;;  %v5289_v48 = vpack.c.bf16 %v3942_v42, %v3938_v29  ;;  %v3984_v29 = vld [vmem:[%s9085_s3 + $0x2b8] sm:$0xff] }
 0x200   :  { %5270 = vmatprep.subr.bf16.mxu0 %v5269_v52  ;;  %5398 = vmatprep.subr.bf16.mxu1 %v5397_v39  ;;  %v3943_v52 = vld [vmem:[%s9085_s3 + $0x170] sm:$0xff]  ;;  %v3946_v39 = vld [vmem:[%s9085_s3 + $0x188] sm:$0xff]  ;;  %v5291_v56 = vpack.c.bf16 %v3941_v49, %v3937_v34  ;;  %v5437_v34 = vpack.c.bf16 %v3984_v29, %v3980_v41  ;;  %v4024_v29 = vld [vmem:[%s9085_s3 + $0x3f8] sm:$0xff] }
 0x201   :  { %v5419_v57 = vpack.c.bf16 %v3943_v52, %v3939_v51  ;;  %v3979_v49 = vld [vmem:[%s9085_s3 + $0x290] sm:$0xff]  ;;  %v3990_v51 = vld [vmem:[%s9085_s3 + $0x2e8] sm:$0xff]  ;;  %v3988_v52 = vld [vmem:[%s9085_s3 + $0x2d8] sm:$0xff] }
 0x202   :  { %3518 = vmatmul.mubr.bf16.vlgmr.msra.gmra.mrb[0].mxu0 %v7891_v45  ;;  %3846 = vmatmul.mubr.bf16.vlgmr.msra.gmra.mrb[0].mxu1 %v7891_v45  ;;  %v3915_v45 = vld [vmem:[%s9085_s3 + $0x90] sm:$0xff] }
 0x203   :  { %5272 = vmatpush1.bf16.msra.mxu0 %v5271_v59  ;;  %5400 = vmatpush1.bf16.msra.mxu1 %v5399_v60  ;;  %v5407_v21 = vpack.c.bf16 %v3919_v14, %v3915_v45  ;;  %v3949_v59 = vld [vmem:[%s9085_s3 + $0x1a0] sm:$0xff]  ;;  %v5293_v60 = vpack.c.bf16 %v3950_v53, %v3946_v39  ;;  %v3966_v45 = vld [vmem:[%s9085_s3 + $0x228] sm:$0xff]  ;;  %v3964_v14 = vld [vmem:[%s9085_s3 + $0x218] sm:$0xff] }
 0x204   :  { %5274 = vmatprep.subr.bf16.mxu0 %v5273_v63  ;;  %5402 = vmatprep.subr.bf16.mxu1 %v5401_v0  ;;  %v3951_v63 = vld [vmem:[%s9085_s3 + $0x1b0] sm:$0xff]  ;;  %v3954_v0 = vld [vmem:[%s9085_s3 + $0x1c8] sm:$0xff]  ;;  %v5295_v4 = vpack.c.bf16 %v3949_v59, %v3945_v58  ;;  %v5429_v23 = vpack.c.bf16 %v3968_v15, %v3964_v14  ;;  %v3992_v39 = vld [vmem:[%s9085_s3 + $0x2f8] sm:$0xff] }
 0x205   :  { %v5423_v5 = vpack.c.bf16 %v3951_v63, %v3947_v62  ;;  %v5441_v58 = vpack.c.bf16 %v3992_v39, %v3988_v52  ;;  %v3987_v59 = vld [vmem:[%s9085_s3 + $0x2d0] sm:$0xff]  ;;  %v3998_v62 = vld [vmem:[%s9085_s3 + $0x328] sm:$0xff]  ;;  %v3996_v63 = vld [vmem:[%s9085_s3 + $0x318] sm:$0xff] }
 0x206   :  { %v4001_v15 = vld [vmem:[%s9085_s3 + $0x340] sm:$0xff]  ;;  %v4032_v39 = vld [vmem:[%s9085_s3 + $0x438] sm:$0xff] }
 0x207   :  { %5276 = vmatpush1.bf16.msra.mxu0 %v5275_v7  ;;  %5404 = vmatpush1.bf16.msra.mxu1 %v5403_v8  ;;  %v3957_v7 = vld [vmem:[%s9085_s3 + $0x1e0] sm:$0xff]  ;;  %v5297_v8 = vpack.c.bf16 %v3958_v1, %v3954_v0  ;;  %v4000_v0 = vld [vmem:[%s9085_s3 + $0x338] sm:$0xff] }
 0x208   :  { %5278 = vmatprep.subr.bf16.mxu0 %v5277_v11  ;;  %5406 = vmatprep.subr.bf16.mxu1 %v5405_v13  ;;  %v3959_v11 = vld [vmem:[%s9085_s3 + $0x1f0] sm:$0xff]  ;;  %v3962_v13 = vld [vmem:[%s9085_s3 + $0x208] sm:$0xff]  ;;  %v5299_v16 = vpack.c.bf16 %v3957_v7, %v3953_v6  ;;  %v5445_v6 = vpack.c.bf16 %v4000_v0, %v3996_v63 }
 0x209   :  { %v5427_v17 = vpack.c.bf16 %v3959_v11, %v3955_v10  ;;  %v3995_v7 = vld [vmem:[%s9085_s3 + $0x310] sm:$0xff]  ;;  %v4006_v10 = vld [vmem:[%s9085_s3 + $0x368] sm:$0xff]  ;;  %v4004_v11 = vld [vmem:[%s9085_s3 + $0x358] sm:$0xff] }
 0x20b   :  { %5280 = vmatpush1.bf16.msra.mxu0 %v5279_v20  ;;  %5408 = vmatpush1.bf16.msra.mxu1 %v5407_v21  ;;  %v3965_v20 = vld [vmem:[%s9085_s3 + $0x220] sm:$0xff]  ;;  %v5301_v21 = vpack.c.bf16 %v3966_v45, %v3962_v13  ;;  %v4008_v13 = vld [vmem:[%s9085_s3 + $0x378] sm:$0xff] }
 0x20c   :  { %5282 = vmatprep.subr.bf16.mxu0 %v5281_v25  ;;  %5410 = vmatprep.subr.bf16.mxu1 %v5409_v12  ;;  %v3967_v25 = vld [vmem:[%s9085_s3 + $0x230] sm:$0xff]  ;;  %v3970_v12 = vld [vmem:[%s9085_s3 + $0x248] sm:$0xff]  ;;  %v5303_v31 = vpack.c.bf16 %v3965_v20, %v3961_v18  ;;  %v4005_v18 = vld [vmem:[%s9085_s3 + $0x360] sm:$0xff] }
 0x20d   :  { %v5431_v22 = vpack.c.bf16 %v3967_v25, %v3963_v19  ;;  %v4003_v20 = vld [vmem:[%s9085_s3 + $0x350] sm:$0xff]  ;;  %v4010_v25 = vld [vmem:[%s9085_s3 + $0x388] sm:$0xff] }
 0x20f   :  { %5284 = vmatpush1.bf16.msra.mxu0 %v5283_v33  ;;  %5412 = vmatpush1.bf16.msra.mxu1 %v5411_v26  ;;  %v3973_v33 = vld [vmem:[%s9085_s3 + $0x260] sm:$0xff]  ;;  %v5305_v26 = vpack.c.bf16 %v3974_v27, %v3970_v12  ;;  %v4014_v12 = vld [vmem:[%s9085_s3 + $0x3a8] sm:$0xff]  ;;  %v4012_v27 = vld [vmem:[%s9085_s3 + $0x398] sm:$0xff] }
 0x210   :  { %5286 = vmatprep.subr.bf16.mxu0 %v5285_v37  ;;  %5414 = vmatprep.subr.bf16.mxu1 %v5413_v38  ;;  %v3975_v37 = vld [vmem:[%s9085_s3 + $0x270] sm:$0xff]  ;;  %v3978_v38 = vld [vmem:[%s9085_s3 + $0x288] sm:$0xff]  ;;  %v5307_v42 = vpack.c.bf16 %v3973_v33, %v3969_v32  ;;  %v4013_v32 = vld [vmem:[%s9085_s3 + $0x3a0] sm:$0xff] }
 0x211   :  { %v5435_v44 = vpack.c.bf16 %v3975_v37, %v3971_v24  ;;  %v4011_v33 = vld [vmem:[%s9085_s3 + $0x390] sm:$0xff]  ;;  %v4018_v37 = vld [vmem:[%s9085_s3 + $0x3c8] sm:$0xff] }
 0x213   :  { %5288 = vmatpush1.bf16.msra.mxu0 %v5287_v46  ;;  %5416 = vmatpush1.bf16.msra.mxu1 %v5415_v47  ;;  %v3981_v46 = vld [vmem:[%s9085_s3 + $0x2a0] sm:$0xff]  ;;  %v5309_v47 = vpack.c.bf16 %v3982_v40, %v3978_v38  ;;  %v4022_v38 = vld [vmem:[%s9085_s3 + $0x3e8] sm:$0xff]  ;;  %v4020_v40 = vld [vmem:[%s9085_s3 + $0x3d8] sm:$0xff] }
 0x214   :  { %5290 = vmatprep.subr.bf16.mxu0 %v5289_v48  ;;  %5418 = vmatprep.subr.bf16.mxu1 %v5417_v50  ;;  %v3983_v48 = vld [vmem:[%s9085_s3 + $0x2b0] sm:$0xff]  ;;  %v3986_v50 = vld [vmem:[%s9085_s3 + $0x2c8] sm:$0xff]  ;;  %v5311_v53 = vpack.c.bf16 %v3981_v46, %v3977_v35  ;;  %v5329_v41 = vpack.c.bf16 %v4022_v38, %v4018_v37  ;;  %v5457_v35 = vpack.c.bf16 %v4024_v29, %v4020_v40  ;;  %v4048_v37 = vld [vmem:[%s9085_s3 + $0x4b8] sm:$0xff] }
 0x215   :  { %v5439_v54 = vpack.c.bf16 %v3983_v48, %v3979_v49  ;;  %v4026_v48 = vld [vmem:[%s9085_s3 + $0x408] sm:$0xff]  ;;  %v4041_v29 = vld [vmem:[%s9085_s3 + $0x480] sm:$0xff] }
 0x217   :  { %5292 = vmatpush1.bf16.msra.mxu0 %v5291_v56  ;;  %5420 = vmatpush1.bf16.msra.mxu1 %v5419_v57  ;;  %v3989_v56 = vld [vmem:[%s9085_s3 + $0x2e0] sm:$0xff]  ;;  %v5313_v57 = vpack.c.bf16 %v3990_v51, %v3986_v50  ;;  %v4030_v50 = vld [vmem:[%s9085_s3 + $0x428] sm:$0xff]  ;;  %v4028_v51 = vld [vmem:[%s9085_s3 + $0x418] sm:$0xff] }
 0x218   :  { %5294 = vmatprep.subr.bf16.mxu0 %v5293_v60  ;;  %5422 = vmatprep.subr.bf16.mxu1 %v5421_v61  ;;  %v3991_v60 = vld [vmem:[%s9085_s3 + $0x2f0] sm:$0xff]  ;;  %v3994_v61 = vld [vmem:[%s9085_s3 + $0x308] sm:$0xff]  ;;  %v5315_v1 = vpack.c.bf16 %v3989_v56, %v3985_v55  ;;  %v5333_v52 = vpack.c.bf16 %v4030_v50, %v4026_v48  ;;  %v3879_v55 = vsub.s32 1, %v6584_v43  ;;  %v3883_v56 = vsub.s32 2, %v6584_v43  ;;  %v4052_v48 = vld [vmem:[%s9085_s3 + $0x4d8] sm:$0xff] }
 0x219   :  { %v5443_v2 = vpack.c.bf16 %v3991_v60, %v3987_v59  ;;  %v4056_v50 = vld [vmem:[%s9085_s3 + $0x4f8] sm:$0xff] }
 0x21b   :  { %5296 = vmatpush1.bf16.msra.mxu0 %v5295_v4  ;;  %5424 = vmatpush1.bf16.msra.mxu1 %v5423_v5  ;;  %v3997_v4 = vld [vmem:[%s9085_s3 + $0x320] sm:$0xff]  ;;  %v5317_v5 = vpack.c.bf16 %v3998_v62, %v3994_v61 }
 0x21c   :  { %5298 = vmatprep.subr.bf16.mxu0 %v5297_v8  ;;  %5426 = vmatprep.subr.bf16.mxu1 %v5425_v9  ;;  %v3999_v8 = vld [vmem:[%s9085_s3 + $0x330] sm:$0xff]  ;;  %v4002_v9 = vld [vmem:[%s9085_s3 + $0x348] sm:$0xff]  ;;  %v5319_v45 = vpack.c.bf16 %v3997_v4, %v3993_v3 }
 0x21d   :  { %v5447_v14 = vpack.c.bf16 %v3999_v8, %v3995_v7 }
 0x21f   :  { %5300 = vmatpush1.bf16.msra.mxu0 %v5299_v16  ;;  %5428 = vmatpush1.bf16.msra.mxu1 %v5427_v17  ;;  %v5321_v16 = vpack.c.bf16 %v4006_v10, %v4002_v9  ;;  %v5449_v17 = vpack.c.bf16 %v4008_v13, %v4004_v11 }
 0x220   :  { %5302 = vmatprep.subr.bf16.mxu0 %v5301_v21  ;;  %5430 = vmatprep.subr.bf16.mxu1 %v5429_v23  ;;  %v4007_v21 = vld [vmem:[%s9085_s3 + $0x370] sm:$0xff]  ;;  %v5323_v23 = vpack.c.bf16 %v4005_v18, %v4001_v15  ;;  %v4034_v18 = vld [vmem:[%s9085_s3 + $0x448] sm:$0xff] }
 0x221   :  { %v5451_v19 = vpack.c.bf16 %v4007_v21, %v4003_v20  ;;  %v4027_v15 = vld [vmem:[%s9085_s3 + $0x410] sm:$0xff]  ;;  %v4038_v21 = vld [vmem:[%s9085_s3 + $0x468] sm:$0xff] }
 0x223   :  { %5304 = vmatpush1.bf16.msra.mxu0 %v5303_v31  ;;  %5432 = vmatpush1.bf16.msra.mxu1 %v5431_v22  ;;  %v5325_v31 = vpack.c.bf16 %v4014_v12, %v4010_v25  ;;  %v5453_v22 = vpack.c.bf16 %v4016_v28, %v4012_v27  ;;  %v4033_v28 = vld [vmem:[%s9085_s3 + $0x440] sm:$0xff] }
 0x224   :  { %5306 = vmatprep.subr.bf16.mxu0 %v5305_v26  ;;  %5434 = vmatprep.subr.bf16.mxu1 %v5433_v36  ;;  %v4015_v26 = vld [vmem:[%s9085_s3 + $0x3b0] sm:$0xff]  ;;  %v5327_v36 = vpack.c.bf16 %v4013_v32, %v4009_v30  ;;  %v4037_v30 = vld [vmem:[%s9085_s3 + $0x460] sm:$0xff]  ;;  %v4042_v32 = vld [vmem:[%s9085_s3 + $0x488] sm:$0xff] }
 0x225   :  { %v5455_v24 = vpack.c.bf16 %v4015_v26, %v4011_v33  ;;  %v5337_v33 = vpack.c.bf16 %v4038_v21, %v4034_v18  ;;  %v5339_v40 = vpack.c.bf16 %v4037_v30, %v4033_v28  ;;  %v4080_v28 = vld [vmem:[%s9085_s3 + $0x5b8] sm:$0xff] }
 0x227   :  { %5308 = vmatpush1.bf16.msra.mxu0 %v5307_v42  ;;  %5436 = vmatpush1.bf16.msra.mxu1 %v5435_v44  ;;  %v4017_v42 = vld [vmem:[%s9085_s3 + $0x3c0] sm:$0xff] }
 0x228   :  { %5310 = vmatprep.subr.bf16.mxu0 %v5309_v47  ;;  %5438 = vmatprep.subr.bf16.mxu1 %v5437_v34  ;;  %v4021_v44 = vld [vmem:[%s9085_s3 + $0x3e0] sm:$0xff]  ;;  %v4019_v47 = vld [vmem:[%s9085_s3 + $0x3d0] sm:$0xff] }
 0x229   :  { %v5331_v46 = vpack.c.bf16 %v4021_v44, %v4017_v42  ;;  %v4023_v34 = vld [vmem:[%s9085_s3 + $0x3f0] sm:$0xff]  ;;  %v4045_v42 = vld [vmem:[%s9085_s3 + $0x4a0] sm:$0xff] }
 0x22a   :  { %v5459_v49 = vpack.c.bf16 %v4023_v34, %v4019_v47  ;;  %v4047_v47 = vld [vmem:[%s9085_s3 + $0x4b0] sm:$0xff]  ;;  %v4050_v34 = vld [vmem:[%s9085_s3 + $0x4c8] sm:$0xff] }
 0x22b   :  { %5312 = vmatpush1.bf16.msra.mxu0 %v5311_v53  ;;  %5440 = vmatpush1.bf16.msra.mxu1 %v5439_v54  ;;  %v5461_v53 = vpack.c.bf16 %v4032_v39, %v4028_v51  ;;  %v3875_v54 = vsub.s32 0, %v6584_v43  ;;  %v5343_v51 = vpack.c.bf16 %v4045_v42, %v4041_v29  ;;  %v4049_v39 = vld [vmem:[%s9085_s3 + $0x4c0] sm:$0xff] }
 0x22c   :  { %5314 = vmatprep.subr.bf16.mxu0 %v5313_v57  ;;  %5442 = vmatprep.subr.bf16.mxu1 %v5441_v58  ;;  %v3887_v57 = vsub.s32 3, %v6584_v43  ;;  %v3871_v58 = vld [vmem:[%s9086_s2] sm:$0xf] }
 0x22d   :  { %v3876_v59 = vrot.slane %v3871_v58, %v3875_v54  ;;  %v3880_v60 = vrot.slane %v3871_v58, %v3879_v55  ;;  %v3884_v61 = vrot.slane %v3871_v58, %v3883_v56  ;;  %v5198_v43 = vld [vmem:[%s9089_s6] ss:$0 sm:$0xff] }
 0x22e   :  { %v3888_v62 = vrot.slane %v3871_v58, %v3887_v57 }
 0x22f   :  { %5316 = vmatpush1.bf16.msra.mxu0 %v5315_v1  ;;  %5444 = vmatpush1.bf16.msra.mxu1 %v5443_v2  ;;  %v3889_v1 = vcombine.low %v3876_v59, %v3880_v60  ;;  %v5473_v59 = vpack.c.bf16 %v4056_v50, %v4052_v48  ;;  %v4051_v60 = vld [vmem:[%s9085_s3 + $0x4d0] sm:$0xff]  ;;  %v4090_v48 = vld [vmem:[%s9085_s3 + $0x608] sm:$0xff] }
 0x230   :  { %5318 = vmatprep.subr.bf16.mxu0 %v5317_v5  ;;  %5446 = vmatprep.subr.bf16.mxu1 %v5445_v6  ;;  %v3890_v2 = vcombine.low %v3884_v61, %v3888_v62  ;;  %v4055_v61 = vld [vmem:[%s9085_s3 + $0x4f0] sm:$0xff]  ;;  %v4058_v62 = vld [vmem:[%s9085_s3 + $0x508] sm:$0xff] }
 0x231   :  { %v4094_v50 = vld [vmem:[%s9085_s3 + $0x628] sm:$0xff] }
 0x233   :  { %5320 = vmatpush1.bf16.msra.mxu0 %v5319_v45  ;;  %5448 = vmatpush1.bf16.msra.mxu1 %v5447_v14  ;;  %v4025_v45 = vld [vmem:[%s9085_s3 + $0x400] sm:$0xff] }
 0x234   :  { %5322 = vmatprep.subr.bf16.mxu0 %v5321_v16  ;;  %5450 = vmatprep.subr.bf16.mxu1 %v5449_v17  ;;  %v4029_v14 = vld [vmem:[%s9085_s3 + $0x420] sm:$0xff]  ;;  %v4031_v16 = vld [vmem:[%s9085_s3 + $0x430] sm:$0xff] }
 0x235   :  { %v5335_v12 = vpack.c.bf16 %v4029_v14, %v4025_v45  ;;  %v5463_v27 = vpack.c.bf16 %v4031_v16, %v4027_v15  ;;  %v4072_v45 = vld [vmem:[%s9085_s3 + $0x578] sm:$0xff]  ;;  %v4065_v16 = vld [vmem:[%s9085_s3 + $0x540] sm:$0xff] }
 0x237   :  { %5324 = vmatpush1.bf16.msra.mxu0 %v5323_v23  ;;  %5452 = vmatpush1.bf16.msra.mxu1 %v5451_v19  ;;  %v4036_v23 = vld [vmem:[%s9085_s3 + $0x458] sm:$0xff] }
 0x238   :  { %5326 = vmatprep.subr.bf16.mxu0 %v5325_v31  ;;  %5454 = vmatprep.subr.bf16.mxu1 %v5453_v22  ;;  %v4040_v19 = vld [vmem:[%s9085_s3 + $0x478] sm:$0xff]  ;;  %v4035_v31 = vld [vmem:[%s9085_s3 + $0x450] sm:$0xff] }
 0x239   :  { %v4039_v22 = vld [vmem:[%s9085_s3 + $0x470] sm:$0xff]  ;;  %v5465_v26 = vpack.c.bf16 %v4040_v19, %v4036_v23 }
 0x23a   :  { %v4067_v23 = vld [vmem:[%s9085_s3 + $0x550] sm:$0xff] }
 0x23b   :  { %5328 = vmatpush1.bf16.msra.mxu0 %v5327_v36  ;;  %5456 = vmatpush1.bf16.msra.mxu1 %v5455_v24  ;;  %v4046_v36 = vld [vmem:[%s9085_s3 + $0x4a8] sm:$0xff]  ;;  %v4044_v24 = vld [vmem:[%s9085_s3 + $0x498] sm:$0xff]  ;;  %v4071_v19 = vld [vmem:[%s9085_s3 + $0x570] sm:$0xff] }
 0x23c   :  { %5330 = vmatprep.subr.bf16.mxu0 %v5329_v41  ;;  %5458 = vmatprep.subr.bf16.mxu1 %v5457_v35  ;;  %v5467_v41 = vpack.c.bf16 %v4039_v22, %v4035_v31  ;;  %v5341_v44 = vpack.c.bf16 %v4046_v36, %v4042_v32  ;;  %v5469_v35 = vpack.c.bf16 %v4048_v37, %v4044_v24  ;;  %v4073_v22 = vld [vmem:[%s9085_s3 + $0x580] sm:$0xff]  ;;  %v4075_v36 = vld [vmem:[%s9085_s3 + $0x590] sm:$0xff]  ;;  %v4082_v37 = vld [vmem:[%s9085_s3 + $0x5c8] sm:$0xff] }
 0x23d   :  { %v5483_v31 = vpack.c.bf16 %v4071_v19, %v4067_v23  ;;  %v4077_v32 = vld [vmem:[%s9085_s3 + $0x5a0] sm:$0xff]  ;;  %v4079_v24 = vld [vmem:[%s9085_s3 + $0x5b0] sm:$0xff] }
 0x23e   :  { %v5359_v29 = vpack.c.bf16 %v4077_v32, %v4073_v22  ;;  %v5487_v42 = vpack.c.bf16 %v4079_v24, %v4075_v36 }
 0x23f   :  { %5332 = vmatpush1.bf16.msra.mxu0 %v5331_v46  ;;  %5460 = vmatpush1.bf16.msra.mxu1 %v5459_v49  ;;  %v4043_v46 = vld [vmem:[%s9085_s3 + $0x490] sm:$0xff]  ;;  %v4054_v49 = vld [vmem:[%s9085_s3 + $0x4e8] sm:$0xff] }
 0x240   :  { %5334 = vmatprep.subr.bf16.mxu0 %v5333_v52  ;;  %5462 = vmatprep.subr.bf16.mxu1 %v5461_v53  ;;  %v5471_v52 = vpack.c.bf16 %v4047_v47, %v4043_v46  ;;  %v4053_v53 = vld [vmem:[%s9085_s3 + $0x4e0] sm:$0xff]  ;;  %v5345_v58 = vpack.c.bf16 %v4054_v49, %v4050_v34  ;;  %v4083_v34 = vld [vmem:[%s9085_s3 + $0x5d0] sm:$0xff] }
 0x241   :  { %v4087_v49 = vld [vmem:[%s9085_s3 + $0x5f0] sm:$0xff] }
 0x2d5   :  { %v3519_v63 = vpop.f32.mrb[0].mxu0  ;;  %v3847_v0 = vpop.f32.mrb[0].mxu1 }
 0x2d6   :  { %v3521_v3 = vpop.f32.mrb[1].mxu0  ;;  %v3849_v4 = vpop.f32.mrb[1].mxu1 }
 0x2d7   :  { %v3858_v5 = vcombine.low %v3519_v63, %v3521_v3  ;;  %v3859_v6 = vcombine.low %v3847_v0, %v3849_v4  ;;  %v3523_v7 = vpop.f32.mrb[2].mxu0  ;;  %v3851_v8 = vpop.f32.mrb[2].mxu1  ;;  %v4062_v63 = vld [vmem:[%s9085_s3 + $0x528] sm:$0xff]  ;;  %v4060_v0 = vld [vmem:[%s9085_s3 + $0x518] sm:$0xff]  ;;  %v5475_v3 = vpack.c.bf16 %v4055_v61, %v4051_v60  ;;  %v4057_v4 = vld [vmem:[%s9085_s3 + $0x500] sm:$0xff]  ;;  %v5365_v60 = vpack.c.bf16 %v4094_v50, %v4090_v48 }
 0x2d8   :  { %v3524_v9 = vpop.f32.mrb[3].mxu0  ;;  %v3852_v10 = vpop.f32.mrb[3].mxu1  ;;  %v4059_v8 = vld [vmem:[%s9085_s3 + $0x510] sm:$0xff] }
 0x2d9   :  { %v3893_v11 = vadd.f32 %v3889_v1, %v3858_v5  ;;  %v3894_v13 = vadd.f32 %v3890_v2, %v3859_v6  ;;  %v4064_v1 = vld [vmem:[%s9085_s3 + $0x538] sm:$0xff]  ;;  %v5347_v2 = vpack.c.bf16 %v4053_v53, %v4049_v39  ;;  %v4061_v5 = vld [vmem:[%s9085_s3 + $0x520] sm:$0xff]  ;;  %v5349_v6 = vpack.c.bf16 %v4062_v63, %v4058_v62  ;;  %v4063_v9 = vld [vmem:[%s9085_s3 + $0x530] sm:$0xff] }
 0x2da   :  { %v5477_v7 = vpack.c.bf16 %v4064_v1, %v4060_v0  ;;  %v4066_v10 = vld [vmem:[%s9085_s3 + $0x548] sm:$0xff]  ;;  %v5351_v14 = vpack.c.bf16 %v4061_v5, %v4057_v4  ;;  %v5479_v15 = vpack.c.bf16 %v4063_v9, %v4059_v8  ;;  %v5491_v53 = vpack.c.bf16 %v4087_v49, %v4083_v34  ;;  %v4091_v62 = vld [vmem:[%s9085_s3 + $0x610] sm:$0xff] }
 0x2db   :  { %v3895_v17 = vmax.f32 %v3893_v11, 0.0  ;;  %v8511_v20 = vmax.f32 %v3894_v13, 0.0  ;;  %v4070_v11 = vld [vmem:[%s9085_s3 + $0x568] sm:$0xff]  ;;  %v4068_v13 = vld [vmem:[%s9085_s3 + $0x558] sm:$0xff]  ;;  %v4095_v63 = vld [vmem:[%s9085_s3 + $0x630] sm:$0xff] }
 0x2dc   :  { %v5353_v18 = vpack.c.bf16 %v4070_v11, %v4066_v10  ;;  %v5481_v21 = vpack.c.bf16 %v4072_v45, %v4068_v13  ;;  %v4098_v0 = vld [vmem:[%s9085_s3 + $0x648] sm:$0xff]  ;;  %v5495_v5 = vpack.c.bf16 %v4095_v63, %v4091_v62  ;;  %v4099_v10 = vld [vmem:[%s9085_s3 + $0x650] sm:$0xff] }
 0x2dd   :  { %v4177_v25 = vcombine.high %v3895_v17, %v3895_v17  ;;  %v4178_v38 = vcombine.high %v8511_v20, %v8511_v20  ;;  %v4102_v1 = vld [vmem:[%s9085_s3 + $0x668] sm:$0xff]  ;;  %v4103_v11 = vld [vmem:[%s9085_s3 + $0x670] sm:$0xff] }
 0x2de   :  { %v5369_v8 = vpack.c.bf16 %v4102_v1, %v4098_v0  ;;  %v4106_v13 = vld [vmem:[%s9085_s3 + $0x688] sm:$0xff]  ;;  %v4123_v48 = vld [vmem:[%s9085_s3 + $0x710] sm:$0xff] }
 0x2df   :  { %4245 = vmatprep.mubr.f32.mxu0 %v4177_v25  ;;  %4387 = vmatprep.mubr.f32.mxu1 %v4177_v25  ;;  %v4074_v25 = vld [vmem:[%s9085_s3 + $0x588] sm:$0xff]  ;;  %v4127_v50 = vld [vmem:[%s9085_s3 + $0x730] sm:$0xff] }
 0x2e0   :  { %4246 = vmatmul.mubr.f32.vlgmr.msra.gmra.mrb[4].mxu0 %v3895_v17  ;;  %4388 = vmatmul.mubr.f32.vlgmr.msra.gmra.mrb[4].mxu1 %v3895_v17  ;;  %v4069_v17 = vld [vmem:[%s9085_s3 + $0x560] sm:$0xff]  ;;  %v4110_v45 = vld [vmem:[%s9085_s3 + $0x6a8] sm:$0xff]  ;;  %v4131_v0 = vld [vmem:[%s9085_s3 + $0x750] sm:$0xff] }
 0x2e1   :  { %5336 = vmatpush1.bf16.msra.mxu0 %v5335_v12  ;;  %5464 = vmatpush1.bf16.msra.mxu1 %v5463_v27  ;;  %v4078_v12 = vld [vmem:[%s9085_s3 + $0x5a8] sm:$0xff]  ;;  %v4076_v27 = vld [vmem:[%s9085_s3 + $0x598] sm:$0xff]  ;;  %v5355_v30 = vpack.c.bf16 %v4069_v17, %v4065_v16  ;;  %v5499_v17 = vpack.c.bf16 %v4103_v11, %v4099_v10  ;;  %v5373_v23 = vpack.c.bf16 %v4110_v45, %v4106_v13  ;;  %v4135_v1 = vld [vmem:[%s9085_s3 + $0x770] sm:$0xff] }
 0x2e2   :  { %4316 = vmatprep.mubr.f32.mxu0 %v4178_v38  ;;  %4458 = vmatprep.mubr.f32.mxu1 %v4178_v38  ;;  %v4086_v38 = vld [vmem:[%s9085_s3 + $0x5e8] sm:$0xff]  ;;  %v4139_v13 = vld [vmem:[%s9085_s3 + $0x790] sm:$0xff] }
 0x2e3   :  { %5338 = vmatprep.subr.bf16.mxu0 %v5337_v33  ;;  %5466 = vmatprep.subr.bf16.mxu1 %v5465_v26  ;;  %v5357_v33 = vpack.c.bf16 %v4078_v12, %v4074_v25  ;;  %v5485_v26 = vpack.c.bf16 %v4080_v28, %v4076_v27  ;;  %v5361_v46 = vpack.c.bf16 %v4086_v38, %v4082_v37  ;;  %v4107_v25 = vld [vmem:[%s9085_s3 + $0x690] sm:$0xff]  ;;  %v4114_v27 = vld [vmem:[%s9085_s3 + $0x6c8] sm:$0xff] }
 0x2e4   :  { %v4111_v12 = vld [vmem:[%s9085_s3 + $0x6b0] sm:$0xff]  ;;  %v4118_v28 = vld [vmem:[%s9085_s3 + $0x6e8] sm:$0xff] }
 0x2e5   :  { %5340 = vmatpush1.bf16.msra.mxu0 %v5339_v40  ;;  %5468 = vmatpush1.bf16.msra.mxu1 %v5467_v41  ;;  %v4084_v40 = vld [vmem:[%s9085_s3 + $0x5d8] sm:$0xff]  ;;  %v5503_v32 = vpack.c.bf16 %v4111_v12, %v4107_v25  ;;  %v5377_v36 = vpack.c.bf16 %v4118_v28, %v4114_v27  ;;  %v4115_v37 = vld [vmem:[%s9085_s3 + $0x6d0] sm:$0xff] }
 0x2e6   :  { %5342 = vmatprep.subr.bf16.mxu0 %v5341_v44  ;;  %5470 = vmatprep.subr.bf16.mxu1 %v5469_v35  ;;  %v4088_v41 = vld [vmem:[%s9085_s3 + $0x5f8] sm:$0xff]  ;;  %v4081_v44 = vld [vmem:[%s9085_s3 + $0x5c0] sm:$0xff]  ;;  %v4119_v38 = vld [vmem:[%s9085_s3 + $0x6f0] sm:$0xff] }
 0x2e7   :  { %v4085_v35 = vld [vmem:[%s9085_s3 + $0x5e0] sm:$0xff]  ;;  %v5489_v47 = vpack.c.bf16 %v4088_v41, %v4084_v40  ;;  %v4122_v40 = vld [vmem:[%s9085_s3 + $0x708] sm:$0xff]  ;;  %v4143_v45 = vld [vmem:[%s9085_s3 + $0x7b0] sm:$0xff] }
 0x2e8   :  { %v5363_v39 = vpack.c.bf16 %v4085_v35, %v4081_v44  ;;  %v4126_v41 = vld [vmem:[%s9085_s3 + $0x728] sm:$0xff]  ;;  %v5507_v35 = vpack.c.bf16 %v4119_v38, %v4115_v37  ;;  %v4147_v27 = vld [vmem:[%s9085_s3 + $0x7d0] sm:$0xff] }
 0x2e9   :  { %5344 = vmatpush1.bf16.msra.mxu0 %v5343_v51  ;;  %5472 = vmatpush1.bf16.msra.mxu1 %v5471_v52  ;;  %v4092_v51 = vld [vmem:[%s9085_s3 + $0x618] sm:$0xff]  ;;  %v5381_v34 = vpack.c.bf16 %v4126_v41, %v4122_v40  ;;  %v4151_v28 = vld [vmem:[%s9085_s3 + $0x7f0] sm:$0xff]  ;;  %v4501_v40 = vld [vmem:[%s9087_s5 + $0x100] sm:$0xff] }
 0x2ea   :  { %5346 = vmatprep.subr.bf16.mxu0 %v5345_v58  ;;  %5474 = vmatprep.subr.bf16.mxu1 %v5473_v59  ;;  %v4096_v52 = vld [vmem:[%s9085_s3 + $0x638] sm:$0xff]  ;;  %v4089_v58 = vld [vmem:[%s9085_s3 + $0x600] sm:$0xff]  ;;  %v4502_v41 = vld [vmem:[%s9087_s5 + $0x108] sm:$0xff] }
 0x2eb   :  { %v4093_v59 = vld [vmem:[%s9085_s3 + $0x620] sm:$0xff]  ;;  %v5493_v61 = vpack.c.bf16 %v4096_v52, %v4092_v51  ;;  %v4130_v51 = vld [vmem:[%s9085_s3 + $0x748] sm:$0xff] }
 0x2ec   :  { %v5367_v4 = vpack.c.bf16 %v4093_v59, %v4089_v58  ;;  %v4134_v52 = vld [vmem:[%s9085_s3 + $0x768] sm:$0xff]  ;;  %v5511_v59 = vpack.c.bf16 %v4127_v50, %v4123_v48 }
 0x2ed   :  { %5348 = vmatpush1.bf16.msra.mxu0 %v5347_v2  ;;  %5476 = vmatpush1.bf16.msra.mxu1 %v5475_v3  ;;  %v4100_v2 = vld [vmem:[%s9085_s3 + $0x658] sm:$0xff]  ;;  %v5385_v62 = vpack.c.bf16 %v4134_v52, %v4130_v51  ;;  %v4503_v51 = vld [vmem:[%s9087_s5 + $0x110] sm:$0xff] }
 0x2ee   :  { %5350 = vmatprep.subr.bf16.mxu0 %v5349_v6  ;;  %5478 = vmatprep.subr.bf16.mxu1 %v5477_v7  ;;  %v4104_v3 = vld [vmem:[%s9085_s3 + $0x678] sm:$0xff]  ;;  %v4097_v6 = vld [vmem:[%s9085_s3 + $0x640] sm:$0xff] }
 0x2ef   :  { %v4101_v7 = vld [vmem:[%s9085_s3 + $0x660] sm:$0xff]  ;;  %v5497_v9 = vpack.c.bf16 %v4104_v3, %v4100_v2  ;;  %v4138_v2 = vld [vmem:[%s9085_s3 + $0x788] sm:$0xff]  ;;  %v4504_v52 = vld [vmem:[%s9087_s5 + $0x118] sm:$0xff] }
 0x2f0   :  { %v5371_v16 = vpack.c.bf16 %v4101_v7, %v4097_v6  ;;  %v4142_v3 = vld [vmem:[%s9085_s3 + $0x7a8] sm:$0xff]  ;;  %v5515_v7 = vpack.c.bf16 %v4135_v1, %v4131_v0 }
 0x2f1   :  { %5352 = vmatpush1.bf16.msra.mxu0 %v5351_v14  ;;  %5480 = vmatpush1.bf16.msra.mxu1 %v5479_v15  ;;  %v4108_v14 = vld [vmem:[%s9085_s3 + $0x698] sm:$0xff]  ;;  %v5389_v10 = vpack.c.bf16 %v4142_v3, %v4138_v2  ;;  %v4506_v2 = vld [vmem:[%s9087_s5 + $0x128] sm:$0xff]  ;;  %v4491_v3 = vld [vmem:[%s9087_s5 + $0xb0] sm:$0xff] }
 0x2f2   :  { %5354 = vmatprep.subr.bf16.mxu0 %v5353_v18  ;;  %5482 = vmatprep.subr.bf16.mxu1 %v5481_v21  ;;  %v4112_v15 = vld [vmem:[%s9085_s3 + $0x6b8] sm:$0xff]  ;;  %v4105_v18 = vld [vmem:[%s9085_s3 + $0x680] sm:$0xff] }
 0x2f3   :  { %v4109_v21 = vld [vmem:[%s9085_s3 + $0x6a0] sm:$0xff]  ;;  %v5501_v19 = vpack.c.bf16 %v4112_v15, %v4108_v14  ;;  %v4146_v14 = vld [vmem:[%s9085_s3 + $0x7c8] sm:$0xff] }
 0x2f4   :  { %v5375_v22 = vpack.c.bf16 %v4109_v21, %v4105_v18  ;;  %v4150_v15 = vld [vmem:[%s9085_s3 + $0x7e8] sm:$0xff]  ;;  %v5519_v21 = vpack.c.bf16 %v4143_v45, %v4139_v13  ;;  %v4507_v45 = vld [vmem:[%s9087_s5 + $0x130] sm:$0xff] }
 0x2f5   :  { %5356 = vmatpush1.bf16.msra.mxu0 %v5355_v30  ;;  %5484 = vmatpush1.bf16.msra.mxu1 %v5483_v31  ;;  %v4116_v30 = vld [vmem:[%s9085_s3 + $0x6d8] sm:$0xff]  ;;  %v5393_v25 = vpack.c.bf16 %v4150_v15, %v4146_v14  ;;  %v4493_v15 = vld [vmem:[%s9087_s5 + $0xc0] sm:$0xff] }
 0x2f6   :  { %5358 = vmatprep.subr.bf16.mxu0 %v5357_v33  ;;  %5486 = vmatprep.subr.bf16.mxu1 %v5485_v26  ;;  %v4120_v31 = vld [vmem:[%s9085_s3 + $0x6f8] sm:$0xff]  ;;  %v4113_v33 = vld [vmem:[%s9085_s3 + $0x6c0] sm:$0xff] }
 0x2f7   :  { %v4117_v26 = vld [vmem:[%s9085_s3 + $0x6e0] sm:$0xff]  ;;  %v5505_v24 = vpack.c.bf16 %v4120_v31, %v4116_v30  ;;  %v4486_v31 = vld [vmem:[%s9087_s5 + $0x88] sm:$0xff]  ;;  %v4508_v14 = vld [vmem:[%s9087_s5 + $0x138] sm:$0xff] }
 0x2f8   :  { %v5379_v44 = vpack.c.bf16 %v4117_v26, %v4113_v33  ;;  %v4485_v30 = vld [vmem:[%s9087_s5 + $0x80] sm:$0xff]  ;;  %v5523_v26 = vpack.c.bf16 %v4151_v28, %v4147_v27 }
 0x2f9   :  { %5360 = vmatpush1.bf16.msra.mxu0 %v5359_v29  ;;  %5488 = vmatpush1.bf16.msra.mxu1 %v5487_v42  ;;  %v4124_v29 = vld [vmem:[%s9085_s3 + $0x718] sm:$0xff]  ;;  %v5525_v37 = vpack.c.bf16 %v4486_v31, %v4485_v30  ;;  %v4509_v28 = vld [vmem:[%s9087_s5 + $0x140] sm:$0xff]  ;;  %v4510_v30 = vld [vmem:[%s9087_s5 + $0x148] sm:$0xff] }
 0x2fa   :  { %5362 = vmatprep.subr.bf16.mxu0 %v5361_v46  ;;  %5490 = vmatprep.subr.bf16.mxu1 %v5489_v47  ;;  %v4128_v42 = vld [vmem:[%s9085_s3 + $0x738] sm:$0xff]  ;;  %v4121_v46 = vld [vmem:[%s9085_s3 + $0x700] sm:$0xff]  ;;  %v4495_v31 = vld [vmem:[%s9087_s5 + $0xd0] sm:$0xff] }
 0x2fb   :  { %v4125_v47 = vld [vmem:[%s9085_s3 + $0x720] sm:$0xff]  ;;  %v5509_v49 = vpack.c.bf16 %v4128_v42, %v4124_v29  ;;  %v4487_v29 = vld [vmem:[%s9087_s5 + $0x90] sm:$0xff]  ;;  %v4488_v42 = vld [vmem:[%s9087_s5 + $0x98] sm:$0xff] }
 0x2fc   :  { %v5383_v58 = vpack.c.bf16 %v4125_v47, %v4121_v46  ;;  %v5559_v47 = vpack.c.bf16 %v4502_v41, %v4501_v40  ;;  %v5529_v48 = vpack.c.bf16 %v4488_v42, %v4487_v29  ;;  %v4511_v41 = vld [vmem:[%s9087_s5 + $0x150] sm:$0xff]  ;;  %v4512_v29 = vld [vmem:[%s9087_s5 + $0x158] sm:$0xff]  ;;  %v4497_v42 = vld [vmem:[%s9087_s5 + $0xe0] sm:$0xff] }
 0x2fd   :  { %5364 = vmatpush1.bf16.msra.mxu0 %v5363_v39  ;;  %5492 = vmatpush1.bf16.msra.mxu1 %v5491_v53  ;;  %v4132_v39 = vld [vmem:[%s9085_s3 + $0x758] sm:$0xff] }
 0x2fe   :  { %5366 = vmatprep.subr.bf16.mxu0 %v5365_v60  ;;  %5494 = vmatprep.subr.bf16.mxu1 %v5493_v61  ;;  %v4136_v53 = vld [vmem:[%s9085_s3 + $0x778] sm:$0xff]  ;;  %v4129_v60 = vld [vmem:[%s9085_s3 + $0x740] sm:$0xff] }
 0x2ff   :  { %v4133_v61 = vld [vmem:[%s9085_s3 + $0x760] sm:$0xff]  ;;  %v5513_v63 = vpack.c.bf16 %v4136_v53, %v4132_v39  ;;  %v4490_v53 = vld [vmem:[%s9087_s5 + $0xa8] sm:$0xff] }
 0x300   :  { %v5387_v6 = vpack.c.bf16 %v4133_v61, %v4129_v60  ;;  %v4489_v39 = vld [vmem:[%s9087_s5 + $0xa0] sm:$0xff]  ;;  %v5563_v61 = vpack.c.bf16 %v4504_v52, %v4503_v51  ;;  %v4482_v51 = vld [vmem:[%s9087_s5 + $0x68] sm:$0xff] }
 0x301   :  { %5368 = vmatpush1.bf16.msra.mxu0 %v5367_v4  ;;  %5496 = vmatpush1.bf16.msra.mxu1 %v5495_v5  ;;  %v4140_v4 = vld [vmem:[%s9085_s3 + $0x798] sm:$0xff]  ;;  %v5533_v0 = vpack.c.bf16 %v4490_v53, %v4489_v39  ;;  %v4513_v52 = vld [vmem:[%s9087_s5 + $0x160] sm:$0xff]  ;;  %v4514_v53 = vld [vmem:[%s9087_s5 + $0x168] sm:$0xff] }
 0x302   :  { %5370 = vmatprep.subr.bf16.mxu0 %v5369_v8  ;;  %5498 = vmatprep.subr.bf16.mxu1 %v5497_v9  ;;  %v4144_v5 = vld [vmem:[%s9085_s3 + $0x7b8] sm:$0xff]  ;;  %v4137_v8 = vld [vmem:[%s9085_s3 + $0x780] sm:$0xff] }
 0x303   :  { %v4141_v9 = vld [vmem:[%s9085_s3 + $0x7a0] sm:$0xff]  ;;  %v5517_v11 = vpack.c.bf16 %v4144_v5, %v4140_v4  ;;  %v4492_v4 = vld [vmem:[%s9087_s5 + $0xb8] sm:$0xff]  ;;  %v4523_v5 = vld [vmem:[%s9087_s5 + $0x1b0] sm:$0xff] }
 0x304   :  { %v5391_v18 = vpack.c.bf16 %v4141_v9, %v4137_v8  ;;  %v4475_v9 = vld [vmem:[%s9087_s5 + $0x30] sm:$0xff] }
 0x305   :  { %5372 = vmatpush1.bf16.msra.mxu0 %v5371_v16  ;;  %5500 = vmatpush1.bf16.msra.mxu1 %v5499_v17  ;;  %v4148_v16 = vld [vmem:[%s9085_s3 + $0x7d8] sm:$0xff] }
 0x306   :  { %5374 = vmatprep.subr.bf16.mxu0 %v5373_v23  ;;  %5502 = vmatprep.subr.bf16.mxu1 %v5501_v19  ;;  %v4152_v17 = vld [vmem:[%s9085_s3 + $0x7f8] sm:$0xff]  ;;  %v4145_v23 = vld [vmem:[%s9085_s3 + $0x7c0] sm:$0xff] }
 0x307   :  { %v4149_v19 = vld [vmem:[%s9085_s3 + $0x7e0] sm:$0xff]  ;;  %v5521_v12 = vpack.c.bf16 %v4152_v17, %v4148_v16  ;;  %v4494_v16 = vld [vmem:[%s9087_s5 + $0xc8] sm:$0xff] }
 0x308   :  { %v5395_v33 = vpack.c.bf16 %v4149_v19, %v4145_v23  ;;  %v4525_v17 = vld [vmem:[%s9087_s5 + $0x1c0] sm:$0xff]  ;;  %v5571_v23 = vpack.c.bf16 %v4508_v14, %v4507_v45 }
 0x309   :  { %5376 = vmatpush1.bf16.msra.mxu0 %v5375_v22  ;;  %5504 = vmatpush1.bf16.msra.mxu1 %v5503_v32  ;;  %v4517_v22 = vld [vmem:[%s9087_s5 + $0x180] sm:$0xff]  ;;  %v4518_v32 = vld [vmem:[%s9087_s5 + $0x188] sm:$0xff] }
 0x30a   :  { %5378 = vmatprep.subr.bf16.mxu0 %v5377_v36  ;;  %5506 = vmatprep.subr.bf16.mxu1 %v5505_v24  ;;  %v4469_v36 = vld [vmem:[%s9087_s5] sm:$0xff]  ;;  %v4470_v24 = vld [vmem:[%s9087_s5 + $0x8] sm:$0xff]  ;;  %v5557_v38 = vpack.c.bf16 %v4518_v32, %v4517_v22  ;;  %v4496_v22 = vld [vmem:[%s9087_s5 + $0xd8] sm:$0xff] }
 0x30b   :  { %v5527_v46 = vpack.c.bf16 %v4470_v24, %v4469_v36  ;;  %v4477_v19 = vld [vmem:[%s9087_s5 + $0x40] sm:$0xff]  ;;  %v4527_v32 = vld [vmem:[%s9087_s5 + $0x1d0] sm:$0xff]  ;;  %v5575_v36 = vpack.c.bf16 %v4510_v30, %v4509_v28 }
 0x30c   :  { %v4479_v24 = vld [vmem:[%s9087_s5 + $0x50] sm:$0xff] }
 0x30d   :  { %5380 = vmatpush1.bf16.msra.mxu0 %v5379_v44  ;;  %5508 = vmatpush1.bf16.msra.mxu1 %v5507_v35  ;;  %v4519_v44 = vld [vmem:[%s9087_s5 + $0x190] sm:$0xff]  ;;  %v4520_v35 = vld [vmem:[%s9087_s5 + $0x198] sm:$0xff] }
 0x30e   :  { %5382 = vmatprep.subr.bf16.mxu0 %v5381_v34  ;;  %5510 = vmatprep.subr.bf16.mxu1 %v5509_v49  ;;  %v4471_v34 = vld [vmem:[%s9087_s5 + $0x10] sm:$0xff]  ;;  %v4472_v49 = vld [vmem:[%s9087_s5 + $0x18] sm:$0xff]  ;;  %v5561_v50 = vpack.c.bf16 %v4520_v35, %v4519_v44  ;;  %v4498_v44 = vld [vmem:[%s9087_s5 + $0xe8] sm:$0xff] }
 0x30f   :  { %v5531_v60 = vpack.c.bf16 %v4472_v49, %v4471_v34  ;;  %v4529_v35 = vld [vmem:[%s9087_s5 + $0x1e0] sm:$0xff]  ;;  %v5579_v34 = vpack.c.bf16 %v4512_v29, %v4511_v41  ;;  %v5549_v49 = vpack.c.bf16 %v4498_v44, %v4497_v42 }
 0x311   :  { %5384 = vmatpush1.bf16.msra.mxu0 %v5383_v58  ;;  %5512 = vmatpush1.bf16.msra.mxu1 %v5511_v59  ;;  %v4521_v58 = vld [vmem:[%s9087_s5 + $0x1a0] sm:$0xff]  ;;  %v4522_v59 = vld [vmem:[%s9087_s5 + $0x1a8] sm:$0xff] }
 0x312   :  { %5386 = vmatprep.subr.bf16.mxu0 %v5385_v62  ;;  %5514 = vmatprep.subr.bf16.mxu1 %v5513_v63  ;;  %v4473_v62 = vld [vmem:[%s9087_s5 + $0x20] sm:$0xff]  ;;  %v4474_v63 = vld [vmem:[%s9087_s5 + $0x28] sm:$0xff]  ;;  %v5565_v1 = vpack.c.bf16 %v4522_v59, %v4521_v58  ;;  %v5583_v58 = vpack.c.bf16 %v4514_v53, %v4513_v52  ;;  %v4499_v59 = vld [vmem:[%s9087_s5 + $0xf0] sm:$0xff] }
 0x315   :  { %5388 = vmatpush1.bf16.msra.mxu0 %v5387_v6  ;;  %5516 = vmatpush1.bf16.msra.mxu1 %v5515_v7  ;;  %v4524_v6 = vld [vmem:[%s9087_s5 + $0x1b8] sm:$0xff]  ;;  %v5535_v7 = vpack.c.bf16 %v4474_v63, %v4473_v62 }
 0x316   :  { %5390 = vmatprep.subr.bf16.mxu0 %v5389_v10  ;;  %5518 = vmatprep.subr.bf16.mxu1 %v5517_v11  ;;  %v4476_v10 = vld [vmem:[%s9087_s5 + $0x38] sm:$0xff]  ;;  %v5537_v11 = vpack.c.bf16 %v4492_v4, %v4491_v3  ;;  %v5569_v13 = vpack.c.bf16 %v4524_v6, %v4523_v5  ;;  %v4515_v3 = vld [vmem:[%s9087_s5 + $0x170] sm:$0xff]  ;;  %v4153_v6 = vld [vmem:[%s9088_s4] sm:$0xf] }
 0x317   :  { %v4532_v63 = vld [vmem:[%s9087_s5 + $0x1f8] sm:$0xff] }
 0x318   :  { %v4516_v4 = vld [vmem:[%s9087_s5 + $0x178] sm:$0xff] }
 0x319   :  { %5392 = vmatpush1.bf16.msra.mxu0 %v5391_v18  ;;  %5520 = vmatpush1.bf16.msra.mxu1 %v5519_v21  ;;  %v4526_v18 = vld [vmem:[%s9087_s5 + $0x1c8] sm:$0xff]  ;;  %v5539_v21 = vpack.c.bf16 %v4476_v10, %v4475_v9  ;;  %v5587_v5 = vpack.c.bf16 %v4516_v4, %v4515_v3  ;;  %v4162_v9 = vrot.slane %v4153_v6, %v3879_v55 }
 0x31a   :  { %5394 = vmatprep.subr.bf16.mxu0 %v5393_v25  ;;  %5522 = vmatprep.subr.bf16.mxu1 %v5521_v12  ;;  %v4478_v25 = vld [vmem:[%s9087_s5 + $0x48] sm:$0xff]  ;;  %v5541_v12 = vpack.c.bf16 %v4494_v16, %v4493_v15  ;;  %v5573_v27 = vpack.c.bf16 %v4526_v18, %v4525_v17  ;;  %v4170_v10 = vrot.slane %v4153_v6, %v3887_v57 }
 0x31d   :  { %5396 = vmatpush1.bf16.msra.mxu0 %v5395_v33  ;;  %5524 = vmatpush1.bf16.msra.mxu1 %v5523_v26  ;;  %v4528_v33 = vld [vmem:[%s9087_s5 + $0x1d8] sm:$0xff]  ;;  %v5543_v26 = vpack.c.bf16 %v4478_v25, %v4477_v19 }
 0x31e   :  { %5526 = vmatprep.subr.bf16.mxu0 %v5525_v37  ;;  %5558 = vmatprep.subr.bf16.mxu1 %v5557_v38  ;;  %v4480_v37 = vld [vmem:[%s9087_s5 + $0x58] sm:$0xff]  ;;  %v5545_v38 = vpack.c.bf16 %v4496_v22, %v4495_v31  ;;  %v5577_v40 = vpack.c.bf16 %v4528_v33, %v4527_v32 }
 0x320   :  { %4317 = vmatmul.mubr.f32.vlgmr.msra.gmra.mrb[4].mxu0 %v8511_v20  ;;  %4459 = vmatmul.mubr.f32.vlgmr.msra.gmra.mrb[4].mxu1 %v8511_v20  ;;  %v4505_v20 = vld [vmem:[%s9087_s5 + $0x120] sm:$0xff] }
 0x321   :  { %5528 = vmatpush3.bf16.msra.mxu0 %v5527_v46  ;;  %5560 = vmatpush3.bf16.msra.mxu1 %v5559_v47  ;;  %v5567_v8 = vpack.c.bf16 %v4506_v2, %v4505_v20  ;;  %v4530_v46 = vld [vmem:[%s9087_s5 + $0x1e8] sm:$0xff]  ;;  %v5547_v47 = vpack.c.bf16 %v4480_v37, %v4479_v24 }
 0x322   :  { %5530 = vmatprep.subr.bf16.mxu0 %v5529_v48  ;;  %5562 = vmatprep.subr.bf16.mxu1 %v5561_v50  ;;  %v5581_v48 = vpack.c.bf16 %v4530_v46, %v4529_v35  ;;  %v4481_v50 = vld [vmem:[%s9087_s5 + $0x60] sm:$0xff] }
 0x323   :  { %v5551_v39 = vpack.c.bf16 %v4482_v51, %v4481_v50 }
 0x325   :  { %5532 = vmatpush3.bf16.msra.mxu0 %v5531_v60  ;;  %5564 = vmatpush3.bf16.msra.mxu1 %v5563_v61  ;;  %v4500_v60 = vld [vmem:[%s9087_s5 + $0xf8] sm:$0xff]  ;;  %v4531_v61 = vld [vmem:[%s9087_s5 + $0x1f0] sm:$0xff] }
 0x326   :  { %5534 = vmatprep.subr.bf16.mxu0 %v5533_v0  ;;  %5566 = vmatprep.subr.bf16.mxu1 %v5565_v1  ;;  %v5553_v62 = vpack.c.bf16 %v4500_v60, %v4499_v59  ;;  %v4483_v0 = vld [vmem:[%s9087_s5 + $0x70] sm:$0xff]  ;;  %v4484_v1 = vld [vmem:[%s9087_s5 + $0x78] sm:$0xff]  ;;  %v5585_v20 = vpack.c.bf16 %v4532_v63, %v4531_v61 }
 0x327   :  { %v5555_v2 = vpack.c.bf16 %v4484_v1, %v4483_v0 }
 0x329   :  { %5536 = vmatpush3.bf16.msra.mxu0 %v5535_v7  ;;  %5568 = vmatpush3.bf16.msra.mxu1 %v5567_v8  ;;  %v4158_v7 = vrot.slane %v4153_v6, %v3875_v54  ;;  %v4166_v8 = vrot.slane %v4153_v6, %v3883_v56 }
 0x32a   :  { %5538 = vmatprep.subr.bf16.mxu0 %v5537_v11  ;;  %5570 = vmatprep.subr.bf16.mxu1 %v5569_v13 }
 0x32d   :  { %5540 = vmatpush3.bf16.msra.mxu0 %v5539_v21  ;;  %5572 = vmatpush3.bf16.msra.mxu1 %v5571_v23 }
 0x32e   :  { %5542 = vmatprep.subr.bf16.mxu0 %v5541_v12  ;;  %5574 = vmatprep.subr.bf16.mxu1 %v5573_v27 }
 0x331   :  { %5544 = vmatpush3.bf16.msra.mxu0 %v5543_v26  ;;  %5576 = vmatpush3.bf16.msra.mxu1 %v5575_v36 }
 0x332   :  { %5546 = vmatprep.subr.bf16.mxu0 %v5545_v38  ;;  %5578 = vmatprep.subr.bf16.mxu1 %v5577_v40 }
 0x335   :  { %5548 = vmatpush3.bf16.msra.mxu0 %v5547_v47  ;;  %5580 = vmatpush3.bf16.msra.mxu1 %v5579_v34 }
 0x336   :  { %5550 = vmatprep.subr.bf16.mxu0 %v5549_v49  ;;  %5582 = vmatprep.subr.bf16.mxu1 %v5581_v48 }
 0x339   :  { %5552 = vmatpush3.bf16.msra.mxu0 %v5551_v39  ;;  %5584 = vmatpush3.bf16.msra.mxu1 %v5583_v58 }
 0x33a   :  { %5554 = vmatprep.subr.bf16.mxu0 %v5553_v62  ;;  %5586 = vmatprep.subr.bf16.mxu1 %v5585_v20 }
 0x33d   :  { %5556 = vmatpush3.bf16.msra.mxu0 %v5555_v2  ;;  %5588 = vmatpush3.bf16.msra.mxu1 %v5587_v5 }
 0x3f3   :  { %v4318_v11 = vpop.f32.mrb[4].mxu0  ;;  %v4460_v13 = vpop.f32.mrb[4].mxu1 }
 0x3f4   :  { %v5589_v45 = vadd.f32 %v4318_v11, %v4158_v7  ;;  %v5591_v14 = vadd.f32 %v4460_v13, %v4166_v8  ;;  %v4320_v15 = vpop.f32.mrb[5].mxu0  ;;  %v4462_v16 = vpop.f32.mrb[5].mxu1 }
 0x3f5   :  { %v5590_v17 = vadd.f32 %v4320_v15, %v4162_v9  ;;  %v5592_v18 = vadd.f32 %v4462_v16, %v4170_v10 }
 0x3f6   :  { %v4465_v54 = vmax.f32 %v5589_v45, 0.0  ;;  %v4467_v19 = vmax.f32 %v5591_v14, 0.0 }
 0x3f7   :  { %v4466_v21 = vmax.f32 %v5590_v17, 0.0  ;;  %v4468_v23 = vmax.f32 %v5592_v18, 0.0 }
 0x3f9   :  { %4604 = vmatprep.mubr.f32.mxu0 %v4466_v21  ;;  %4674 = vmatprep.mubr.f32.mxu1 %v4468_v23 }
 0x3fa   :  { %4605 = vmatmul.mubr.f32.vlgmr.msra.gmra.mrb[6].mxu0 %v4465_v54  ;;  %4675 = vmatmul.mubr.f32.vlgmr.msra.gmra.mrb[6].mxu1 %v4467_v19 }
 0x4cd   :  { %v5231_v55 = vpop.f32.mrb[6].mxu0  ;;  %v5266_v56 = vpop.f32.mrb[6].mxu1 }
 0x4ce   :  { %v5232_v57 = vpop.f32.mrb[7].mxu0  ;;  %v5267_v25 = vpop.f32.mrb[7].mxu1 }
 0x4cf   :  { %v5233_v12 = vadd.f32 %v5232_v57, %v5231_v55  ;;  %v5268_v27 = vadd.f32 %v5267_v25, %v5266_v56 }
 0x4d1   :  { %v4607_v28 = vadd.f32 %v5233_v12, %v5198_v43 }
 0x4d3   :  { %v4677_v30 = vadd.f32 %v5268_v27, %v4607_v28 }
 0x4d5   :  { %4681 = vst.msk [vmem:[%s9090_s7] sm:$0xf] %vm4680_vm0, %v4677_v30 }

</bundles_post_ra>
